<compile_context>
chip_gen: v7x
topology: tpu7x:2x2x1
jax: 0.10.0
libtpu: 0.0.40
codegen_flags: <defaults>
</compile_context>

<pallas_src>
import functools

import jax
import jax.numpy as jnp
from jax import lax
from jax.experimental import pallas as pl
from jax.experimental.pallas import tpu as pltpu


def _round_up(a, b):
    return (a + b - 1) // b * b


# --------------------------------------------------------------------------
# Pallas kernel: fused conv (K-stacked matmuls) + InstanceNorm2d + ReLU.
# One grid step = `nb` batch samples x one Cout tile.
# --------------------------------------------------------------------------
def _conv_norm_act_kernel(x_ref, w_ref, m_ref, o_ref, xs_ref, *,
                          nb, cin, cpad, h, w, kh, kw, ph, pw, ws, l_out,
                          base, inv_n, act, eps):
    # x_ref : (nb, cin, h*w)          f32   raw (unpadded) input rows
    # w_ref : (kh, tco, kw*cpad)      bf16  per-dy weights, (dx, ci)-minor
    # m_ref : (1, l_out)              f32   1.0 on valid wide columns else 0.0
    # o_ref : (nb, tco, l_out)        out   lane-dense "wide" output
    # xs_ref: (kw*cpad, base+hp*ws)   bf16  dx-shifted, zero-padded image rows
    #
    # Zero the scratch every grid step: the data regions below are rewritten
    # per sample at identical (static) offsets; the padding must stay 0.
    xs_ref[...] = jnp.zeros_like(xs_ref)
    mask = m_ref[...]                                    # (1, l_out)

    for b in range(nb):                                  # static unroll
        # ---- assembly: pad + f32->bf16 cast + horizontal shift, in VMEM ----
        # Variant dx holds the padded image shifted left by dx lanes, so its
        # dy-tap slice starts at the lane-aligned offset base + dy*ws.
        # TODO(synk): for large H, replace this unrolled per-row copy loop
        # with a fori_loop / strided copy to bound code size.
        for dx in range(kw):
            r0 = dx * cpad
            for hh in range(h):
                dst = base + (hh + ph) * ws + (pw - dx)
                xs_ref[r0:r0 + cin, dst:dst + w] = (
                    x_ref[b, :, hh * w:(hh + 1) * w].astype(xs_ref.dtype))

        # ---- conv: kh matmuls with K = kw*cpad, single f32 accumulation ----
        acc = None
        for dy in range(kh):
            s = base + dy * ws                           # multiple of 128
            rhs = xs_ref[:, s:s + l_out]                 # lane-aligned view
            part = jnp.dot(w_ref[dy], rhs,
                           preferred_element_type=jnp.float32)
            acc = part if acc is None else acc + part    # (tco, l_out) f32

        # ---- InstanceNorm2d (affine=False, biased var) + ReLU, masked ------
        mean = jnp.sum(acc * mask, axis=1, keepdims=True) * inv_n
        diff = (acc - mean) * mask                       # shifted two-pass var
        var = jnp.sum(diff * diff, axis=1, keepdims=True) * inv_n
        y = (acc - mean) * lax.rsqrt(var + eps)
        if act:
            y = jnp.maximum(y, 0.0)
        o_ref[b] = y.astype(o_ref.dtype)


# --------------------------------------------------------------------------
# Wrapper.
# --------------------------------------------------------------------------
def conv_norm_act(x, weight, bias=None, *, stride=1, groups=1, act=True,
                  eps=1e-5, out_dtype=jnp.bfloat16, batch_block=8,
                  cout_tile=None):
    """Fused Conv2d('same') + InstanceNorm2d(affine=False) + ReLU.

    x: (N, Cin, H, W) f32, weight: (Cout, Cin, KH, KW).  Returns NCHW in
    `out_dtype` (bf16 by default; stats/normalization are computed in f32).
    """
    if stride != 1 or groups != 1:
        # TODO(synk): stride > 1 / groups > 1 not implemented in the fused kernel.
        raise NotImplementedError("fused ConvNormAct supports stride=1, groups=1")
    del bias  # exactly cancelled by InstanceNorm2d(affine=False)

    N, Cin, H, W = x.shape
    Cout, Cin_w, KH, KW = weight.shape
    assert Cin_w == Cin

    ph, pw = KH // 2, KW // 2
    Hp, Wp = H + 2 * ph, W + 2 * pw
    Ho, Wo = Hp - KH + 1, Wp - KW + 1

    # Lane-aligned row stride for the in-VMEM padded layout and wide output.
    Ws = _round_up(Wp, 128)
    L_out = Ho * Ws
    min_off = ph * Ws + pw - (KW - 1)
    base = 0 if min_off >= 0 else _round_up(-min_off, 128)
    L_in = base + Hp * Ws                         # scratch lane extent
    cpad = _round_up(Cin, 8)                      # per-dx channel block rows

    # Samples per grid step: amortize per-step overhead, stay inside VMEM.
    out_bytes = Cout * L_out * jnp.dtype(out_dtype).itemsize
    in_bytes = Cin * H * W * x.dtype.itemsize
    nb = max(1, min(batch_block, N,
                    (6 * 1024 * 1024) // max(out_bytes + in_bytes, 1)))
    n_pad = _round_up(N, nb)

    # Optional Cout tiling (v7x VMEM budgets / megacore); stats are per
    # channel so no cross-tile reduction is needed.
    tco = Cout if cout_tile is None else cout_tile
    assert Cout % tco == 0 and (tco == Cout or tco % 8 == 0)

    x_in = x.reshape(N, Cin, H * W)               # free reshape, stays f32
    if n_pad != N:
        x_in = jnp.pad(x_in, ((0, n_pad - N), (0, 0), (0, 0)))

    # Weights as (KH, Cout, KW*cpad) bf16; inner order (dx, ci), ci zero-padded.
    w_t = jnp.transpose(weight, (2, 0, 3, 1))     # (KH, Cout, KW, Cin)
    w_t = jnp.pad(w_t, ((0, 0), (0, 0), (0, 0), (0, cpad - Cin)))
    w_r = w_t.reshape(KH, Cout, KW * cpad).astype(jnp.bfloat16)

    # Valid-column mask: columns [0, Wo) of every Ws-strided row.
    # (Kept as a tiny f32 input; in-kernel int-mod iota is avoided for
    # lowering robustness — this array is 1 row, fetched once.)
    col = jnp.arange(L_out, dtype=jnp.int32)
    mask = ((col % Ws) < Wo).astype(jnp.float32).reshape(1, L_out)

    kernel = functools.partial(
        _conv_norm_act_kernel, nb=nb, cin=Cin, cpad=cpad, h=H, w=W,
        kh=KH, kw=KW, ph=ph, pw=pw, ws=Ws, l_out=L_out, base=base,
        inv_n=1.0 / float(Ho * Wo), act=act, eps=eps)

    cost = pl.CostEstimate(
        flops=2 * N * Cout * Cin * KH * KW * Ho * Wo,
        transcendentals=N * Cout,
        bytes_accessed=int(x.size * x.dtype.itemsize + w_r.size * 2
                           + n_pad * Cout * L_out
                           * jnp.dtype(out_dtype).itemsize))

    out_wide = pl.pallas_call(
        kernel,
        out_shape=jax.ShapeDtypeStruct((n_pad, Cout, L_out), out_dtype),
        grid_spec=pltpu.PrefetchScalarGridSpec(
            num_scalar_prefetch=0,
            grid=(n_pad // nb, Cout // tco),
            in_specs=[
                pl.BlockSpec((nb, Cin, H * W), lambda n, j: (n, 0, 0)),
                pl.BlockSpec((KH, tco, KW * cpad), lambda n, j: (0, j, 0)),
                pl.BlockSpec((1, L_out), lambda n, j: (0, 0)),
            ],
            out_specs=pl.BlockSpec((nb, tco, L_out), lambda n, j: (n, j, 0)),
            scratch_shapes=[pltpu.VMEM((KW * cpad, L_in), jnp.bfloat16)],
        ),
        compiler_params=pltpu.CompilerParams(
            dimension_semantics=("parallel", "parallel"),
            vmem_limit_bytes=48 * 1024 * 1024),   # safe on v5e/v6e/v7x
        cost_estimate=cost,
    )(x_in, w_r, mask)

    # Strip batch / wide padding: (n_pad, Cout, L_out) -> (N, Cout, Ho, Wo).
    return out_wide[:N].reshape(N, Cout, Ho, Ws)[:, :, :, :Wo]


# --------------------------------------------------------------------------
# Pure-JAX reference (for correctness check).
# --------------------------------------------------------------------------
def _reference(x, weight, bias, stride, act, eps=1e-5):
    KH, KW = weight.shape[2], weight.shape[3]
    y = lax.conv_general_dilated(
        x, weight, window_strides=(stride, stride),
        padding=((KH // 2, KH // 2), (KW // 2, KW // 2)),
        dimension_numbers=("NCHW", "OIHW", "NCHW"))
    if bias is not None:
        y = y + bias.reshape(1, -1, 1, 1)
    mean = jnp.mean(y, axis=(2, 3), keepdims=True)
    var = jnp.mean((y - mean) ** 2, axis=(2, 3), keepdims=True)
    y = (y - mean) * lax.rsqrt(var + eps)
    return jnp.maximum(y, 0.0) if act else y


if __name__ == "__main__":
    # ConvNormAct(ins=4, outs=8, kernel=3) ->
    #   Conv2d(4, 8, 3, padding=1, bias=False) + InstanceNorm2d(8) + ReLU
    N, Cin, H, W = 2, 4, 16, 16
    Cout, KH, KW = 8, 3, 3

    key = jax.random.PRNGKey(0)
    kx, kwt = jax.random.split(key)
    x = jax.random.normal(kx, (N, Cin, H, W), dtype=jnp.float32)
    weight = jax.random.normal(kwt, (Cout, Cin, KH, KW), dtype=jnp.float32) * 0.1

    out = conv_norm_act(x, weight, None, stride=1, act=True)
    out = jax.block_until_ready(out)
    assert out.shape == (N, Cout, H, W), out.shape

    # Reference on bf16-rounded operands (the kernel feeds the MXU bf16
    # operands with f32 accumulation; normalization is f32 on both sides).
    x_r = x.astype(jnp.bfloat16).astype(jnp.float32)
    w_ref = weight.astype(jnp.bfloat16).astype(jnp.float32)
    ref = _reference(x_r, w_ref, None, 1, True)

    out_f32 = out.astype(jnp.float32)
    err = float(jnp.max(jnp.abs(out_f32 - ref)))
    # bf16 output store => ~2^-8 relative rounding on top of compute-order noise.
    assert bool(jnp.all(jnp.isfinite(out_f32))), "non-finite output"
    assert jnp.allclose(out_f32, ref, atol=2e-2, rtol=2e-2), err

    print("KERNEL_OK")
</pallas_src>

<mosaic_0001>
module attributes {stable_mosaic.version = 11 : i64} {
  func.func @_conv_norm_act_kernel(%arg0: i32, %arg1: i32, %arg2: memref<2x4x256xf32, #tpu.memory_space<vmem>>, %arg3: memref<3x8x24xbf16, #tpu.memory_space<vmem>>, %arg4: memref<1x2048xf32, #tpu.memory_space<vmem>>, %arg5: memref<2x8x2048xbf16, #tpu.memory_space<vmem>>, %arg6: memref<24x2304xbf16, #tpu.memory_space<vmem>>) attributes {dimension_semantics = [#tpu.dimension_semantics<parallel>, #tpu.dimension_semantics<parallel>], iteration_bounds = array<i64: 1, 1>, scalar_prefetch = 0 : i64, scratch_operands = 1 : i64, tpu.core_type = #tpu.core_type<tc>, window_params = [{transform_indices = @transform_0, window_bounds = array<i64: 2, 4, 256>}, {transform_indices = @transform_1, window_bounds = array<i64: 3, 8, 24>}, {pipeline_mode = #tpu.pipeline_mode<synchronous>, transform_indices = @transform_2, window_bounds = array<i64: 1, 2048>}, {transform_indices = @transform_3, window_bounds = array<i64: 2, 8, 2048>}]} {
    %cst = arith.constant 0.000000e+00 : bf16
    %0 = vector.broadcast %cst : bf16 to vector<24x2304xbf16>
    %c0 = arith.constant 0 : index
    %c0_0 = arith.constant 0 : index
    %1 = vector.load %arg6[%c0, %c0_0] : memref<24x2304xbf16, #tpu.memory_space<vmem>>, vector<24x2304xbf16>
    tpu.vector_store %arg6[%c0, %c0_0], %0 {strides = array<i32>} : memref<24x2304xbf16, #tpu.memory_space<vmem>>, vector<24x2304xbf16>,
    %c0_1 = arith.constant 0 : index
    %c0_2 = arith.constant 0 : index
    %2 = vector.load %arg4[%c0_1, %c0_2] : memref<1x2048xf32, #tpu.memory_space<vmem>>, vector<1x2048xf32>
    %c0_3 = arith.constant 0 : index
    %c0_4 = arith.constant 0 : index
    %c0_5 = arith.constant 0 : index
    %3 = vector.load %arg2[%c0_3, %c0_4, %c0_5] : memref<2x4x256xf32, #tpu.memory_space<vmem>>, vector<1x4x16xf32>
    %4 = vector.shape_cast %3 : vector<1x4x16xf32> to vector<4x16xf32>
    %5 = arith.truncf %4 : vector<4x16xf32> to vector<4x16xbf16>
    %c0_6 = arith.constant 0 : index
    %c129 = arith.constant 129 : index
    %6 = vector.load %arg6[%c0_6, %c129] : memref<24x2304xbf16, #tpu.memory_space<vmem>>, vector<4x16xbf16>
    tpu.vector_store %arg6[%c0_6, %c129], %5 {strides = array<i32>} : memref<24x2304xbf16, #tpu.memory_space<vmem>>, vector<4x16xbf16>,
    %c0_7 = arith.constant 0 : index
    %c0_8 = arith.constant 0 : index
    %c16 = arith.constant 16 : index
    %7 = vector.load %arg2[%c0_7, %c0_8, %c16] : memref<2x4x256xf32, #tpu.memory_space<vmem>>, vector<1x4x16xf32>
    %8 = vector.shape_cast %7 : vector<1x4x16xf32> to vector<4x16xf32>
    %9 = arith.truncf %8 : vector<4x16xf32> to vector<4x16xbf16>
    %c0_9 = arith.constant 0 : index
    %c257 = arith.constant 257 : index
    %10 = vector.load %arg6[%c0_9, %c257] : memref<24x2304xbf16, #tpu.memory_space<vmem>>, vector<4x16xbf16>
    tpu.vector_store %arg6[%c0_9, %c257], %9 {strides = array<i32>} : memref<24x2304xbf16, #tpu.memory_space<vmem>>, vector<4x16xbf16>,
    %c0_10 = arith.constant 0 : index
    %c0_11 = arith.constant 0 : index
    %c32 = arith.constant 32 : index
    %11 = vector.load %arg2[%c0_10, %c0_11, %c32] : memref<2x4x256xf32, #tpu.memory_space<vmem>>, vector<1x4x16xf32>
    %12 = vector.shape_cast %11 : vector<1x4x16xf32> to vector<4x16xf32>
    %13 = arith.truncf %12 : vector<4x16xf32> to vector<4x16xbf16>
    %c0_12 = arith.constant 0 : index
    %c385 = arith.constant 385 : index
    %14 = vector.load %arg6[%c0_12, %c385] : memref<24x2304xbf16, #tpu.memory_space<vmem>>, vector<4x16xbf16>
    tpu.vector_store %arg6[%c0_12, %c385], %13 {strides = array<i32>} : memref<24x2304xbf16, #tpu.memory_space<vmem>>, vector<4x16xbf16>,
    %c0_13 = arith.constant 0 : index
    %c0_14 = arith.constant 0 : index
    %c48 = arith.constant 48 : index
    %15 = vector.load %arg2[%c0_13, %c0_14, %c48] : memref<2x4x256xf32, #tpu.memory_space<vmem>>, vector<1x4x16xf32>
    %16 = vector.shape_cast %15 : vector<1x4x16xf32> to vector<4x16xf32>
    %17 = arith.truncf %16 : vector<4x16xf32> to vector<4x16xbf16>
    %c0_15 = arith.constant 0 : index
    %c513 = arith.constant 513 : index
    %18 = vector.load %arg6[%c0_15, %c513] : memref<24x2304xbf16, #tpu.memory_space<vmem>>, vector<4x16xbf16>
    tpu.vector_store %arg6[%c0_15, %c513], %17 {strides = array<i32>} : memref<24x2304xbf16, #tpu.memory_space<vmem>>, vector<4x16xbf16>,
    %c0_16 = arith.constant 0 : index
    %c0_17 = arith.constant 0 : index
    %c64 = arith.constant 64 : index
    %19 = vector.load %arg2[%c0_16, %c0_17, %c64] : memref<2x4x256xf32, #tpu.memory_space<vmem>>, vector<1x4x16xf32>
    %20 = vector.shape_cast %19 : vector<1x4x16xf32> to vector<4x16xf32>
    %21 = arith.truncf %20 : vector<4x16xf32> to vector<4x16xbf16>
    %c0_18 = arith.constant 0 : index
    %c641 = arith.constant 641 : index
    %22 = vector.load %arg6[%c0_18, %c641] : memref<24x2304xbf16, #tpu.memory_space<vmem>>, vector<4x16xbf16>
    tpu.vector_store %arg6[%c0_18, %c641], %21 {strides = array<i32>} : memref<24x2304xbf16, #tpu.memory_space<vmem>>, vector<4x16xbf16>,
    %c0_19 = arith.constant 0 : index
    %c0_20 = arith.constant 0 : index
    %c80 = arith.constant 80 : index
    %23 = vector.load %arg2[%c0_19, %c0_20, %c80] : memref<2x4x256xf32, #tpu.memory_space<vmem>>, vector<1x4x16xf32>
    %24 = vector.shape_cast %23 : vector<1x4x16xf32> to vector<4x16xf32>
    %25 = arith.truncf %24 : vector<4x16xf32> to vector<4x16xbf16>
    %c0_21 = arith.constant 0 : index
    %c769 = arith.constant 769 : index
    %26 = vector.load %arg6[%c0_21, %c769] : memref<24x2304xbf16, #tpu.memory_space<vmem>>, vector<4x16xbf16>
    tpu.vector_store %arg6[%c0_21, %c769], %25 {strides = array<i32>} : memref<24x2304xbf16, #tpu.memory_space<vmem>>, vector<4x16xbf16>,
    %c0_22 = arith.constant 0 : index
    %c0_23 = arith.constant 0 : index
    %c96 = arith.constant 96 : index
    %27 = vector.load %arg2[%c0_22, %c0_23, %c96] : memref<2x4x256xf32, #tpu.memory_space<vmem>>, vector<1x4x16xf32>
    %28 = vector.shape_cast %27 : vector<1x4x16xf32> to vector<4x16xf32>
    %29 = arith.truncf %28 : vector<4x16xf32> to vector<4x16xbf16>
    %c0_24 = arith.constant 0 : index
    %c897 = arith.constant 897 : index
    %30 = vector.load %arg6[%c0_24, %c897] : memref<24x2304xbf16, #tpu.memory_space<vmem>>, vector<4x16xbf16>
    tpu.vector_store %arg6[%c0_24, %c897], %29 {strides = array<i32>} : memref<24x2304xbf16, #tpu.memory_space<vmem>>, vector<4x16xbf16>,
    %c0_25 = arith.constant 0 : index
    %c0_26 = arith.constant 0 : index
    %c112 = arith.constant 112 : index
    %31 = vector.load %arg2[%c0_25, %c0_26, %c112] : memref<2x4x256xf32, #tpu.memory_space<vmem>>, vector<1x4x16xf32>
    %32 = vector.shape_cast %31 : vector<1x4x16xf32> to vector<4x16xf32>
    %33 = arith.truncf %32 : vector<4x16xf32> to vector<4x16xbf16>
    %c0_27 = arith.constant 0 : index
    %c1025 = arith.constant 1025 : index
    %34 = vector.load %arg6[%c0_27, %c1025] : memref<24x2304xbf16, #tpu.memory_space<vmem>>, vector<4x16xbf16>
    tpu.vector_store %arg6[%c0_27, %c1025], %33 {strides = array<i32>} : memref<24x2304xbf16, #tpu.memory_space<vmem>>, vector<4x16xbf16>,
    %c0_28 = arith.constant 0 : index
    %c0_29 = arith.constant 0 : index
    %c128 = arith.constant 128 : index
    %35 = vector.load %arg2[%c0_28, %c0_29, %c128] : memref<2x4x256xf32, #tpu.memory_space<vmem>>, vector<1x4x16xf32>
    %36 = vector.shape_cast %35 : vector<1x4x16xf32> to vector<4x16xf32>
    %37 = arith.truncf %36 : vector<4x16xf32> to vector<4x16xbf16>
    %c0_30 = arith.constant 0 : index
    %c1153 = arith.constant 1153 : index
    %38 = vector.load %arg6[%c0_30, %c1153] : memref<24x2304xbf16, #tpu.memory_space<vmem>>, vector<4x16xbf16>
    tpu.vector_store %arg6[%c0_30, %c1153], %37 {strides = array<i32>} : memref<24x2304xbf16, #tpu.memory_space<vmem>>, vector<4x16xbf16>,
    %c0_31 = arith.constant 0 : index
    %c0_32 = arith.constant 0 : index
    %c144 = arith.constant 144 : index
    %39 = vector.load %arg2[%c0_31, %c0_32, %c144] : memref<2x4x256xf32, #tpu.memory_space<vmem>>, vector<1x4x16xf32>
    %40 = vector.shape_cast %39 : vector<1x4x16xf32> to vector<4x16xf32>
    %41 = arith.truncf %40 : vector<4x16xf32> to vector<4x16xbf16>
    %c0_33 = arith.constant 0 : index
    %c1281 = arith.constant 1281 : index
    %42 = vector.load %arg6[%c0_33, %c1281] : memref<24x2304xbf16, #tpu.memory_space<vmem>>, vector<4x16xbf16>
    tpu.vector_store %arg6[%c0_33, %c1281], %41 {strides = array<i32>} : memref<24x2304xbf16, #tpu.memory_space<vmem>>, vector<4x16xbf16>,
    %c0_34 = arith.constant 0 : index
    %c0_35 = arith.constant 0 : index
    %c160 = arith.constant 160 : index
    %43 = vector.load %arg2[%c0_34, %c0_35, %c160] : memref<2x4x256xf32, #tpu.memory_space<vmem>>, vector<1x4x16xf32>
    %44 = vector.shape_cast %43 : vector<1x4x16xf32> to vector<4x16xf32>
    %45 = arith.truncf %44 : vector<4x16xf32> to vector<4x16xbf16>
    %c0_36 = arith.constant 0 : index
    %c1409 = arith.constant 1409 : index
    %46 = vector.load %arg6[%c0_36, %c1409] : memref<24x2304xbf16, #tpu.memory_space<vmem>>, vector<4x16xbf16>
    tpu.vector_store %arg6[%c0_36, %c1409], %45 {strides = array<i32>} : memref<24x2304xbf16, #tpu.memory_space<vmem>>, vector<4x16xbf16>,
    %c0_37 = arith.constant 0 : index
    %c0_38 = arith.constant 0 : index
    %c176 = arith.constant 176 : index
    %47 = vector.load %arg2[%c0_37, %c0_38, %c176] : memref<2x4x256xf32, #tpu.memory_space<vmem>>, vector<1x4x16xf32>
    %48 = vector.shape_cast %47 : vector<1x4x16xf32> to vector<4x16xf32>
    %49 = arith.truncf %48 : vector<4x16xf32> to vector<4x16xbf16>
    %c0_39 = arith.constant 0 : index
    %c1537 = arith.constant 1537 : index
    %50 = vector.load %arg6[%c0_39, %c1537] : memref<24x2304xbf16, #tpu.memory_space<vmem>>, vector<4x16xbf16>
    tpu.vector_store %arg6[%c0_39, %c1537], %49 {strides = array<i32>} : memref<24x2304xbf16, #tpu.memory_space<vmem>>, vector<4x16xbf16>,
    %c0_40 = arith.constant 0 : index
    %c0_41 = arith.constant 0 : index
    %c192 = arith.constant 192 : index
    %51 = vector.load %arg2[%c0_40, %c0_41, %c192] : memref<2x4x256xf32, #tpu.memory_space<vmem>>, vector<1x4x16xf32>
    %52 = vector.shape_cast %51 : vector<1x4x16xf32> to vector<4x16xf32>
    %53 = arith.truncf %52 : vector<4x16xf32> to vector<4x16xbf16>
    %c0_42 = arith.constant 0 : index
    %c1665 = arith.constant 1665 : index
    %54 = vector.load %arg6[%c0_42, %c1665] : memref<24x2304xbf16, #tpu.memory_space<vmem>>, vector<4x16xbf16>
    tpu.vector_store %arg6[%c0_42, %c1665], %53 {strides = array<i32>} : memref<24x2304xbf16, #tpu.memory_space<vmem>>, vector<4x16xbf16>,
    %c0_43 = arith.constant 0 : index
    %c0_44 = arith.constant 0 : index
    %c208 = arith.constant 208 : index
    %55 = vector.load %arg2[%c0_43, %c0_44, %c208] : memref<2x4x256xf32, #tpu.memory_space<vmem>>, vector<1x4x16xf32>
    %56 = vector.shape_cast %55 : vector<1x4x16xf32> to vector<4x16xf32>
    %57 = arith.truncf %56 : vector<4x16xf32> to vector<4x16xbf16>
    %c0_45 = arith.constant 0 : index
    %c1793 = arith.constant 1793 : index
    %58 = vector.load %arg6[%c0_45, %c1793] : memref<24x2304xbf16, #tpu.memory_space<vmem>>, vector<4x16xbf16>
    tpu.vector_store %arg6[%c0_45, %c1793], %57 {strides = array<i32>} : memref<24x2304xbf16, #tpu.memory_space<vmem>>, vector<4x16xbf16>,
    %c0_46 = arith.constant 0 : index
    %c0_47 = arith.constant 0 : index
    %c224 = arith.constant 224 : index
    %59 = vector.load %arg2[%c0_46, %c0_47, %c224] : memref<2x4x256xf32, #tpu.memory_space<vmem>>, vector<1x4x16xf32>
    %60 = vector.shape_cast %59 : vector<1x4x16xf32> to vector<4x16xf32>
    %61 = arith.truncf %60 : vector<4x16xf32> to vector<4x16xbf16>
    %c0_48 = arith.constant 0 : index
    %c1921 = arith.constant 1921 : index
    %62 = vector.load %arg6[%c0_48, %c1921] : memref<24x2304xbf16, #tpu.memory_space<vmem>>, vector<4x16xbf16>
    tpu.vector_store %arg6[%c0_48, %c1921], %61 {strides = array<i32>} : memref<24x2304xbf16, #tpu.memory_space<vmem>>, vector<4x16xbf16>,
    %c0_49 = arith.constant 0 : index
    %c0_50 = arith.constant 0 : index
    %c240 = arith.constant 240 : index
    %63 = vector.load %arg2[%c0_49, %c0_50, %c240] : memref<2x4x256xf32, #tpu.memory_space<vmem>>, vector<1x4x16xf32>
    %64 = vector.shape_cast %63 : vector<1x4x16xf32> to vector<4x16xf32>
    %65 = arith.truncf %64 : vector<4x16xf32> to vector<4x16xbf16>
    %c0_51 = arith.constant 0 : index
    %c2049 = arith.constant 2049 : index
    %66 = vector.load %arg6[%c0_51, %c2049] : memref<24x2304xbf16, #tpu.memory_space<vmem>>, vector<4x16xbf16>
    tpu.vector_store %arg6[%c0_51, %c2049], %65 {strides = array<i32>} : memref<24x2304xbf16, #tpu.memory_space<vmem>>, vector<4x16xbf16>,
    %c0_52 = arith.constant 0 : index
    %c0_53 = arith.constant 0 : index
    %c0_54 = arith.constant 0 : index
    %67 = vector.load %arg2[%c0_52, %c0_53, %c0_54] : memref<2x4x256xf32, #tpu.memory_space<vmem>>, vector<1x4x16xf32>
    %68 = vector.shape_cast %67 : vector<1x4x16xf32> to vector<4x16xf32>
    %69 = arith.truncf %68 : vector<4x16xf32> to vector<4x16xbf16>
    %c8 = arith.constant 8 : index
    %c128_55 = arith.constant 128 : index
    %70 = vector.load %arg6[%c8, %c128_55] : memref<24x2304xbf16, #tpu.memory_space<vmem>>, vector<4x16xbf16>
    tpu.vector_store %arg6[%c8, %c128_55], %69 {strides = array<i32>} : memref<24x2304xbf16, #tpu.memory_space<vmem>>, vector<4x16xbf16>,
    %c0_56 = arith.constant 0 : index
    %c0_57 = arith.constant 0 : index
    %c16_58 = arith.constant 16 : index
    %71 = vector.load %arg2[%c0_56, %c0_57, %c16_58] : memref<2x4x256xf32, #tpu.memory_space<vmem>>, vector<1x4x16xf32>
    %72 = vector.shape_cast %71 : vector<1x4x16xf32> to vector<4x16xf32>
    %73 = arith.truncf %72 : vector<4x16xf32> to vector<4x16xbf16>
    %c8_59 = arith.constant 8 : index
    %c256 = arith.constant 256 : index
    %74 = vector.load %arg6[%c8_59, %c256] : memref<24x2304xbf16, #tpu.memory_space<vmem>>, vector<4x16xbf16>
    tpu.vector_store %arg6[%c8_59, %c256], %73 {strides = array<i32>} : memref<24x2304xbf16, #tpu.memory_space<vmem>>, vector<4x16xbf16>,
    %c0_60 = arith.constant 0 : index
    %c0_61 = arith.constant 0 : index
    %c32_62 = arith.constant 32 : index
    %75 = vector.load %arg2[%c0_60, %c0_61, %c32_62] : memref<2x4x256xf32, #tpu.memory_space<vmem>>, vector<1x4x16xf32>
    %76 = vector.shape_cast %75 : vector<1x4x16xf32> to vector<4x16xf32>
    %77 = arith.truncf %76 : vector<4x16xf32> to vector<4x16xbf16>
    %c8_63 = arith.constant 8 : index
    %c384 = arith.constant 384 : index
    %78 = vector.load %arg6[%c8_63, %c384] : memref<24x2304xbf16, #tpu.memory_space<vmem>>, vector<4x16xbf16>
    tpu.vector_store %arg6[%c8_63, %c384], %77 {strides = array<i32>} : memref<24x2304xbf16, #tpu.memory_space<vmem>>, vector<4x16xbf16>,
    %c0_64 = arith.constant 0 : index
    %c0_65 = arith.constant 0 : index
    %c48_66 = arith.constant 48 : index
    %79 = vector.load %arg2[%c0_64, %c0_65, %c48_66] : memref<2x4x256xf32, #tpu.memory_space<vmem>>, vector<1x4x16xf32>
    %80 = vector.shape_cast %79 : vector<1x4x16xf32> to vector<4x16xf32>
    %81 = arith.truncf %80 : vector<4x16xf32> to vector<4x16xbf16>
    %c8_67 = arith.constant 8 : index
    %c512 = arith.constant 512 : index
    %82 = vector.load %arg6[%c8_67, %c512] : memref<24x2304xbf16, #tpu.memory_space<vmem>>, vector<4x16xbf16>
    tpu.vector_store %arg6[%c8_67, %c512], %81 {strides = array<i32>} : memref<24x2304xbf16, #tpu.memory_space<vmem>>, vector<4x16xbf16>,
    %c0_68 = arith.constant 0 : index
    %c0_69 = arith.constant 0 : index
    %c64_70 = arith.constant 64 : index
    %83 = vector.load %arg2[%c0_68, %c0_69, %c64_70] : memref<2x4x256xf32, #tpu.memory_space<vmem>>, vector<1x4x16xf32>
    %84 = vector.shape_cast %83 : vector<1x4x16xf32> to vector<4x16xf32>
    %85 = arith.truncf %84 : vector<4x16xf32> to vector<4x16xbf16>
    %c8_71 = arith.constant 8 : index
    %c640 = arith.constant 640 : index
    %86 = vector.load %arg6[%c8_71, %c640] : memref<24x2304xbf16, #tpu.memory_space<vmem>>, vector<4x16xbf16>
    tpu.vector_store %arg6[%c8_71, %c640], %85 {strides = array<i32>} : memref<24x2304xbf16, #tpu.memory_space<vmem>>, vector<4x16xbf16>,
    %c0_72 = arith.constant 0 : index
    %c0_73 = arith.constant 0 : index
    %c80_74 = arith.constant 80 : index
    %87 = vector.load %arg2[%c0_72, %c0_73, %c80_74] : memref<2x4x256xf32, #tpu.memory_space<vmem>>, vector<1x4x16xf32>
    %88 = vector.shape_cast %87 : vector<1x4x16xf32> to vector<4x16xf32>
    %89 = arith.truncf %88 : vector<4x16xf32> to vector<4x16xbf16>
    %c8_75 = arith.constant 8 : index
    %c768 = arith.constant 768 : index
    %90 = vector.load %arg6[%c8_75, %c768] : memref<24x2304xbf16, #tpu.memory_space<vmem>>, vector<4x16xbf16>
    tpu.vector_store %arg6[%c8_75, %c768], %89 {strides = array<i32>} : memref<24x2304xbf16, #tpu.memory_space<vmem>>, vector<4x16xbf16>,
    %c0_76 = arith.constant 0 : index
    %c0_77 = arith.constant 0 : index
    %c96_78 = arith.constant 96 : index
    %91 = vector.load %arg2[%c0_76, %c0_77, %c96_78] : memref<2x4x256xf32, #tpu.memory_space<vmem>>, vector<1x4x16xf32>
    %92 = vector.shape_cast %91 : vector<1x4x16xf32> to vector<4x16xf32>
    %93 = arith.truncf %92 : vector<4x16xf32> to vector<4x16xbf16>
    %c8_79 = arith.constant 8 : index
    %c896 = arith.constant 896 : index
    %94 = vector.load %arg6[%c8_79, %c896] : memref<24x2304xbf16, #tpu.memory_space<vmem>>, vector<4x16xbf16>
    tpu.vector_store %arg6[%c8_79, %c896], %93 {strides = array<i32>} : memref<24x2304xbf16, #tpu.memory_space<vmem>>, vector<4x16xbf16>,
    %c0_80 = arith.constant 0 : index
    %c0_81 = arith.constant 0 : index
    %c112_82 = arith.constant 112 : index
    %95 = vector.load %arg2[%c0_80, %c0_81, %c112_82] : memref<2x4x256xf32, #tpu.memory_space<vmem>>, vector<1x4x16xf32>
    %96 = vector.shape_cast %95 : vector<1x4x16xf32> to vector<4x16xf32>
    %97 = arith.truncf %96 : vector<4x16xf32> to vector<4x16xbf16>
    %c8_83 = arith.constant 8 : index
    %c1024 = arith.constant 1024 : index
    %98 = vector.load %arg6[%c8_83, %c1024] : memref<24x2304xbf16, #tpu.memory_space<vmem>>, vector<4x16xbf16>
    tpu.vector_store %arg6[%c8_83, %c1024], %97 {strides = array<i32>} : memref<24x2304xbf16, #tpu.memory_space<vmem>>, vector<4x16xbf16>,
    %c0_84 = arith.constant 0 : index
    %c0_85 = arith.constant 0 : index
    %c128_86 = arith.constant 128 : index
    %99 = vector.load %arg2[%c0_84, %c0_85, %c128_86] : memref<2x4x256xf32, #tpu.memory_space<vmem>>, vector<1x4x16xf32>
    %100 = vector.shape_cast %99 : vector<1x4x16xf32> to vector<4x16xf32>
    %101 = arith.truncf %100 : vector<4x16xf32> to vector<4x16xbf16>
    %c8_87 = arith.constant 8 : index
    %c1152 = arith.constant 1152 : index
    %102 = vector.load %arg6[%c8_87, %c1152] : memref<24x2304xbf16, #tpu.memory_space<vmem>>, vector<4x16xbf16>
    tpu.vector_store %arg6[%c8_87, %c1152], %101 {strides = array<i32>} : memref<24x2304xbf16, #tpu.memory_space<vmem>>, vector<4x16xbf16>,
    %c0_88 = arith.constant 0 : index
    %c0_89 = arith.constant 0 : index
    %c144_90 = arith.constant 144 : index
    %103 = vector.load %arg2[%c0_88, %c0_89, %c144_90] : memref<2x4x256xf32, #tpu.memory_space<vmem>>, vector<1x4x16xf32>
    %104 = vector.shape_cast %103 : vector<1x4x16xf32> to vector<4x16xf32>
    %105 = arith.truncf %104 : vector<4x16xf32> to vector<4x16xbf16>
    %c8_91 = arith.constant 8 : index
    %c1280 = arith.constant 1280 : index
    %106 = vector.load %arg6[%c8_91, %c1280] : memref<24x2304xbf16, #tpu.memory_space<vmem>>, vector<4x16xbf16>
    tpu.vector_store %arg6[%c8_91, %c1280], %105 {strides = array<i32>} : memref<24x2304xbf16, #tpu.memory_space<vmem>>, vector<4x16xbf16>,
    %c0_92 = arith.constant 0 : index
    %c0_93 = arith.constant 0 : index
    %c160_94 = arith.constant 160 : index
    %107 = vector.load %arg2[%c0_92, %c0_93, %c160_94] : memref<2x4x256xf32, #tpu.memory_space<vmem>>, vector<1x4x16xf32>
    %108 = vector.shape_cast %107 : vector<1x4x16xf32> to vector<4x16xf32>
    %109 = arith.truncf %108 : vector<4x16xf32> to vector<4x16xbf16>
    %c8_95 = arith.constant 8 : index
    %c1408 = arith.constant 1408 : index
    %110 = vector.load %arg6[%c8_95, %c1408] : memref<24x2304xbf16, #tpu.memory_space<vmem>>, vector<4x16xbf16>
    tpu.vector_store %arg6[%c8_95, %c1408], %109 {strides = array<i32>} : memref<24x2304xbf16, #tpu.memory_space<vmem>>, vector<4x16xbf16>,
    %c0_96 = arith.constant 0 : index
    %c0_97 = arith.constant 0 : index
    %c176_98 = arith.constant 176 : index
    %111 = vector.load %arg2[%c0_96, %c0_97, %c176_98] : memref<2x4x256xf32, #tpu.memory_space<vmem>>, vector<1x4x16xf32>
    %112 = vector.shape_cast %111 : vector<1x4x16xf32> to vector<4x16xf32>
    %113 = arith.truncf %112 : vector<4x16xf32> to vector<4x16xbf16>
    %c8_99 = arith.constant 8 : index
    %c1536 = arith.constant 1536 : index
    %114 = vector.load %arg6[%c8_99, %c1536] : memref<24x2304xbf16, #tpu.memory_space<vmem>>, vector<4x16xbf16>
    tpu.vector_store %arg6[%c8_99, %c1536], %113 {strides = array<i32>} : memref<24x2304xbf16, #tpu.memory_space<vmem>>, vector<4x16xbf16>,
    %c0_100 = arith.constant 0 : index
    %c0_101 = arith.constant 0 : index
    %c192_102 = arith.constant 192 : index
    %115 = vector.load %arg2[%c0_100, %c0_101, %c192_102] : memref<2x4x256xf32, #tpu.memory_space<vmem>>, vector<1x4x16xf32>
    %116 = vector.shape_cast %115 : vector<1x4x16xf32> to vector<4x16xf32>
    %117 = arith.truncf %116 : vector<4x16xf32> to vector<4x16xbf16>
    %c8_103 = arith.constant 8 : index
    %c1664 = arith.constant 1664 : index
    %118 = vector.load %arg6[%c8_103, %c1664] : memref<24x2304xbf16, #tpu.memory_space<vmem>>, vector<4x16xbf16>
    tpu.vector_store %arg6[%c8_103, %c1664], %117 {strides = array<i32>} : memref<24x2304xbf16, #tpu.memory_space<vmem>>, vector<4x16xbf16>,
    %c0_104 = arith.constant 0 : index
    %c0_105 = arith.constant 0 : index
    %c208_106 = arith.constant 208 : index
    %119 = vector.load %arg2[%c0_104, %c0_105, %c208_106] : memref<2x4x256xf32, #tpu.memory_space<vmem>>, vector<1x4x16xf32>
    %120 = vector.shape_cast %119 : vector<1x4x16xf32> to vector<4x16xf32>
    %121 = arith.truncf %120 : vector<4x16xf32> to vector<4x16xbf16>
    %c8_107 = arith.constant 8 : index
    %c1792 = arith.constant 1792 : index
    %122 = vector.load %arg6[%c8_107, %c1792] : memref<24x2304xbf16, #tpu.memory_space<vmem>>, vector<4x16xbf16>
    tpu.vector_store %arg6[%c8_107, %c1792], %121 {strides = array<i32>} : memref<24x2304xbf16, #tpu.memory_space<vmem>>, vector<4x16xbf16>,
    %c0_108 = arith.constant 0 : index
    %c0_109 = arith.constant 0 : index
    %c224_110 = arith.constant 224 : index
    %123 = vector.load %arg2[%c0_108, %c0_109, %c224_110] : memref<2x4x256xf32, #tpu.memory_space<vmem>>, vector<1x4x16xf32>
    %124 = vector.shape_cast %123 : vector<1x4x16xf32> to vector<4x16xf32>
    %125 = arith.truncf %124 : vector<4x16xf32> to vector<4x16xbf16>
    %c8_111 = arith.constant 8 : index
    %c1920 = arith.constant 1920 : index
    %126 = vector.load %arg6[%c8_111, %c1920] : memref<24x2304xbf16, #tpu.memory_space<vmem>>, vector<4x16xbf16>
    tpu.vector_store %arg6[%c8_111, %c1920], %125 {strides = array<i32>} : memref<24x2304xbf16, #tpu.memory_space<vmem>>, vector<4x16xbf16>,
    %c0_112 = arith.constant 0 : index
    %c0_113 = arith.constant 0 : index
    %c240_114 = arith.constant 240 : index
    %127 = vector.load %arg2[%c0_112, %c0_113, %c240_114] : memref<2x4x256xf32, #tpu.memory_space<vmem>>, vector<1x4x16xf32>
    %128 = vector.shape_cast %127 : vector<1x4x16xf32> to vector<4x16xf32>
    %129 = arith.truncf %128 : vector<4x16xf32> to vector<4x16xbf16>
    %c8_115 = arith.constant 8 : index
    %c2048 = arith.constant 2048 : index
    %130 = vector.load %arg6[%c8_115, %c2048] : memref<24x2304xbf16, #tpu.memory_space<vmem>>, vector<4x16xbf16>
    tpu.vector_store %arg6[%c8_115, %c2048], %129 {strides = array<i32>} : memref<24x2304xbf16, #tpu.memory_space<vmem>>, vector<4x16xbf16>,
    %c0_116 = arith.constant 0 : index
    %c0_117 = arith.constant 0 : index
    %c0_118 = arith.constant 0 : index
    %131 = vector.load %arg2[%c0_116, %c0_117, %c0_118] : memref<2x4x256xf32, #tpu.memory_space<vmem>>, vector<1x4x16xf32>
    %132 = vector.shape_cast %131 : vector<1x4x16xf32> to vector<4x16xf32>
    %133 = arith.truncf %132 : vector<4x16xf32> to vector<4x16xbf16>
    %c16_119 = arith.constant 16 : index
    %c127 = arith.constant 127 : index
    %134 = vector.load %arg6[%c16_119, %c127] : memref<24x2304xbf16, #tpu.memory_space<vmem>>, vector<4x16xbf16>
    tpu.vector_store %arg6[%c16_119, %c127], %133 {strides = array<i32>} : memref<24x2304xbf16, #tpu.memory_space<vmem>>, vector<4x16xbf16>,
    %c0_120 = arith.constant 0 : index
    %c0_121 = arith.constant 0 : index
    %c16_122 = arith.constant 16 : index
    %135 = vector.load %arg2[%c0_120, %c0_121, %c16_122] : memref<2x4x256xf32, #tpu.memory_space<vmem>>, vector<1x4x16xf32>
    %136 = vector.shape_cast %135 : vector<1x4x16xf32> to vector<4x16xf32>
    %137 = arith.truncf %136 : vector<4x16xf32> to vector<4x16xbf16>
    %c16_123 = arith.constant 16 : index
    %c255 = arith.constant 255 : index
    %138 = vector.load %arg6[%c16_123, %c255] : memref<24x2304xbf16, #tpu.memory_space<vmem>>, vector<4x16xbf16>
    tpu.vector_store %arg6[%c16_123, %c255], %137 {strides = array<i32>} : memref<24x2304xbf16, #tpu.memory_space<vmem>>, vector<4x16xbf16>,
    %c0_124 = arith.constant 0 : index
    %c0_125 = arith.constant 0 : index
    %c32_126 = arith.constant 32 : index
    %139 = vector.load %arg2[%c0_124, %c0_125, %c32_126] : memref<2x4x256xf32, #tpu.memory_space<vmem>>, vector<1x4x16xf32>
    %140 = vector.shape_cast %139 : vector<1x4x16xf32> to vector<4x16xf32>
    %141 = arith.truncf %140 : vector<4x16xf32> to vector<4x16xbf16>
    %c16_127 = arith.constant 16 : index
    %c383 = arith.constant 383 : index
    %142 = vector.load %arg6[%c16_127, %c383] : memref<24x2304xbf16, #tpu.memory_space<vmem>>, vector<4x16xbf16>
    tpu.vector_store %arg6[%c16_127, %c383], %141 {strides = array<i32>} : memref<24x2304xbf16, #tpu.memory_space<vmem>>, vector<4x16xbf16>,
    %c0_128 = arith.constant 0 : index
    %c0_129 = arith.constant 0 : index
    %c48_130 = arith.constant 48 : index
    %143 = vector.load %arg2[%c0_128, %c0_129, %c48_130] : memref<2x4x256xf32, #tpu.memory_space<vmem>>, vector<1x4x16xf32>
    %144 = vector.shape_cast %143 : vector<1x4x16xf32> to vector<4x16xf32>
    %145 = arith.truncf %144 : vector<4x16xf32> to vector<4x16xbf16>
    %c16_131 = arith.constant 16 : index
    %c511 = arith.constant 511 : index
    %146 = vector.load %arg6[%c16_131, %c511] : memref<24x2304xbf16, #tpu.memory_space<vmem>>, vector<4x16xbf16>
    tpu.vector_store %arg6[%c16_131, %c511], %145 {strides = array<i32>} : memref<24x2304xbf16, #tpu.memory_space<vmem>>, vector<4x16xbf16>,
    %c0_132 = arith.constant 0 : index
    %c0_133 = arith.constant 0 : index
    %c64_134 = arith.constant 64 : index
    %147 = vector.load %arg2[%c0_132, %c0_133, %c64_134] : memref<2x4x256xf32, #tpu.memory_space<vmem>>, vector<1x4x16xf32>
    %148 = vector.shape_cast %147 : vector<1x4x16xf32> to vector<4x16xf32>
    %149 = arith.truncf %148 : vector<4x16xf32> to vector<4x16xbf16>
    %c16_135 = arith.constant 16 : index
    %c639 = arith.constant 639 : index
    %150 = vector.load %arg6[%c16_135, %c639] : memref<24x2304xbf16, #tpu.memory_space<vmem>>, vector<4x16xbf16>
    tpu.vector_store %arg6[%c16_135, %c639], %149 {strides = array<i32>} : memref<24x2304xbf16, #tpu.memory_space<vmem>>, vector<4x16xbf16>,
    %c0_136 = arith.constant 0 : index
    %c0_137 = arith.constant 0 : index
    %c80_138 = arith.constant 80 : index
    %151 = vector.load %arg2[%c0_136, %c0_137, %c80_138] : memref<2x4x256xf32, #tpu.memory_space<vmem>>, vector<1x4x16xf32>
    %152 = vector.shape_cast %151 : vector<1x4x16xf32> to vector<4x16xf32>
    %153 = arith.truncf %152 : vector<4x16xf32> to vector<4x16xbf16>
    %c16_139 = arith.constant 16 : index
    %c767 = arith.constant 767 : index
    %154 = vector.load %arg6[%c16_139, %c767] : memref<24x2304xbf16, #tpu.memory_space<vmem>>, vector<4x16xbf16>
    tpu.vector_store %arg6[%c16_139, %c767], %153 {strides = array<i32>} : memref<24x2304xbf16, #tpu.memory_space<vmem>>, vector<4x16xbf16>,
    %c0_140 = arith.constant 0 : index
    %c0_141 = arith.constant 0 : index
    %c96_142 = arith.constant 96 : index
    %155 = vector.load %arg2[%c0_140, %c0_141, %c96_142] : memref<2x4x256xf32, #tpu.memory_space<vmem>>, vector<1x4x16xf32>
    %156 = vector.shape_cast %155 : vector<1x4x16xf32> to vector<4x16xf32>
    %157 = arith.truncf %156 : vector<4x16xf32> to vector<4x16xbf16>
    %c16_143 = arith.constant 16 : index
    %c895 = arith.constant 895 : index
    %158 = vector.load %arg6[%c16_143, %c895] : memref<24x2304xbf16, #tpu.memory_space<vmem>>, vector<4x16xbf16>
    tpu.vector_store %arg6[%c16_143, %c895], %157 {strides = array<i32>} : memref<24x2304xbf16, #tpu.memory_space<vmem>>, vector<4x16xbf16>,
    %c0_144 = arith.constant 0 : index
    %c0_145 = arith.constant 0 : index
    %c112_146 = arith.constant 112 : index
    %159 = vector.load %arg2[%c0_144, %c0_145, %c112_146] : memref<2x4x256xf32, #tpu.memory_space<vmem>>, vector<1x4x16xf32>
    %160 = vector.shape_cast %159 : vector<1x4x16xf32> to vector<4x16xf32>
    %161 = arith.truncf %160 : vector<4x16xf32> to vector<4x16xbf16>
    %c16_147 = arith.constant 16 : index
    %c1023 = arith.constant 1023 : index
    %162 = vector.load %arg6[%c16_147, %c1023] : memref<24x2304xbf16, #tpu.memory_space<vmem>>, vector<4x16xbf16>
    tpu.vector_store %arg6[%c16_147, %c1023], %161 {strides = array<i32>} : memref<24x2304xbf16, #tpu.memory_space<vmem>>, vector<4x16xbf16>,
    %c0_148 = arith.constant 0 : index
    %c0_149 = arith.constant 0 : index
    %c128_150 = arith.constant 128 : index
    %163 = vector.load %arg2[%c0_148, %c0_149, %c128_150] : memref<2x4x256xf32, #tpu.memory_space<vmem>>, vector<1x4x16xf32>
    %164 = vector.shape_cast %163 : vector<1x4x16xf32> to vector<4x16xf32>
    %165 = arith.truncf %164 : vector<4x16xf32> to vector<4x16xbf16>
    %c16_151 = arith.constant 16 : index
    %c1151 = arith.constant 1151 : index
    %166 = vector.load %arg6[%c16_151, %c1151] : memref<24x2304xbf16, #tpu.memory_space<vmem>>, vector<4x16xbf16>
    tpu.vector_store %arg6[%c16_151, %c1151], %165 {strides = array<i32>} : memref<24x2304xbf16, #tpu.memory_space<vmem>>, vector<4x16xbf16>,
    %c0_152 = arith.constant 0 : index
    %c0_153 = arith.constant 0 : index
    %c144_154 = arith.constant 144 : index
    %167 = vector.load %arg2[%c0_152, %c0_153, %c144_154] : memref<2x4x256xf32, #tpu.memory_space<vmem>>, vector<1x4x16xf32>
    %168 = vector.shape_cast %167 : vector<1x4x16xf32> to vector<4x16xf32>
    %169 = arith.truncf %168 : vector<4x16xf32> to vector<4x16xbf16>
    %c16_155 = arith.constant 16 : index
    %c1279 = arith.constant 1279 : index
    %170 = vector.load %arg6[%c16_155, %c1279] : memref<24x2304xbf16, #tpu.memory_space<vmem>>, vector<4x16xbf16>
    tpu.vector_store %arg6[%c16_155, %c1279], %169 {strides = array<i32>} : memref<24x2304xbf16, #tpu.memory_space<vmem>>, vector<4x16xbf16>,
    %c0_156 = arith.constant 0 : index
    %c0_157 = arith.constant 0 : index
    %c160_158 = arith.constant 160 : index
    %171 = vector.load %arg2[%c0_156, %c0_157, %c160_158] : memref<2x4x256xf32, #tpu.memory_space<vmem>>, vector<1x4x16xf32>
    %172 = vector.shape_cast %171 : vector<1x4x16xf32> to vector<4x16xf32>
    %173 = arith.truncf %172 : vector<4x16xf32> to vector<4x16xbf16>
    %c16_159 = arith.constant 16 : index
    %c1407 = arith.constant 1407 : index
    %174 = vector.load %arg6[%c16_159, %c1407] : memref<24x2304xbf16, #tpu.memory_space<vmem>>, vector<4x16xbf16>
    tpu.vector_store %arg6[%c16_159, %c1407], %173 {strides = array<i32>} : memref<24x2304xbf16, #tpu.memory_space<vmem>>, vector<4x16xbf16>,
    %c0_160 = arith.constant 0 : index
    %c0_161 = arith.constant 0 : index
    %c176_162 = arith.constant 176 : index
    %175 = vector.load %arg2[%c0_160, %c0_161, %c176_162] : memref<2x4x256xf32, #tpu.memory_space<vmem>>, vector<1x4x16xf32>
    %176 = vector.shape_cast %175 : vector<1x4x16xf32> to vector<4x16xf32>
    %177 = arith.truncf %176 : vector<4x16xf32> to vector<4x16xbf16>
    %c16_163 = arith.constant 16 : index
    %c1535 = arith.constant 1535 : index
    %178 = vector.load %arg6[%c16_163, %c1535] : memref<24x2304xbf16, #tpu.memory_space<vmem>>, vector<4x16xbf16>
    tpu.vector_store %arg6[%c16_163, %c1535], %177 {strides = array<i32>} : memref<24x2304xbf16, #tpu.memory_space<vmem>>, vector<4x16xbf16>,
    %c0_164 = arith.constant 0 : index
    %c0_165 = arith.constant 0 : index
    %c192_166 = arith.constant 192 : index
    %179 = vector.load %arg2[%c0_164, %c0_165, %c192_166] : memref<2x4x256xf32, #tpu.memory_space<vmem>>, vector<1x4x16xf32>
    %180 = vector.shape_cast %179 : vector<1x4x16xf32> to vector<4x16xf32>
    %181 = arith.truncf %180 : vector<4x16xf32> to vector<4x16xbf16>
    %c16_167 = arith.constant 16 : index
    %c1663 = arith.constant 1663 : index
    %182 = vector.load %arg6[%c16_167, %c1663] : memref<24x2304xbf16, #tpu.memory_space<vmem>>, vector<4x16xbf16>
    tpu.vector_store %arg6[%c16_167, %c1663], %181 {strides = array<i32>} : memref<24x2304xbf16, #tpu.memory_space<vmem>>, vector<4x16xbf16>,
    %c0_168 = arith.constant 0 : index
    %c0_169 = arith.constant 0 : index
    %c208_170 = arith.constant 208 : index
    %183 = vector.load %arg2[%c0_168, %c0_169, %c208_170] : memref<2x4x256xf32, #tpu.memory_space<vmem>>, vector<1x4x16xf32>
    %184 = vector.shape_cast %183 : vector<1x4x16xf32> to vector<4x16xf32>
    %185 = arith.truncf %184 : vector<4x16xf32> to vector<4x16xbf16>
    %c16_171 = arith.constant 16 : index
    %c1791 = arith.constant 1791 : index
    %186 = vector.load %arg6[%c16_171, %c1791] : memref<24x2304xbf16, #tpu.memory_space<vmem>>, vector<4x16xbf16>
    tpu.vector_store %arg6[%c16_171, %c1791], %185 {strides = array<i32>} : memref<24x2304xbf16, #tpu.memory_space<vmem>>, vector<4x16xbf16>,
    %c0_172 = arith.constant 0 : index
    %c0_173 = arith.constant 0 : index
    %c224_174 = arith.constant 224 : index
    %187 = vector.load %arg2[%c0_172, %c0_173, %c224_174] : memref<2x4x256xf32, #tpu.memory_space<vmem>>, vector<1x4x16xf32>
    %188 = vector.shape_cast %187 : vector<1x4x16xf32> to vector<4x16xf32>
    %189 = arith.truncf %188 : vector<4x16xf32> to vector<4x16xbf16>
    %c16_175 = arith.constant 16 : index
    %c1919 = arith.constant 1919 : index
    %190 = vector.load %arg6[%c16_175, %c1919] : memref<24x2304xbf16, #tpu.memory_space<vmem>>, vector<4x16xbf16>
    tpu.vector_store %arg6[%c16_175, %c1919], %189 {strides = array<i32>} : memref<24x2304xbf16, #tpu.memory_space<vmem>>, vector<4x16xbf16>,
    %c0_176 = arith.constant 0 : index
    %c0_177 = arith.constant 0 : index
    %c240_178 = arith.constant 240 : index
    %191 = vector.load %arg2[%c0_176, %c0_177, %c240_178] : memref<2x4x256xf32, #tpu.memory_space<vmem>>, vector<1x4x16xf32>
    %192 = vector.shape_cast %191 : vector<1x4x16xf32> to vector<4x16xf32>
    %193 = arith.truncf %192 : vector<4x16xf32> to vector<4x16xbf16>
    %c16_179 = arith.constant 16 : index
    %c2047 = arith.constant 2047 : index
    %194 = vector.load %arg6[%c16_179, %c2047] : memref<24x2304xbf16, #tpu.memory_space<vmem>>, vector<4x16xbf16>
    tpu.vector_store %arg6[%c16_179, %c2047], %193 {strides = array<i32>} : memref<24x2304xbf16, #tpu.memory_space<vmem>>, vector<4x16xbf16>,
    %c0_180 = arith.constant 0 : index
    %c0_181 = arith.constant 0 : index
    %195 = vector.load %arg6[%c0_180, %c0_181] : memref<24x2304xbf16, #tpu.memory_space<vmem>>, vector<24x2048xbf16>
    %c0_182 = arith.constant 0 : index
    %c0_183 = arith.constant 0 : index
    %c0_184 = arith.constant 0 : index
    %196 = vector.load %arg3[%c0_182, %c0_183, %c0_184] : memref<3x8x24xbf16, #tpu.memory_space<vmem>>, vector<1x8x24xbf16>
    %197 = vector.shape_cast %196 : vector<1x8x24xbf16> to vector<8x24xbf16>
    %cst_185 = arith.constant dense<0.000000e+00> : vector<8x2048xf32>
    %198 = tpu.matmul %197, %195, %cst_185 {dimension_numbers = #tpu.dot_dimension_numbers<[1], [0], [0], [1], [0, 0, 1, 1], [], []>} : vector<8x24xbf16>, vector<24x2048xbf16>, vector<8x2048xf32> -> vector<8x2048xf32>
    %c0_186 = arith.constant 0 : index
    %c128_187 = arith.constant 128 : index
    %199 = vector.load %arg6[%c0_186, %c128_187] : memref<24x2304xbf16, #tpu.memory_space<vmem>>, vector<24x2048xbf16>
    %c1 = arith.constant 1 : index
    %c0_188 = arith.constant 0 : index
    %c0_189 = arith.constant 0 : index
    %200 = vector.load %arg3[%c1, %c0_188, %c0_189] : memref<3x8x24xbf16, #tpu.memory_space<vmem>>, vector<1x8x24xbf16>
    %201 = vector.shape_cast %200 : vector<1x8x24xbf16> to vector<8x24xbf16>
    %cst_190 = arith.constant dense<0.000000e+00> : vector<8x2048xf32>
    %202 = tpu.matmul %201, %199, %cst_190 {dimension_numbers = #tpu.dot_dimension_numbers<[1], [0], [0], [1], [0, 0, 1, 1], [], []>} : vector<8x24xbf16>, vector<24x2048xbf16>, vector<8x2048xf32> -> vector<8x2048xf32>
    %203 = arith.addf %198, %202 : vector<8x2048xf32>
    %c0_191 = arith.constant 0 : index
    %c256_192 = arith.constant 256 : index
    %204 = vector.load %arg6[%c0_191, %c256_192] : memref<24x2304xbf16, #tpu.memory_space<vmem>>, vector<24x2048xbf16>
    %c2 = arith.constant 2 : index
    %c0_193 = arith.constant 0 : index
    %c0_194 = arith.constant 0 : index
    %205 = vector.load %arg3[%c2, %c0_193, %c0_194] : memref<3x8x24xbf16, #tpu.memory_space<vmem>>, vector<1x8x24xbf16>
    %206 = vector.shape_cast %205 : vector<1x8x24xbf16> to vector<8x24xbf16>
    %cst_195 = arith.constant dense<0.000000e+00> : vector<8x2048xf32>
    %207 = tpu.matmul %206, %204, %cst_195 {dimension_numbers = #tpu.dot_dimension_numbers<[1], [0], [0], [1], [0, 0, 1, 1], [], []>} : vector<8x24xbf16>, vector<24x2048xbf16>, vector<8x2048xf32> -> vector<8x2048xf32>
    %208 = arith.addf %203, %207 : vector<8x2048xf32>
    %209 = vector.broadcast %2 : vector<1x2048xf32> to vector<8x2048xf32>
    %210 = arith.mulf %208, %209 : vector<8x2048xf32>
    %cst_196 = arith.constant dense<0.000000e+00> : vector<8xf32>
    %211 = vector.multi_reduction <add>, %210, %cst_196 [1] : vector<8x2048xf32> to vector<8xf32>
    %212 = vector.shape_cast %211 : vector<8xf32> to vector<8x1xf32>
    %cst_197 = arith.constant 3.906250e-03 : f32
    %213 = vector.broadcast %cst_197 : f32 to vector<8x1xf32>
    %214 = arith.mulf %212, %213 : vector<8x1xf32>
    %215 = vector.broadcast %214 : vector<8x1xf32> to vector<8x2048xf32>
    %216 = arith.subf %208, %215 : vector<8x2048xf32>
    %217 = vector.broadcast %2 : vector<1x2048xf32> to vector<8x2048xf32>
    %218 = arith.mulf %216, %217 : vector<8x2048xf32>
    %219 = arith.mulf %218, %218 : vector<8x2048xf32>
    %cst_198 = arith.constant dense<0.000000e+00> : vector<8xf32>
    %220 = vector.multi_reduction <add>, %219, %cst_198 [1] : vector<8x2048xf32> to vector<8xf32>
    %221 = vector.shape_cast %220 : vector<8xf32> to vector<8x1xf32>
    %cst_199 = arith.constant 3.906250e-03 : f32
    %222 = vector.broadcast %cst_199 : f32 to vector<8x1xf32>
    %223 = arith.mulf %221, %222 : vector<8x1xf32>
    %224 = vector.broadcast %214 : vector<8x1xf32> to vector<8x2048xf32>
    %225 = arith.subf %208, %224 : vector<8x2048xf32>
    %cst_200 = arith.constant 9.99999974E-6 : f32
    %226 = vector.broadcast %cst_200 : f32 to vector<8x1xf32>
    %227 = arith.addf %223, %226 : vector<8x1xf32>
    %228 = math.rsqrt %227 : vector<8x1xf32>
    %229 = vector.broadcast %228 : vector<8x1xf32> to vector<8x2048xf32>
    %230 = arith.mulf %225, %229 : vector<8x2048xf32>
    %cst_201 = arith.constant 0.000000e+00 : f32
    %231 = vector.broadcast %cst_201 : f32 to vector<8x2048xf32>
    %232 = arith.maximumf %230, %231 : vector<8x2048xf32>
    %233 = arith.truncf %232 : vector<8x2048xf32> to vector<8x2048xbf16>
    %c0_202 = arith.constant 0 : index
    %c0_203 = arith.constant 0 : index
    %c0_204 = arith.constant 0 : index
    %234 = vector.load %arg5[%c0_202, %c0_203, %c0_204] : memref<2x8x2048xbf16, #tpu.memory_space<vmem>>, vector<1x8x2048xbf16>
    %235 = vector.shape_cast %234 : vector<1x8x2048xbf16> to vector<8x2048xbf16>
    %236 = vector.shape_cast %233 : vector<8x2048xbf16> to vector<1x8x2048xbf16>
    tpu.vector_store %arg5[%c0_202, %c0_203, %c0_204], %236 {strides = array<i32>} : memref<2x8x2048xbf16, #tpu.memory_space<vmem>>, vector<1x8x2048xbf16>,
    %c1_205 = arith.constant 1 : index
    %c0_206 = arith.constant 0 : index
    %c0_207 = arith.constant 0 : index
    %237 = vector.load %arg2[%c1_205, %c0_206, %c0_207] : memref<2x4x256xf32, #tpu.memory_space<vmem>>, vector<1x4x16xf32>
    %238 = vector.shape_cast %237 : vector<1x4x16xf32> to vector<4x16xf32>
    %239 = arith.truncf %238 : vector<4x16xf32> to vector<4x16xbf16>
    %c0_208 = arith.constant 0 : index
    %c129_209 = arith.constant 129 : index
    %240 = vector.load %arg6[%c0_208, %c129_209] : memref<24x2304xbf16, #tpu.memory_space<vmem>>, vector<4x16xbf16>
    tpu.vector_store %arg6[%c0_208, %c129_209], %239 {strides = array<i32>} : memref<24x2304xbf16, #tpu.memory_space<vmem>>, vector<4x16xbf16>,
    %c1_210 = arith.constant 1 : index
    %c0_211 = arith.constant 0 : index
    %c16_212 = arith.constant 16 : index
    %241 = vector.load %arg2[%c1_210, %c0_211, %c16_212] : memref<2x4x256xf32, #tpu.memory_space<vmem>>, vector<1x4x16xf32>
    %242 = vector.shape_cast %241 : vector<1x4x16xf32> to vector<4x16xf32>
    %243 = arith.truncf %242 : vector<4x16xf32> to vector<4x16xbf16>
    %c0_213 = arith.constant 0 : index
    %c257_214 = arith.constant 257 : index
    %244 = vector.load %arg6[%c0_213, %c257_214] : memref<24x2304xbf16, #tpu.memory_space<vmem>>, vector<4x16xbf16>
    tpu.vector_store %arg6[%c0_213, %c257_214], %243 {strides = array<i32>} : memref<24x2304xbf16, #tpu.memory_space<vmem>>, vector<4x16xbf16>,
    %c1_215 = arith.constant 1 : index
    %c0_216 = arith.constant 0 : index
    %c32_217 = arith.constant 32 : index
    %245 = vector.load %arg2[%c1_215, %c0_216, %c32_217] : memref<2x4x256xf32, #tpu.memory_space<vmem>>, vector<1x4x16xf32>
    %246 = vector.shape_cast %245 : vector<1x4x16xf32> to vector<4x16xf32>
    %247 = arith.truncf %246 : vector<4x16xf32> to vector<4x16xbf16>
    %c0_218 = arith.constant 0 : index
    %c385_219 = arith.constant 385 : index
    %248 = vector.load %arg6[%c0_218, %c385_219] : memref<24x2304xbf16, #tpu.memory_space<vmem>>, vector<4x16xbf16>
    tpu.vector_store %arg6[%c0_218, %c385_219], %247 {strides = array<i32>} : memref<24x2304xbf16, #tpu.memory_space<vmem>>, vector<4x16xbf16>,
    %c1_220 = arith.constant 1 : index
    %c0_221 = arith.constant 0 : index
    %c48_222 = arith.constant 48 : index
    %249 = vector.load %arg2[%c1_220, %c0_221, %c48_222] : memref<2x4x256xf32, #tpu.memory_space<vmem>>, vector<1x4x16xf32>
    %250 = vector.shape_cast %249 : vector<1x4x16xf32> to vector<4x16xf32>
    %251 = arith.truncf %250 : vector<4x16xf32> to vector<4x16xbf16>
    %c0_223 = arith.constant 0 : index
    %c513_224 = arith.constant 513 : index
    %252 = vector.load %arg6[%c0_223, %c513_224] : memref<24x2304xbf16, #tpu.memory_space<vmem>>, vector<4x16xbf16>
    tpu.vector_store %arg6[%c0_223, %c513_224], %251 {strides = array<i32>} : memref<24x2304xbf16, #tpu.memory_space<vmem>>, vector<4x16xbf16>,
    %c1_225 = arith.constant 1 : index
    %c0_226 = arith.constant 0 : index
    %c64_227 = arith.constant 64 : index
    %253 = vector.load %arg2[%c1_225, %c0_226, %c64_227] : memref<2x4x256xf32, #tpu.memory_space<vmem>>, vector<1x4x16xf32>
    %254 = vector.shape_cast %253 : vector<1x4x16xf32> to vector<4x16xf32>
    %255 = arith.truncf %254 : vector<4x16xf32> to vector<4x16xbf16>
    %c0_228 = arith.constant 0 : index
    %c641_229 = arith.constant 641 : index
    %256 = vector.load %arg6[%c0_228, %c641_229] : memref<24x2304xbf16, #tpu.memory_space<vmem>>, vector<4x16xbf16>
    tpu.vector_store %arg6[%c0_228, %c641_229], %255 {strides = array<i32>} : memref<24x2304xbf16, #tpu.memory_space<vmem>>, vector<4x16xbf16>,
    %c1_230 = arith.constant 1 : index
    %c0_231 = arith.constant 0 : index
    %c80_232 = arith.constant 80 : index
    %257 = vector.load %arg2[%c1_230, %c0_231, %c80_232] : memref<2x4x256xf32, #tpu.memory_space<vmem>>, vector<1x4x16xf32>
    %258 = vector.shape_cast %257 : vector<1x4x16xf32> to vector<4x16xf32>
    %259 = arith.truncf %258 : vector<4x16xf32> to vector<4x16xbf16>
    %c0_233 = arith.constant 0 : index
    %c769_234 = arith.constant 769 : index
    %260 = vector.load %arg6[%c0_233, %c769_234] : memref<24x2304xbf16, #tpu.memory_space<vmem>>, vector<4x16xbf16>
    tpu.vector_store %arg6[%c0_233, %c769_234], %259 {strides = array<i32>} : memref<24x2304xbf16, #tpu.memory_space<vmem>>, vector<4x16xbf16>,
    %c1_235 = arith.constant 1 : index
    %c0_236 = arith.constant 0 : index
    %c96_237 = arith.constant 96 : index
    %261 = vector.load %arg2[%c1_235, %c0_236, %c96_237] : memref<2x4x256xf32, #tpu.memory_space<vmem>>, vector<1x4x16xf32>
    %262 = vector.shape_cast %261 : vector<1x4x16xf32> to vector<4x16xf32>
    %263 = arith.truncf %262 : vector<4x16xf32> to vector<4x16xbf16>
    %c0_238 = arith.constant 0 : index
    %c897_239 = arith.constant 897 : index
    %264 = vector.load %arg6[%c0_238, %c897_239] : memref<24x2304xbf16, #tpu.memory_space<vmem>>, vector<4x16xbf16>
    tpu.vector_store %arg6[%c0_238, %c897_239], %263 {strides = array<i32>} : memref<24x2304xbf16, #tpu.memory_space<vmem>>, vector<4x16xbf16>,
    %c1_240 = arith.constant 1 : index
    %c0_241 = arith.constant 0 : index
    %c112_242 = arith.constant 112 : index
    %265 = vector.load %arg2[%c1_240, %c0_241, %c112_242] : memref<2x4x256xf32, #tpu.memory_space<vmem>>, vector<1x4x16xf32>
    %266 = vector.shape_cast %265 : vector<1x4x16xf32> to vector<4x16xf32>
    %267 = arith.truncf %266 : vector<4x16xf32> to vector<4x16xbf16>
    %c0_243 = arith.constant 0 : index
    %c1025_244 = arith.constant 1025 : index
    %268 = vector.load %arg6[%c0_243, %c1025_244] : memref<24x2304xbf16, #tpu.memory_space<vmem>>, vector<4x16xbf16>
    tpu.vector_store %arg6[%c0_243, %c1025_244], %267 {strides = array<i32>} : memref<24x2304xbf16, #tpu.memory_space<vmem>>, vector<4x16xbf16>,
    %c1_245 = arith.constant 1 : index
    %c0_246 = arith.constant 0 : index
    %c128_247 = arith.constant 128 : index
    %269 = vector.load %arg2[%c1_245, %c0_246, %c128_247] : memref<2x4x256xf32, #tpu.memory_space<vmem>>, vector<1x4x16xf32>
    %270 = vector.shape_cast %269 : vector<1x4x16xf32> to vector<4x16xf32>
    %271 = arith.truncf %270 : vector<4x16xf32> to vector<4x16xbf16>
    %c0_248 = arith.constant 0 : index
    %c1153_249 = arith.constant 1153 : index
    %272 = vector.load %arg6[%c0_248, %c1153_249] : memref<24x2304xbf16, #tpu.memory_space<vmem>>, vector<4x16xbf16>
    tpu.vector_store %arg6[%c0_248, %c1153_249], %271 {strides = array<i32>} : memref<24x2304xbf16, #tpu.memory_space<vmem>>, vector<4x16xbf16>,
    %c1_250 = arith.constant 1 : index
    %c0_251 = arith.constant 0 : index
    %c144_252 = arith.constant 144 : index
    %273 = vector.load %arg2[%c1_250, %c0_251, %c144_252] : memref<2x4x256xf32, #tpu.memory_space<vmem>>, vector<1x4x16xf32>
    %274 = vector.shape_cast %273 : vector<1x4x16xf32> to vector<4x16xf32>
    %275 = arith.truncf %274 : vector<4x16xf32> to vector<4x16xbf16>
    %c0_253 = arith.constant 0 : index
    %c1281_254 = arith.constant 1281 : index
    %276 = vector.load %arg6[%c0_253, %c1281_254] : memref<24x2304xbf16, #tpu.memory_space<vmem>>, vector<4x16xbf16>
    tpu.vector_store %arg6[%c0_253, %c1281_254], %275 {strides = array<i32>} : memref<24x2304xbf16, #tpu.memory_space<vmem>>, vector<4x16xbf16>,
    %c1_255 = arith.constant 1 : index
    %c0_256 = arith.constant 0 : index
    %c160_257 = arith.constant 160 : index
    %277 = vector.load %arg2[%c1_255, %c0_256, %c160_257] : memref<2x4x256xf32, #tpu.memory_space<vmem>>, vector<1x4x16xf32>
    %278 = vector.shape_cast %277 : vector<1x4x16xf32> to vector<4x16xf32>
    %279 = arith.truncf %278 : vector<4x16xf32> to vector<4x16xbf16>
    %c0_258 = arith.constant 0 : index
    %c1409_259 = arith.constant 1409 : index
    %280 = vector.load %arg6[%c0_258, %c1409_259] : memref<24x2304xbf16, #tpu.memory_space<vmem>>, vector<4x16xbf16>
    tpu.vector_store %arg6[%c0_258, %c1409_259], %279 {strides = array<i32>} : memref<24x2304xbf16, #tpu.memory_space<vmem>>, vector<4x16xbf16>,
    %c1_260 = arith.constant 1 : index
    %c0_261 = arith.constant 0 : index
    %c176_262 = arith.constant 176 : index
    %281 = vector.load %arg2[%c1_260, %c0_261, %c176_262] : memref<2x4x256xf32, #tpu.memory_space<vmem>>, vector<1x4x16xf32>
    %282 = vector.shape_cast %281 : vector<1x4x16xf32> to vector<4x16xf32>
    %283 = arith.truncf %282 : vector<4x16xf32> to vector<4x16xbf16>
    %c0_263 = arith.constant 0 : index
    %c1537_264 = arith.constant 1537 : index
    %284 = vector.load %arg6[%c0_263, %c1537_264] : memref<24x2304xbf16, #tpu.memory_space<vmem>>, vector<4x16xbf16>
    tpu.vector_store %arg6[%c0_263, %c1537_264], %283 {strides = array<i32>} : memref<24x2304xbf16, #tpu.memory_space<vmem>>, vector<4x16xbf16>,
    %c1_265 = arith.constant 1 : index
    %c0_266 = arith.constant 0 : index
    %c192_267 = arith.constant 192 : index
    %285 = vector.load %arg2[%c1_265, %c0_266, %c192_267] : memref<2x4x256xf32, #tpu.memory_space<vmem>>, vector<1x4x16xf32>
    %286 = vector.shape_cast %285 : vector<1x4x16xf32> to vector<4x16xf32>
    %287 = arith.truncf %286 : vector<4x16xf32> to vector<4x16xbf16>
    %c0_268 = arith.constant 0 : index
    %c1665_269 = arith.constant 1665 : index
    %288 = vector.load %arg6[%c0_268, %c1665_269] : memref<24x2304xbf16, #tpu.memory_space<vmem>>, vector<4x16xbf16>
    tpu.vector_store %arg6[%c0_268, %c1665_269], %287 {strides = array<i32>} : memref<24x2304xbf16, #tpu.memory_space<vmem>>, vector<4x16xbf16>,
    %c1_270 = arith.constant 1 : index
    %c0_271 = arith.constant 0 : index
    %c208_272 = arith.constant 208 : index
    %289 = vector.load %arg2[%c1_270, %c0_271, %c208_272] : memref<2x4x256xf32, #tpu.memory_space<vmem>>, vector<1x4x16xf32>
    %290 = vector.shape_cast %289 : vector<1x4x16xf32> to vector<4x16xf32>
    %291 = arith.truncf %290 : vector<4x16xf32> to vector<4x16xbf16>
    %c0_273 = arith.constant 0 : index
    %c1793_274 = arith.constant 1793 : index
    %292 = vector.load %arg6[%c0_273, %c1793_274] : memref<24x2304xbf16, #tpu.memory_space<vmem>>, vector<4x16xbf16>
    tpu.vector_store %arg6[%c0_273, %c1793_274], %291 {strides = array<i32>} : memref<24x2304xbf16, #tpu.memory_space<vmem>>, vector<4x16xbf16>,
    %c1_275 = arith.constant 1 : index
    %c0_276 = arith.constant 0 : index
    %c224_277 = arith.constant 224 : index
    %293 = vector.load %arg2[%c1_275, %c0_276, %c224_277] : memref<2x4x256xf32, #tpu.memory_space<vmem>>, vector<1x4x16xf32>
    %294 = vector.shape_cast %293 : vector<1x4x16xf32> to vector<4x16xf32>
    %295 = arith.truncf %294 : vector<4x16xf32> to vector<4x16xbf16>
    %c0_278 = arith.constant 0 : index
    %c1921_279 = arith.constant 1921 : index
    %296 = vector.load %arg6[%c0_278, %c1921_279] : memref<24x2304xbf16, #tpu.memory_space<vmem>>, vector<4x16xbf16>
    tpu.vector_store %arg6[%c0_278, %c1921_279], %295 {strides = array<i32>} : memref<24x2304xbf16, #tpu.memory_space<vmem>>, vector<4x16xbf16>,
    %c1_280 = arith.constant 1 : index
    %c0_281 = arith.constant 0 : index
    %c240_282 = arith.constant 240 : index
    %297 = vector.load %arg2[%c1_280, %c0_281, %c240_282] : memref<2x4x256xf32, #tpu.memory_space<vmem>>, vector<1x4x16xf32>
    %298 = vector.shape_cast %297 : vector<1x4x16xf32> to vector<4x16xf32>
    %299 = arith.truncf %298 : vector<4x16xf32> to vector<4x16xbf16>
    %c0_283 = arith.constant 0 : index
    %c2049_284 = arith.constant 2049 : index
    %300 = vector.load %arg6[%c0_283, %c2049_284] : memref<24x2304xbf16, #tpu.memory_space<vmem>>, vector<4x16xbf16>
    tpu.vector_store %arg6[%c0_283, %c2049_284], %299 {strides = array<i32>} : memref<24x2304xbf16, #tpu.memory_space<vmem>>, vector<4x16xbf16>,
    %c1_285 = arith.constant 1 : index
    %c0_286 = arith.constant 0 : index
    %c0_287 = arith.constant 0 : index
    %301 = vector.load %arg2[%c1_285, %c0_286, %c0_287] : memref<2x4x256xf32, #tpu.memory_space<vmem>>, vector<1x4x16xf32>
    %302 = vector.shape_cast %301 : vector<1x4x16xf32> to vector<4x16xf32>
    %303 = arith.truncf %302 : vector<4x16xf32> to vector<4x16xbf16>
    %c8_288 = arith.constant 8 : index
    %c128_289 = arith.constant 128 : index
    %304 = vector.load %arg6[%c8_288, %c128_289] : memref<24x2304xbf16, #tpu.memory_space<vmem>>, vector<4x16xbf16>
    tpu.vector_store %arg6[%c8_288, %c128_289], %303 {strides = array<i32>} : memref<24x2304xbf16, #tpu.memory_space<vmem>>, vector<4x16xbf16>,
    %c1_290 = arith.constant 1 : index
    %c0_291 = arith.constant 0 : index
    %c16_292 = arith.constant 16 : index
    %305 = vector.load %arg2[%c1_290, %c0_291, %c16_292] : memref<2x4x256xf32, #tpu.memory_space<vmem>>, vector<1x4x16xf32>
    %306 = vector.shape_cast %305 : vector<1x4x16xf32> to vector<4x16xf32>
    %307 = arith.truncf %306 : vector<4x16xf32> to vector<4x16xbf16>
    %c8_293 = arith.constant 8 : index
    %c256_294 = arith.constant 256 : index
    %308 = vector.load %arg6[%c8_293, %c256_294] : memref<24x2304xbf16, #tpu.memory_space<vmem>>, vector<4x16xbf16>
    tpu.vector_store %arg6[%c8_293, %c256_294], %307 {strides = array<i32>} : memref<24x2304xbf16, #tpu.memory_space<vmem>>, vector<4x16xbf16>,
    %c1_295 = arith.constant 1 : index
    %c0_296 = arith.constant 0 : index
    %c32_297 = arith.constant 32 : index
    %309 = vector.load %arg2[%c1_295, %c0_296, %c32_297] : memref<2x4x256xf32, #tpu.memory_space<vmem>>, vector<1x4x16xf32>
    %310 = vector.shape_cast %309 : vector<1x4x16xf32> to vector<4x16xf32>
    %311 = arith.truncf %310 : vector<4x16xf32> to vector<4x16xbf16>
    %c8_298 = arith.constant 8 : index
    %c384_299 = arith.constant 384 : index
    %312 = vector.load %arg6[%c8_298, %c384_299] : memref<24x2304xbf16, #tpu.memory_space<vmem>>, vector<4x16xbf16>
    tpu.vector_store %arg6[%c8_298, %c384_299], %311 {strides = array<i32>} : memref<24x2304xbf16, #tpu.memory_space<vmem>>, vector<4x16xbf16>,
    %c1_300 = arith.constant 1 : index
    %c0_301 = arith.constant 0 : index
    %c48_302 = arith.constant 48 : index
    %313 = vector.load %arg2[%c1_300, %c0_301, %c48_302] : memref<2x4x256xf32, #tpu.memory_space<vmem>>, vector<1x4x16xf32>
    %314 = vector.shape_cast %313 : vector<1x4x16xf32> to vector<4x16xf32>
    %315 = arith.truncf %314 : vector<4x16xf32> to vector<4x16xbf16>
    %c8_303 = arith.constant 8 : index
    %c512_304 = arith.constant 512 : index
    %316 = vector.load %arg6[%c8_303, %c512_304] : memref<24x2304xbf16, #tpu.memory_space<vmem>>, vector<4x16xbf16>
    tpu.vector_store %arg6[%c8_303, %c512_304], %315 {strides = array<i32>} : memref<24x2304xbf16, #tpu.memory_space<vmem>>, vector<4x16xbf16>,
    %c1_305 = arith.constant 1 : index
    %c0_306 = arith.constant 0 : index
    %c64_307 = arith.constant 64 : index
    %317 = vector.load %arg2[%c1_305, %c0_306, %c64_307] : memref<2x4x256xf32, #tpu.memory_space<vmem>>, vector<1x4x16xf32>
    %318 = vector.shape_cast %317 : vector<1x4x16xf32> to vector<4x16xf32>
    %319 = arith.truncf %318 : vector<4x16xf32> to vector<4x16xbf16>
    %c8_308 = arith.constant 8 : index
    %c640_309 = arith.constant 640 : index
    %320 = vector.load %arg6[%c8_308, %c640_309] : memref<24x2304xbf16, #tpu.memory_space<vmem>>, vector<4x16xbf16>
    tpu.vector_store %arg6[%c8_308, %c640_309], %319 {strides = array<i32>} : memref<24x2304xbf16, #tpu.memory_space<vmem>>, vector<4x16xbf16>,
    %c1_310 = arith.constant 1 : index
    %c0_311 = arith.constant 0 : index
    %c80_312 = arith.constant 80 : index
    %321 = vector.load %arg2[%c1_310, %c0_311, %c80_312] : memref<2x4x256xf32, #tpu.memory_space<vmem>>, vector<1x4x16xf32>
    %322 = vector.shape_cast %321 : vector<1x4x16xf32> to vector<4x16xf32>
    %323 = arith.truncf %322 : vector<4x16xf32> to vector<4x16xbf16>
    %c8_313 = arith.constant 8 : index
    %c768_314 = arith.constant 768 : index
    %324 = vector.load %arg6[%c8_313, %c768_314] : memref<24x2304xbf16, #tpu.memory_space<vmem>>, vector<4x16xbf16>
    tpu.vector_store %arg6[%c8_313, %c768_314], %323 {strides = array<i32>} : memref<24x2304xbf16, #tpu.memory_space<vmem>>, vector<4x16xbf16>,
    %c1_315 = arith.constant 1 : index
    %c0_316 = arith.constant 0 : index
    %c96_317 = arith.constant 96 : index
    %325 = vector.load %arg2[%c1_315, %c0_316, %c96_317] : memref<2x4x256xf32, #tpu.memory_space<vmem>>, vector<1x4x16xf32>
    %326 = vector.shape_cast %325 : vector<1x4x16xf32> to vector<4x16xf32>
    %327 = arith.truncf %326 : vector<4x16xf32> to vector<4x16xbf16>
    %c8_318 = arith.constant 8 : index
    %c896_319 = arith.constant 896 : index
    %328 = vector.load %arg6[%c8_318, %c896_319] : memref<24x2304xbf16, #tpu.memory_space<vmem>>, vector<4x16xbf16>
    tpu.vector_store %arg6[%c8_318, %c896_319], %327 {strides = array<i32>} : memref<24x2304xbf16, #tpu.memory_space<vmem>>, vector<4x16xbf16>,
    %c1_320 = arith.constant 1 : index
    %c0_321 = arith.constant 0 : index
    %c112_322 = arith.constant 112 : index
    %329 = vector.load %arg2[%c1_320, %c0_321, %c112_322] : memref<2x4x256xf32, #tpu.memory_space<vmem>>, vector<1x4x16xf32>
    %330 = vector.shape_cast %329 : vector<1x4x16xf32> to vector<4x16xf32>
    %331 = arith.truncf %330 : vector<4x16xf32> to vector<4x16xbf16>
    %c8_323 = arith.constant 8 : index
    %c1024_324 = arith.constant 1024 : index
    %332 = vector.load %arg6[%c8_323, %c1024_324] : memref<24x2304xbf16, #tpu.memory_space<vmem>>, vector<4x16xbf16>
    tpu.vector_store %arg6[%c8_323, %c1024_324], %331 {strides = array<i32>} : memref<24x2304xbf16, #tpu.memory_space<vmem>>, vector<4x16xbf16>,
    %c1_325 = arith.constant 1 : index
    %c0_326 = arith.constant 0 : index
    %c128_327 = arith.constant 128 : index
    %333 = vector.load %arg2[%c1_325, %c0_326, %c128_327] : memref<2x4x256xf32, #tpu.memory_space<vmem>>, vector<1x4x16xf32>
    %334 = vector.shape_cast %333 : vector<1x4x16xf32> to vector<4x16xf32>
    %335 = arith.truncf %334 : vector<4x16xf32> to vector<4x16xbf16>
    %c8_328 = arith.constant 8 : index
    %c1152_329 = arith.constant 1152 : index
    %336 = vector.load %arg6[%c8_328, %c1152_329] : memref<24x2304xbf16, #tpu.memory_space<vmem>>, vector<4x16xbf16>
    tpu.vector_store %arg6[%c8_328, %c1152_329], %335 {strides = array<i32>} : memref<24x2304xbf16, #tpu.memory_space<vmem>>, vector<4x16xbf16>,
    %c1_330 = arith.constant 1 : index
    %c0_331 = arith.constant 0 : index
    %c144_332 = arith.constant 144 : index
    %337 = vector.load %arg2[%c1_330, %c0_331, %c144_332] : memref<2x4x256xf32, #tpu.memory_space<vmem>>, vector<1x4x16xf32>
    %338 = vector.shape_cast %337 : vector<1x4x16xf32> to vector<4x16xf32>
    %339 = arith.truncf %338 : vector<4x16xf32> to vector<4x16xbf16>
    %c8_333 = arith.constant 8 : index
    %c1280_334 = arith.constant 1280 : index
    %340 = vector.load %arg6[%c8_333, %c1280_334] : memref<24x2304xbf16, #tpu.memory_space<vmem>>, vector<4x16xbf16>
    tpu.vector_store %arg6[%c8_333, %c1280_334], %339 {strides = array<i32>} : memref<24x2304xbf16, #tpu.memory_space<vmem>>, vector<4x16xbf16>,
    %c1_335 = arith.constant 1 : index
    %c0_336 = arith.constant 0 : index
    %c160_337 = arith.constant 160 : index
    %341 = vector.load %arg2[%c1_335, %c0_336, %c160_337] : memref<2x4x256xf32, #tpu.memory_space<vmem>>, vector<1x4x16xf32>
    %342 = vector.shape_cast %341 : vector<1x4x16xf32> to vector<4x16xf32>
    %343 = arith.truncf %342 : vector<4x16xf32> to vector<4x16xbf16>
    %c8_338 = arith.constant 8 : index
    %c1408_339 = arith.constant 1408 : index
    %344 = vector.load %arg6[%c8_338, %c1408_339] : memref<24x2304xbf16, #tpu.memory_space<vmem>>, vector<4x16xbf16>
    tpu.vector_store %arg6[%c8_338, %c1408_339], %343 {strides = array<i32>} : memref<24x2304xbf16, #tpu.memory_space<vmem>>, vector<4x16xbf16>,
    %c1_340 = arith.constant 1 : index
    %c0_341 = arith.constant 0 : index
    %c176_342 = arith.constant 176 : index
    %345 = vector.load %arg2[%c1_340, %c0_341, %c176_342] : memref<2x4x256xf32, #tpu.memory_space<vmem>>, vector<1x4x16xf32>
    %346 = vector.shape_cast %345 : vector<1x4x16xf32> to vector<4x16xf32>
    %347 = arith.truncf %346 : vector<4x16xf32> to vector<4x16xbf16>
    %c8_343 = arith.constant 8 : index
    %c1536_344 = arith.constant 1536 : index
    %348 = vector.load %arg6[%c8_343, %c1536_344] : memref<24x2304xbf16, #tpu.memory_space<vmem>>, vector<4x16xbf16>
    tpu.vector_store %arg6[%c8_343, %c1536_344], %347 {strides = array<i32>} : memref<24x2304xbf16, #tpu.memory_space<vmem>>, vector<4x16xbf16>,
    %c1_345 = arith.constant 1 : index
    %c0_346 = arith.constant 0 : index
    %c192_347 = arith.constant 192 : index
    %349 = vector.load %arg2[%c1_345, %c0_346, %c192_347] : memref<2x4x256xf32, #tpu.memory_space<vmem>>, vector<1x4x16xf32>
    %350 = vector.shape_cast %349 : vector<1x4x16xf32> to vector<4x16xf32>
    %351 = arith.truncf %350 : vector<4x16xf32> to vector<4x16xbf16>
    %c8_348 = arith.constant 8 : index
    %c1664_349 = arith.constant 1664 : index
    %352 = vector.load %arg6[%c8_348, %c1664_349] : memref<24x2304xbf16, #tpu.memory_space<vmem>>, vector<4x16xbf16>
    tpu.vector_store %arg6[%c8_348, %c1664_349], %351 {strides = array<i32>} : memref<24x2304xbf16, #tpu.memory_space<vmem>>, vector<4x16xbf16>,
    %c1_350 = arith.constant 1 : index
    %c0_351 = arith.constant 0 : index
    %c208_352 = arith.constant 208 : index
    %353 = vector.load %arg2[%c1_350, %c0_351, %c208_352] : memref<2x4x256xf32, #tpu.memory_space<vmem>>, vector<1x4x16xf32>
    %354 = vector.shape_cast %353 : vector<1x4x16xf32> to vector<4x16xf32>
    %355 = arith.truncf %354 : vector<4x16xf32> to vector<4x16xbf16>
    %c8_353 = arith.constant 8 : index
    %c1792_354 = arith.constant 1792 : index
    %356 = vector.load %arg6[%c8_353, %c1792_354] : memref<24x2304xbf16, #tpu.memory_space<vmem>>, vector<4x16xbf16>
    tpu.vector_store %arg6[%c8_353, %c1792_354], %355 {strides = array<i32>} : memref<24x2304xbf16, #tpu.memory_space<vmem>>, vector<4x16xbf16>,
    %c1_355 = arith.constant 1 : index
    %c0_356 = arith.constant 0 : index
    %c224_357 = arith.constant 224 : index
    %357 = vector.load %arg2[%c1_355, %c0_356, %c224_357] : memref<2x4x256xf32, #tpu.memory_space<vmem>>, vector<1x4x16xf32>
    %358 = vector.shape_cast %357 : vector<1x4x16xf32> to vector<4x16xf32>
    %359 = arith.truncf %358 : vector<4x16xf32> to vector<4x16xbf16>
    %c8_358 = arith.constant 8 : index
    %c1920_359 = arith.constant 1920 : index
    %360 = vector.load %arg6[%c8_358, %c1920_359] : memref<24x2304xbf16, #tpu.memory_space<vmem>>, vector<4x16xbf16>
    tpu.vector_store %arg6[%c8_358, %c1920_359], %359 {strides = array<i32>} : memref<24x2304xbf16, #tpu.memory_space<vmem>>, vector<4x16xbf16>,
    %c1_360 = arith.constant 1 : index
    %c0_361 = arith.constant 0 : index
    %c240_362 = arith.constant 240 : index
    %361 = vector.load %arg2[%c1_360, %c0_361, %c240_362] : memref<2x4x256xf32, #tpu.memory_space<vmem>>, vector<1x4x16xf32>
    %362 = vector.shape_cast %361 : vector<1x4x16xf32> to vector<4x16xf32>
    %363 = arith.truncf %362 : vector<4x16xf32> to vector<4x16xbf16>
    %c8_363 = arith.constant 8 : index
    %c2048_364 = arith.constant 2048 : index
    %364 = vector.load %arg6[%c8_363, %c2048_364] : memref<24x2304xbf16, #tpu.memory_space<vmem>>, vector<4x16xbf16>
    tpu.vector_store %arg6[%c8_363, %c2048_364], %363 {strides = array<i32>} : memref<24x2304xbf16, #tpu.memory_space<vmem>>, vector<4x16xbf16>,
    %c1_365 = arith.constant 1 : index
    %c0_366 = arith.constant 0 : index
    %c0_367 = arith.constant 0 : index
    %365 = vector.load %arg2[%c1_365, %c0_366, %c0_367] : memref<2x4x256xf32, #tpu.memory_space<vmem>>, vector<1x4x16xf32>
    %366 = vector.shape_cast %365 : vector<1x4x16xf32> to vector<4x16xf32>
    %367 = arith.truncf %366 : vector<4x16xf32> to vector<4x16xbf16>
    %c16_368 = arith.constant 16 : index
    %c127_369 = arith.constant 127 : index
    %368 = vector.load %arg6[%c16_368, %c127_369] : memref<24x2304xbf16, #tpu.memory_space<vmem>>, vector<4x16xbf16>
    tpu.vector_store %arg6[%c16_368, %c127_369], %367 {strides = array<i32>} : memref<24x2304xbf16, #tpu.memory_space<vmem>>, vector<4x16xbf16>,
    %c1_370 = arith.constant 1 : index
    %c0_371 = arith.constant 0 : index
    %c16_372 = arith.constant 16 : index
    %369 = vector.load %arg2[%c1_370, %c0_371, %c16_372] : memref<2x4x256xf32, #tpu.memory_space<vmem>>, vector<1x4x16xf32>
    %370 = vector.shape_cast %369 : vector<1x4x16xf32> to vector<4x16xf32>
    %371 = arith.truncf %370 : vector<4x16xf32> to vector<4x16xbf16>
    %c16_373 = arith.constant 16 : index
    %c255_374 = arith.constant 255 : index
    %372 = vector.load %arg6[%c16_373, %c255_374] : memref<24x2304xbf16, #tpu.memory_space<vmem>>, vector<4x16xbf16>
    tpu.vector_store %arg6[%c16_373, %c255_374], %371 {strides = array<i32>} : memref<24x2304xbf16, #tpu.memory_space<vmem>>, vector<4x16xbf16>,
    %c1_375 = arith.constant 1 : index
    %c0_376 = arith.constant 0 : index
    %c32_377 = arith.constant 32 : index
    %373 = vector.load %arg2[%c1_375, %c0_376, %c32_377] : memref<2x4x256xf32, #tpu.memory_space<vmem>>, vector<1x4x16xf32>
    %374 = vector.shape_cast %373 : vector<1x4x16xf32> to vector<4x16xf32>
    %375 = arith.truncf %374 : vector<4x16xf32> to vector<4x16xbf16>
    %c16_378 = arith.constant 16 : index
    %c383_379 = arith.constant 383 : index
    %376 = vector.load %arg6[%c16_378, %c383_379] : memref<24x2304xbf16, #tpu.memory_space<vmem>>, vector<4x16xbf16>
    tpu.vector_store %arg6[%c16_378, %c383_379], %375 {strides = array<i32>} : memref<24x2304xbf16, #tpu.memory_space<vmem>>, vector<4x16xbf16>,
    %c1_380 = arith.constant 1 : index
    %c0_381 = arith.constant 0 : index
    %c48_382 = arith.constant 48 : index
    %377 = vector.load %arg2[%c1_380, %c0_381, %c48_382] : memref<2x4x256xf32, #tpu.memory_space<vmem>>, vector<1x4x16xf32>
    %378 = vector.shape_cast %377 : vector<1x4x16xf32> to vector<4x16xf32>
    %379 = arith.truncf %378 : vector<4x16xf32> to vector<4x16xbf16>
    %c16_383 = arith.constant 16 : index
    %c511_384 = arith.constant 511 : index
    %380 = vector.load %arg6[%c16_383, %c511_384] : memref<24x2304xbf16, #tpu.memory_space<vmem>>, vector<4x16xbf16>
    tpu.vector_store %arg6[%c16_383, %c511_384], %379 {strides = array<i32>} : memref<24x2304xbf16, #tpu.memory_space<vmem>>, vector<4x16xbf16>,
    %c1_385 = arith.constant 1 : index
    %c0_386 = arith.constant 0 : index
    %c64_387 = arith.constant 64 : index
    %381 = vector.load %arg2[%c1_385, %c0_386, %c64_387] : memref<2x4x256xf32, #tpu.memory_space<vmem>>, vector<1x4x16xf32>
    %382 = vector.shape_cast %381 : vector<1x4x16xf32> to vector<4x16xf32>
    %383 = arith.truncf %382 : vector<4x16xf32> to vector<4x16xbf16>
    %c16_388 = arith.constant 16 : index
    %c639_389 = arith.constant 639 : index
    %384 = vector.load %arg6[%c16_388, %c639_389] : memref<24x2304xbf16, #tpu.memory_space<vmem>>, vector<4x16xbf16>
    tpu.vector_store %arg6[%c16_388, %c639_389], %383 {strides = array<i32>} : memref<24x2304xbf16, #tpu.memory_space<vmem>>, vector<4x16xbf16>,
    %c1_390 = arith.constant 1 : index
    %c0_391 = arith.constant 0 : index
    %c80_392 = arith.constant 80 : index
    %385 = vector.load %arg2[%c1_390, %c0_391, %c80_392] : memref<2x4x256xf32, #tpu.memory_space<vmem>>, vector<1x4x16xf32>
    %386 = vector.shape_cast %385 : vector<1x4x16xf32> to vector<4x16xf32>
    %387 = arith.truncf %386 : vector<4x16xf32> to vector<4x16xbf16>
    %c16_393 = arith.constant 16 : index
    %c767_394 = arith.constant 767 : index
    %388 = vector.load %arg6[%c16_393, %c767_394] : memref<24x2304xbf16, #tpu.memory_space<vmem>>, vector<4x16xbf16>
    tpu.vector_store %arg6[%c16_393, %c767_394], %387 {strides = array<i32>} : memref<24x2304xbf16, #tpu.memory_space<vmem>>, vector<4x16xbf16>,
    %c1_395 = arith.constant 1 : index
    %c0_396 = arith.constant 0 : index
    %c96_397 = arith.constant 96 : index
    %389 = vector.load %arg2[%c1_395, %c0_396, %c96_397] : memref<2x4x256xf32, #tpu.memory_space<vmem>>, vector<1x4x16xf32>
    %390 = vector.shape_cast %389 : vector<1x4x16xf32> to vector<4x16xf32>
    %391 = arith.truncf %390 : vector<4x16xf32> to vector<4x16xbf16>
    %c16_398 = arith.constant 16 : index
    %c895_399 = arith.constant 895 : index
    %392 = vector.load %arg6[%c16_398, %c895_399] : memref<24x2304xbf16, #tpu.memory_space<vmem>>, vector<4x16xbf16>
    tpu.vector_store %arg6[%c16_398, %c895_399], %391 {strides = array<i32>} : memref<24x2304xbf16, #tpu.memory_space<vmem>>, vector<4x16xbf16>,
    %c1_400 = arith.constant 1 : index
    %c0_401 = arith.constant 0 : index
    %c112_402 = arith.constant 112 : index
    %393 = vector.load %arg2[%c1_400, %c0_401, %c112_402] : memref<2x4x256xf32, #tpu.memory_space<vmem>>, vector<1x4x16xf32>
    %394 = vector.shape_cast %393 : vector<1x4x16xf32> to vector<4x16xf32>
    %395 = arith.truncf %394 : vector<4x16xf32> to vector<4x16xbf16>
    %c16_403 = arith.constant 16 : index
    %c1023_404 = arith.constant 1023 : index
    %396 = vector.load %arg6[%c16_403, %c1023_404] : memref<24x2304xbf16, #tpu.memory_space<vmem>>, vector<4x16xbf16>
    tpu.vector_store %arg6[%c16_403, %c1023_404], %395 {strides = array<i32>} : memref<24x2304xbf16, #tpu.memory_space<vmem>>, vector<4x16xbf16>,
    %c1_405 = arith.constant 1 : index
    %c0_406 = arith.constant 0 : index
    %c128_407 = arith.constant 128 : index
    %397 = vector.load %arg2[%c1_405, %c0_406, %c128_407] : memref<2x4x256xf32, #tpu.memory_space<vmem>>, vector<1x4x16xf32>
    %398 = vector.shape_cast %397 : vector<1x4x16xf32> to vector<4x16xf32>
    %399 = arith.truncf %398 : vector<4x16xf32> to vector<4x16xbf16>
    %c16_408 = arith.constant 16 : index
    %c1151_409 = arith.constant 1151 : index
    %400 = vector.load %arg6[%c16_408, %c1151_409] : memref<24x2304xbf16, #tpu.memory_space<vmem>>, vector<4x16xbf16>
    tpu.vector_store %arg6[%c16_408, %c1151_409], %399 {strides = array<i32>} : memref<24x2304xbf16, #tpu.memory_space<vmem>>, vector<4x16xbf16>,
    %c1_410 = arith.constant 1 : index
    %c0_411 = arith.constant 0 : index
    %c144_412 = arith.constant 144 : index
    %401 = vector.load %arg2[%c1_410, %c0_411, %c144_412] : memref<2x4x256xf32, #tpu.memory_space<vmem>>, vector<1x4x16xf32>
    %402 = vector.shape_cast %401 : vector<1x4x16xf32> to vector<4x16xf32>
    %403 = arith.truncf %402 : vector<4x16xf32> to vector<4x16xbf16>
    %c16_413 = arith.constant 16 : index
    %c1279_414 = arith.constant 1279 : index
    %404 = vector.load %arg6[%c16_413, %c1279_414] : memref<24x2304xbf16, #tpu.memory_space<vmem>>, vector<4x16xbf16>
    tpu.vector_store %arg6[%c16_413, %c1279_414], %403 {strides = array<i32>} : memref<24x2304xbf16, #tpu.memory_space<vmem>>, vector<4x16xbf16>,
    %c1_415 = arith.constant 1 : index
    %c0_416 = arith.constant 0 : index
    %c160_417 = arith.constant 160 : index
    %405 = vector.load %arg2[%c1_415, %c0_416, %c160_417] : memref<2x4x256xf32, #tpu.memory_space<vmem>>, vector<1x4x16xf32>
    %406 = vector.shape_cast %405 : vector<1x4x16xf32> to vector<4x16xf32>
    %407 = arith.truncf %406 : vector<4x16xf32> to vector<4x16xbf16>
    %c16_418 = arith.constant 16 : index
    %c1407_419 = arith.constant 1407 : index
    %408 = vector.load %arg6[%c16_418, %c1407_419] : memref<24x2304xbf16, #tpu.memory_space<vmem>>, vector<4x16xbf16>
    tpu.vector_store %arg6[%c16_418, %c1407_419], %407 {strides = array<i32>} : memref<24x2304xbf16, #tpu.memory_space<vmem>>, vector<4x16xbf16>,
    %c1_420 = arith.constant 1 : index
    %c0_421 = arith.constant 0 : index
    %c176_422 = arith.constant 176 : index
    %409 = vector.load %arg2[%c1_420, %c0_421, %c176_422] : memref<2x4x256xf32, #tpu.memory_space<vmem>>, vector<1x4x16xf32>
    %410 = vector.shape_cast %409 : vector<1x4x16xf32> to vector<4x16xf32>
    %411 = arith.truncf %410 : vector<4x16xf32> to vector<4x16xbf16>
    %c16_423 = arith.constant 16 : index
    %c1535_424 = arith.constant 1535 : index
    %412 = vector.load %arg6[%c16_423, %c1535_424] : memref<24x2304xbf16, #tpu.memory_space<vmem>>, vector<4x16xbf16>
    tpu.vector_store %arg6[%c16_423, %c1535_424], %411 {strides = array<i32>} : memref<24x2304xbf16, #tpu.memory_space<vmem>>, vector<4x16xbf16>,
    %c1_425 = arith.constant 1 : index
    %c0_426 = arith.constant 0 : index
    %c192_427 = arith.constant 192 : index
    %413 = vector.load %arg2[%c1_425, %c0_426, %c192_427] : memref<2x4x256xf32, #tpu.memory_space<vmem>>, vector<1x4x16xf32>
    %414 = vector.shape_cast %413 : vector<1x4x16xf32> to vector<4x16xf32>
    %415 = arith.truncf %414 : vector<4x16xf32> to vector<4x16xbf16>
    %c16_428 = arith.constant 16 : index
    %c1663_429 = arith.constant 1663 : index
    %416 = vector.load %arg6[%c16_428, %c1663_429] : memref<24x2304xbf16, #tpu.memory_space<vmem>>, vector<4x16xbf16>
    tpu.vector_store %arg6[%c16_428, %c1663_429], %415 {strides = array<i32>} : memref<24x2304xbf16, #tpu.memory_space<vmem>>, vector<4x16xbf16>,
    %c1_430 = arith.constant 1 : index
    %c0_431 = arith.constant 0 : index
    %c208_432 = arith.constant 208 : index
    %417 = vector.load %arg2[%c1_430, %c0_431, %c208_432] : memref<2x4x256xf32, #tpu.memory_space<vmem>>, vector<1x4x16xf32>
    %418 = vector.shape_cast %417 : vector<1x4x16xf32> to vector<4x16xf32>
    %419 = arith.truncf %418 : vector<4x16xf32> to vector<4x16xbf16>
    %c16_433 = arith.constant 16 : index
    %c1791_434 = arith.constant 1791 : index
    %420 = vector.load %arg6[%c16_433, %c1791_434] : memref<24x2304xbf16, #tpu.memory_space<vmem>>, vector<4x16xbf16>
    tpu.vector_store %arg6[%c16_433, %c1791_434], %419 {strides = array<i32>} : memref<24x2304xbf16, #tpu.memory_space<vmem>>, vector<4x16xbf16>,
    %c1_435 = arith.constant 1 : index
    %c0_436 = arith.constant 0 : index
    %c224_437 = arith.constant 224 : index
    %421 = vector.load %arg2[%c1_435, %c0_436, %c224_437] : memref<2x4x256xf32, #tpu.memory_space<vmem>>, vector<1x4x16xf32>
    %422 = vector.shape_cast %421 : vector<1x4x16xf32> to vector<4x16xf32>
    %423 = arith.truncf %422 : vector<4x16xf32> to vector<4x16xbf16>
    %c16_438 = arith.constant 16 : index
    %c1919_439 = arith.constant 1919 : index
    %424 = vector.load %arg6[%c16_438, %c1919_439] : memref<24x2304xbf16, #tpu.memory_space<vmem>>, vector<4x16xbf16>
    tpu.vector_store %arg6[%c16_438, %c1919_439], %423 {strides = array<i32>} : memref<24x2304xbf16, #tpu.memory_space<vmem>>, vector<4x16xbf16>,
    %c1_440 = arith.constant 1 : index
    %c0_441 = arith.constant 0 : index
    %c240_442 = arith.constant 240 : index
    %425 = vector.load %arg2[%c1_440, %c0_441, %c240_442] : memref<2x4x256xf32, #tpu.memory_space<vmem>>, vector<1x4x16xf32>
    %426 = vector.shape_cast %425 : vector<1x4x16xf32> to vector<4x16xf32>
    %427 = arith.truncf %426 : vector<4x16xf32> to vector<4x16xbf16>
    %c16_443 = arith.constant 16 : index
    %c2047_444 = arith.constant 2047 : index
    %428 = vector.load %arg6[%c16_443, %c2047_444] : memref<24x2304xbf16, #tpu.memory_space<vmem>>, vector<4x16xbf16>
    tpu.vector_store %arg6[%c16_443, %c2047_444], %427 {strides = array<i32>} : memref<24x2304xbf16, #tpu.memory_space<vmem>>, vector<4x16xbf16>,
    %c0_445 = arith.constant 0 : index
    %c0_446 = arith.constant 0 : index
    %429 = vector.load %arg6[%c0_445, %c0_446] : memref<24x2304xbf16, #tpu.memory_space<vmem>>, vector<24x2048xbf16>
    %c0_447 = arith.constant 0 : index
    %c0_448 = arith.constant 0 : index
    %c0_449 = arith.constant 0 : index
    %430 = vector.load %arg3[%c0_447, %c0_448, %c0_449] : memref<3x8x24xbf16, #tpu.memory_space<vmem>>, vector<1x8x24xbf16>
    %431 = vector.shape_cast %430 : vector<1x8x24xbf16> to vector<8x24xbf16>
    %cst_450 = arith.constant dense<0.000000e+00> : vector<8x2048xf32>
    %432 = tpu.matmul %431, %429, %cst_450 {dimension_numbers = #tpu.dot_dimension_numbers<[1], [0], [0], [1], [0, 0, 1, 1], [], []>} : vector<8x24xbf16>, vector<24x2048xbf16>, vector<8x2048xf32> -> vector<8x2048xf32>
    %c0_451 = arith.constant 0 : index
    %c128_452 = arith.constant 128 : index
    %433 = vector.load %arg6[%c0_451, %c128_452] : memref<24x2304xbf16, #tpu.memory_space<vmem>>, vector<24x2048xbf16>
    %c1_453 = arith.constant 1 : index
    %c0_454 = arith.constant 0 : index
    %c0_455 = arith.constant 0 : index
    %434 = vector.load %arg3[%c1_453, %c0_454, %c0_455] : memref<3x8x24xbf16, #tpu.memory_space<vmem>>, vector<1x8x24xbf16>
    %435 = vector.shape_cast %434 : vector<1x8x24xbf16> to vector<8x24xbf16>
    %cst_456 = arith.constant dense<0.000000e+00> : vector<8x2048xf32>
    %436 = tpu.matmul %435, %433, %cst_456 {dimension_numbers = #tpu.dot_dimension_numbers<[1], [0], [0], [1], [0, 0, 1, 1], [], []>} : vector<8x24xbf16>, vector<24x2048xbf16>, vector<8x2048xf32> -> vector<8x2048xf32>
    %437 = arith.addf %432, %436 : vector<8x2048xf32>
    %c0_457 = arith.constant 0 : index
    %c256_458 = arith.constant 256 : index
    %438 = vector.load %arg6[%c0_457, %c256_458] : memref<24x2304xbf16, #tpu.memory_space<vmem>>, vector<24x2048xbf16>
    %c2_459 = arith.constant 2 : index
    %c0_460 = arith.constant 0 : index
    %c0_461 = arith.constant 0 : index
    %439 = vector.load %arg3[%c2_459, %c0_460, %c0_461] : memref<3x8x24xbf16, #tpu.memory_space<vmem>>, vector<1x8x24xbf16>
    %440 = vector.shape_cast %439 : vector<1x8x24xbf16> to vector<8x24xbf16>
    %cst_462 = arith.constant dense<0.000000e+00> : vector<8x2048xf32>
    %441 = tpu.matmul %440, %438, %cst_462 {dimension_numbers = #tpu.dot_dimension_numbers<[1], [0], [0], [1], [0, 0, 1, 1], [], []>} : vector<8x24xbf16>, vector<24x2048xbf16>, vector<8x2048xf32> -> vector<8x2048xf32>
    %442 = arith.addf %437, %441 : vector<8x2048xf32>
    %443 = vector.broadcast %2 : vector<1x2048xf32> to vector<8x2048xf32>
    %444 = arith.mulf %442, %443 : vector<8x2048xf32>
    %cst_463 = arith.constant dense<0.000000e+00> : vector<8xf32>
    %445 = vector.multi_reduction <add>, %444, %cst_463 [1] : vector<8x2048xf32> to vector<8xf32>
    %446 = vector.shape_cast %445 : vector<8xf32> to vector<8x1xf32>
    %cst_464 = arith.constant 3.906250e-03 : f32
    %447 = vector.broadcast %cst_464 : f32 to vector<8x1xf32>
    %448 = arith.mulf %446, %447 : vector<8x1xf32>
    %449 = vector.broadcast %448 : vector<8x1xf32> to vector<8x2048xf32>
    %450 = arith.subf %442, %449 : vector<8x2048xf32>
    %451 = vector.broadcast %2 : vector<1x2048xf32> to vector<8x2048xf32>
    %452 = arith.mulf %450, %451 : vector<8x2048xf32>
    %453 = arith.mulf %452, %452 : vector<8x2048xf32>
    %cst_465 = arith.constant dense<0.000000e+00> : vector<8xf32>
    %454 = vector.multi_reduction <add>, %453, %cst_465 [1] : vector<8x2048xf32> to vector<8xf32>
    %455 = vector.shape_cast %454 : vector<8xf32> to vector<8x1xf32>
    %cst_466 = arith.constant 3.906250e-03 : f32
    %456 = vector.broadcast %cst_466 : f32 to vector<8x1xf32>
    %457 = arith.mulf %455, %456 : vector<8x1xf32>
    %458 = vector.broadcast %448 : vector<8x1xf32> to vector<8x2048xf32>
    %459 = arith.subf %442, %458 : vector<8x2048xf32>
    %cst_467 = arith.constant 9.99999974E-6 : f32
    %460 = vector.broadcast %cst_467 : f32 to vector<8x1xf32>
    %461 = arith.addf %457, %460 : vector<8x1xf32>
    %462 = math.rsqrt %461 : vector<8x1xf32>
    %463 = vector.broadcast %462 : vector<8x1xf32> to vector<8x2048xf32>
    %464 = arith.mulf %459, %463 : vector<8x2048xf32>
    %cst_468 = arith.constant 0.000000e+00 : f32
    %465 = vector.broadcast %cst_468 : f32 to vector<8x2048xf32>
    %466 = arith.maximumf %464, %465 : vector<8x2048xf32>
    %467 = arith.truncf %466 : vector<8x2048xf32> to vector<8x2048xbf16>
    %c1_469 = arith.constant 1 : index
    %c0_470 = arith.constant 0 : index
    %c0_471 = arith.constant 0 : index
    %468 = vector.load %arg5[%c1_469, %c0_470, %c0_471] : memref<2x8x2048xbf16, #tpu.memory_space<vmem>>, vector<1x8x2048xbf16>
    %469 = vector.shape_cast %468 : vector<1x8x2048xbf16> to vector<8x2048xbf16>
    %470 = vector.shape_cast %467 : vector<8x2048xbf16> to vector<1x8x2048xbf16>
    tpu.vector_store %arg5[%c1_469, %c0_470, %c0_471], %470 {strides = array<i32>} : memref<2x8x2048xbf16, #tpu.memory_space<vmem>>, vector<1x8x2048xbf16>,
    return
  }
  func.func @transform_0(%arg0: i32, %arg1: i32) -> (i32, i32, i32) {
    %c0_i32 = arith.constant 0 : i32
    %c0_i32_0 = arith.constant 0 : i32
    %c0_i32_1 = arith.constant 0 : i32
    return %arg0, %c0_i32, %c0_i32_0 : i32, i32, i32
  }
  func.func @transform_1(%arg0: i32, %arg1: i32) -> (i32, i32, i32) {
    %c0_i32 = arith.constant 0 : i32
    %c0_i32_0 = arith.constant 0 : i32
    %c0_i32_1 = arith.constant 0 : i32
    return %c0_i32, %arg1, %c0_i32_0 : i32, i32, i32
  }
  func.func @transform_2(%arg0: i32, %arg1: i32) -> (i32, i32) {
    %c0_i32 = arith.constant 0 : i32
    %c0_i32_0 = arith.constant 0 : i32
    %c0_i32_1 = arith.constant 0 : i32
    return %c0_i32, %c0_i32_0 : i32, i32
  }
  func.func @transform_3(%arg0: i32, %arg1: i32) -> (i32, i32, i32) {
    %c0_i32 = arith.constant 0 : i32
    %c0_i32_0 = arith.constant 0 : i32
    return %arg0, %arg1, %c0_i32 : i32, i32, i32
  }
}

</mosaic_0001>

<bundles_post_ra>
// kernel: tpu_custom_call.1
= control target key start
LH: loop header
LB: loop body
LE: loop exit
PB: predicated region body
PF: predicated region fallthrough
CT: control target
= control target key end

     0   :  { %8 = vsyncpa [#allocation4], 0  ;;  %s6773_s0 = inlined_call_operand.hbm [shape: f32[2,4,256], index: 0, kind: input, shape index: {}]   ;;  %s6774_s1 = inlined_call_operand.hbm [shape: bf16[3,8,24], index: 1, kind: input, shape index: {}]   ;;  %s6775_s2 = inlined_call_operand.hbm [shape: f32[1,2048], index: 2, kind: input, shape index: {}]   ;;  %s6776_s3 = inlined_call_operand.hbm [shape: bf16[2,8,2048], index: 3, kind: output, shape index: {}]  }
   0x1   :  { %9 = vsyncpa [#allocation7], 0 }
   0x2   :  { %10 = vsyncpa [#allocation5], 0  ;;  %s5612_s12 = smov [#allocation6]   ;;  %s5518_s16 = scalar_lea.hbm %s6774_s1, 192 }
   0x3   :  { %s28_s13 = sshll.u32 %s5612_s12, 4  ;;  %p5519_p0 = scmp.ne.s32.totalorder %s6774_s1, %s5518_s16  ;;  %s29_s13 = int_to_ptr.vmem [resolvable:$true] %s28_s13 }
   0x4   :  { %p5522_p1 = scmp.lt.u32.totalorder %s5518_s16, %s6774_s1 }
   0x6   :  { %p5524_p2 = pnand %p5522_p1, %p5519_p0 }
   0x8   :  { %5527 = shalt.err (!%p5524_p2)
}
   0x9   :  { %s5528_s21 = scalar_lea.vmem %s29_s13, 192  ;;  %p5533_p4 = scmp.lt.s32.totalorder %s29_s13, %s29_s13 }
   0xa   :  { %p5529_p3 = scmp.ne.s32.totalorder %s29_s13, %s5528_s21  ;;  %p5534_p5 = scmp.lt.s32.totalorder %s5528_s21, %s5528_s21 }
   0xc   :  { %p5535_p6 = por %p5534_p5, %p5533_p4 }
   0xe   :  { %p5536_p7 = pnand %p5535_p6, %p5529_p3 }
  0x10   :  { %5539 = shalt.err (!%p5536_p7)
}
  0x11   :  { %s5613_s22 = smov 64   ;;  %s5614_s23 = smov 4  }
  0x12   :  { %34 = dma.hbm_to_vmem [thread:$0]  %s6774_s1, 192, %s29_s13, [#allocation7], %s5613_s22, %s5613_s22, %s5614_s23  }
  0x13   :  { %s5615_s26 = smov [#allocation3]   ;;  %s5540_s30 = scalar_lea.hbm %s6773_s0, 256 }
  0x14   :  { %s16_s27 = sshll.u32 %s5615_s26, 4  ;;  %p5541_p8 = scmp.ne.s32.totalorder %s6773_s0, %s5540_s30  ;;  %s17_s27 = int_to_ptr.vmem [resolvable:$true] %s16_s27 }
  0x15   :  { %p5544_p9 = scmp.lt.u32.totalorder %s5540_s30, %s6773_s0 }
  0x17   :  { %p5546_p10 = pnand %p5544_p9, %p5541_p8 }
  0x19   :  { %5549 = shalt.err (!%p5546_p10)
}
  0x1a   :  { %s5550_s8 = scalar_lea.vmem %s17_s27, 256  ;;  %p5555_p12 = scmp.lt.s32.totalorder %s17_s27, %s17_s27 }
  0x1b   :  { %p5551_p11 = scmp.ne.s32.totalorder %s17_s27, %s5550_s8  ;;  %p5556_p13 = scmp.lt.s32.totalorder %s5550_s8, %s5550_s8 }
  0x1d   :  { %p5557_p0 = por %p5556_p13, %p5555_p12 }
  0x1f   :  { %p5558_p1 = pnand %p5557_p0, %p5551_p11 }
  0x21   :  { %5561 = shalt.err (!%p5558_p1)
}
  0x22   :  { %s5616_s1 = smov 128   ;;  %s5617_s9 = smov 8  }
  0x23   :  { %22 = dma.hbm_to_vmem [thread:$0]  %s6773_s0, 256, %s17_s27, [#allocation4], %s5616_s1, %s5616_s1, %s5617_s9  }
  0x24   :  { %s5618_s12 = smov [#allocation8]   ;;  %s5562_s16 = scalar_lea.hbm %s6775_s2, 256 }
  0x25   :  { %s41_s13 = sshll.u32 %s5618_s12, 4  ;;  %p5563_p2 = scmp.ne.s32.totalorder %s6775_s2, %s5562_s16  ;;  %s42_s13 = int_to_ptr.vmem [resolvable:$true] %s41_s13 }
  0x26   :  { %p5566_p3 = scmp.lt.u32.totalorder %s5562_s16, %s6775_s2 }
  0x28   :  { %p5568_p4 = pnand %p5566_p3, %p5563_p2 }
  0x2a   :  { %5571 = shalt.err (!%p5568_p4)
}
  0x2b   :  { %s5572_s21 = scalar_lea.vmem %s42_s13, 256  ;;  %p5577_p6 = scmp.lt.s32.totalorder %s42_s13, %s42_s13 }
  0x2c   :  { %p5573_p5 = scmp.ne.s32.totalorder %s42_s13, %s5572_s21  ;;  %p5578_p7 = scmp.lt.s32.totalorder %s5572_s21, %s5572_s21 }
  0x2e   :  { %p5579_p8 = por %p5578_p7, %p5577_p6 }
  0x30   :  { %p5580_p9 = pnand %p5579_p8, %p5573_p5 }
  0x32   :  { %5583 = shalt.err (!%p5580_p9)
}
  0x33   :  { %44 = dma.hbm_to_vmem [thread:$0]  %s6775_s2, 256, %s42_s13, [#allocation7]  }
  0x34   :  { %5606 = dma.done.wait [#allocation4], 256  }
  0x35   :  { %5607 = vsyncadd [#allocation4], 4294967040 }
  0x36   :  { %5608 = dma.done.wait [#allocation7], 448  }
  0x37   :  { %5609 = vsyncadd [#allocation7], 4294966848  ;;  %v5619_v0 = vmov 0   ;;  %v362_v1 = vld [vmem:[#allocation3] sm:$0xf]  ;;  %s5620_s2 = smov 127  }
  0x38   :  { %73 = vst [vmem:[#allocation2 + $0x90] sm:$0xff] %v5619_v0  ;;  %55 = vst [vmem:[#allocation2] sm:$0xff] %v5619_v0  ;;  %805 = vmatprep.mubr.bf16.mxu0 %v5619_v0  ;;  %846 = vmatprep.mubr.bf16.mxu1 %v5619_v0  ;;  %v94_v2 = vld [vmem:[#allocation3] sm:$0xf]  ;;  %v5121_v4 = vpack.c.bf16 %v362_v1, %v362_v1  ;;  %s5621_s24 = smov 113   ;;  %s5622_s25 = smov 112  }
  0x39   :  { %56 = vst [vmem:[#allocation2 + $0x8] sm:$0xff] %v5619_v0  ;;  %57 = vst [vmem:[#allocation2 + $0x10] sm:$0xff] %v5619_v0  ;;  %v233_v3 = vld [vmem:[#allocation3] sm:$0xf]  ;;  %v5092_v5 = vpack.c.bf16 %v94_v2, %v94_v2  ;;  %s5623_s26 = smov 1   ;;  %s5624_s27 = smov 95  }
  0x3a   :  { %58 = vst [vmem:[#allocation2 + $0x18] sm:$0xff] %v5619_v0  ;;  %59 = vst [vmem:[#allocation2 + $0x20] sm:$0xff] %v5619_v0  ;;  %v84_v6 = vld [vmem:[#allocation3] sm:$0xf]  ;;  %367 = vrot.lane.b32.xlu0 %v5121_v4, %s5620_s2  ;;  %v5107_v7 = vpack.c.bf16 %v233_v3, %v233_v3  ;;  %s5625_s28 = smov 111   ;;  %s5626_s29 = smov 81  }
  0x3b   :  { %60 = vst [vmem:[#allocation2 + $0x28] sm:$0xff] %v5619_v0  ;;  %61 = vst [vmem:[#allocation2 + $0x30] sm:$0xff] %v5619_v0  ;;  %99 = vrot.lane.b32.xlu1 %v5092_v5, %s5621_s24  ;;  %v5091_v8 = vpack.c.bf16 %v84_v6, %v84_v6  ;;  %v389_v9 = vld [vmem:[#allocation3] sm:$0xf]  ;;  %s5627_s30 = smov 97   ;;  %s5628_s4 = smov 80  }
  0x3c   :  { %62 = vst [vmem:[#allocation2 + $0x38] sm:$0xff] %v5619_v0  ;;  %63 = vst [vmem:[#allocation2 + $0x40] sm:$0xff] %v5619_v0  ;;  %v377_v10 = vld [vmem:[#allocation3] sm:$0xf]  ;;  %v5123_v11 = vpack.c.bf16 %v389_v9, %v389_v9  ;;  %s5629_s5 = smov 96   ;;  %s5630_s6 = smov 63  }
  0x3d   :  { %64 = vst [vmem:[#allocation2 + $0x48] sm:$0xff] %v5619_v0  ;;  %65 = vst [vmem:[#allocation2 + $0x50] sm:$0xff] %v5619_v0  ;;  %v5122_v12 = vpack.c.bf16 %v377_v10, %v377_v10  ;;  %v112_v13 = vld [vmem:[#allocation3] sm:$0xf]  ;;  %s5631_s7 = smov 79   ;;  %vm231_vm0 = vcmask 123904  }
  0x3e   :  { %66 = vst [vmem:[#allocation2 + $0x58] sm:$0xff] %v5619_v0  ;;  %67 = vst [vmem:[#allocation2 + $0x60] sm:$0xff] %v5619_v0  ;;  %89 = vrot.lane.b32.xlu0 %v5091_v8, %s5623_s26  ;;  %v103_v14 = vld [vmem:[#allocation3] sm:$0xf]  ;;  %v5094_v15 = vpack.c.bf16 %v112_v13, %v112_v13  ;;  %s5632_s8 = smov 49   ;;  %s5633_s1 = smov 65  }
  0x3f   :  { %68 = vst [vmem:[#allocation2 + $0x68] sm:$0xff] %v5619_v0  ;;  %69 = vst [vmem:[#allocation2 + $0x70] sm:$0xff] %v5619_v0  ;;  %238 = vrot.lane.b32.xlu1 %v5107_v7, %s5622_s25  ;;  %v5093_v16 = vpack.c.bf16 %v103_v14, %v103_v14  ;;  %v251_v17 = vld [vmem:[#allocation3] sm:$0xf]  ;;  %v296_v37 = vld [vmem:[#allocation3 + $0x4] sm:$0xf] }
  0x40   :  { %70 = vst [vmem:[#allocation2 + $0x78] sm:$0xff] %v5619_v0  ;;  %71 = vst [vmem:[#allocation2 + $0x80] sm:$0xff] %v5619_v0  ;;  %v242_v18 = vld [vmem:[#allocation3] sm:$0xf]  ;;  %v5109_v19 = vpack.c.bf16 %v251_v17, %v251_v17  ;;  %s5634_s9 = smov 48   ;;  %v297_v40 = vpack.c.bf16 %v296_v37, %v296_v37  ;;  %s5635_s10 = smov 31  }
  0x41   :  { %72 = vst [vmem:[#allocation2 + $0x88] sm:$0xff] %v5619_v0  ;;  %74 = vst [vmem:[#allocation2 + $0x98] sm:$0xff] %v5619_v0  ;;  %v5108_v20 = vpack.c.bf16 %v242_v18, %v242_v18  ;;  %v413_v21 = vld [vmem:[#allocation3] sm:$0xf]  ;;  %s5636_s11 = smov 47   ;;  %s5637_s12 = smov 17  }
  0x42   :  { %75 = vst [vmem:[#allocation2 + $0xa0] sm:$0xff] %v5619_v0  ;;  %76 = vst [vmem:[#allocation2 + $0xa8] sm:$0xff] %v5619_v0  ;;  %382 = vrot.lane.b32.xlu0 %v5122_v12, %s5625_s28  ;;  %v401_v22 = vld [vmem:[#allocation3] sm:$0xf]  ;;  %v5125_v23 = vpack.c.bf16 %v413_v21, %v413_v21  ;;  %s5638_s13 = smov 33   ;;  %s5639_s14 = smov 16  }
  0x43   :  { %77 = vst [vmem:[#allocation2 + $0xb0] sm:$0xff] %v5619_v0  ;;  %78 = vst [vmem:[#allocation2 + $0xb8] sm:$0xff] %v5619_v0  ;;  %394 = vrot.lane.b32.xlu1 %v5123_v11, %s5624_s27  ;;  %v5124_v24 = vpack.c.bf16 %v401_v22, %v401_v22  ;;  %v130_v25 = vld [vmem:[#allocation3] sm:$0xf]  ;;  %v461_v49 = vld [vmem:[#allocation3 + $0x4] sm:$0xf] }
  0x44   :  { %79 = vst [vmem:[#allocation2 + $0xc0] sm:$0xff] %v5619_v0  ;;  %80 = vst [vmem:[#allocation2 + $0xc8] sm:$0xff] %v5619_v0  ;;  %v121_v26 = vld [vmem:[#allocation3] sm:$0xf]  ;;  %v5096_v27 = vpack.c.bf16 %v130_v25, %v130_v25  ;;  %s5640_s15 = smov 32   ;;  %v5129_v51 = vpack.c.bf16 %v461_v49, %v461_v49  ;;  %s5641_s16 = smov 15  }
  0x45   :  { %81 = vst [vmem:[#allocation2 + $0xd0] sm:$0xff] %v5619_v0  ;;  %v5095_v28 = vpack.c.bf16 %v121_v26, %v121_v26  ;;  %v229_v29 = vld [vmem:[#allocation3] sm:$0xf]  ;;  %298 = vst.msk [vmem:[#allocation2 + $0x6c] sm:$0x3] %vm231_vm0, %v297_v40  ;;  %vm373_vm1 = vcmask 1042424  }
  0x46   :  { %108 = vrot.lane.b32.xlu0 %v5093_v16, %s5627_s30  ;;  %v269_v30 = vld [vmem:[#allocation3] sm:$0xf]  ;;  %v230_v32 = vpack.c.bf16 %v229_v29, %v229_v29  ;;  %v166_v53 = vld [vmem:[#allocation3 + $0x4] sm:$0xf]  ;;  %vm374_vm2 = vcmask 119812   ;;  %vm92_vm3 = vcmask 132104  }
  0x47   :  { %117 = vrot.lane.b32.xlu1 %v5094_v15, %s5626_s29  ;;  %v260_v31 = vld [vmem:[#allocation3] sm:$0xf]  ;;  %v5111_v33 = vpack.c.bf16 %v269_v30, %v269_v30  ;;  %v157_v54 = vld [vmem:[#allocation3 + $0x4] sm:$0xf]  ;;  %v5100_v55 = vpack.c.bf16 %v166_v53, %v166_v53  ;;  %vm370_vm4 = vcmask 1039360   ;;  %vm5791_vm5 = vmor %vm374_vm2, %vm373_vm1  ;;  %vm397_vm6 = vcmask 777216  }
  0x48   :  { %232 = vst.msk [vmem:[#allocation2 + $0x4c] sm:$0x3] %vm231_vm0, %v230_v32  ;;  %v5110_v34 = vpack.c.bf16 %v260_v31, %v260_v31  ;;  %v437_v35 = vld [vmem:[#allocation3] sm:$0xf]  ;;  %v5099_v56 = vpack.c.bf16 %v157_v54, %v157_v54  ;;  %v472_v57 = vld [vmem:[#allocation3 + $0x4] sm:$0xf] }
  0x49   :  { %v425_v36 = vld [vmem:[#allocation3] sm:$0xf]  ;;  %v5127_v38 = vpack.c.bf16 %v437_v35, %v437_v35  ;;  %v299_v58 = vld [vmem:[#allocation3 + $0x4] sm:$0xf]  ;;  %v5130_v59 = vpack.c.bf16 %v472_v57, %v472_v57  ;;  %v2706_v35 = vld [vmem:[#allocation3 + $0x8] sm:$0xf] }
  0x4a   :  { %247 = vrot.lane.b32.xlu0 %v5108_v20, %s5629_s5  ;;  %v5126_v39 = vpack.c.bf16 %v425_v36, %v425_v36  ;;  %v148_v41 = vld [vmem:[#allocation3] sm:$0xf]  ;;  %v5114_v60 = vpack.c.bf16 %v299_v58, %v299_v58  ;;  %v175_v61 = vld [vmem:[#allocation3 + $0x4] sm:$0xf]  ;;  %v5175_v37 = vpack.c.bf16 %v2706_v35, %v2706_v35  ;;  %v2750_v54 = vld [vmem:[#allocation3 + $0x8] sm:$0xf] }
  0x4b   :  { %256 = vrot.lane.b32.xlu1 %v5109_v19, %s5628_s4  ;;  %v139_v42 = vld [vmem:[#allocation3] sm:$0xf]  ;;  %v5098_v43 = vpack.c.bf16 %v148_v41, %v148_v41  ;;  %v483_v62 = vld [vmem:[#allocation3 + $0x4] sm:$0xf]  ;;  %v5101_v63 = vpack.c.bf16 %v175_v61, %v175_v61  ;;  %v2475_v58 = vld [vmem:[#allocation3 + $0x8] sm:$0xf] }
  0x4c   :  { %v5097_v44 = vpack.c.bf16 %v139_v42, %v139_v42  ;;  %v287_v45 = vld [vmem:[#allocation3] sm:$0xf]  ;;  %v5131_v1 = vpack.c.bf16 %v483_v62, %v483_v62  ;;  %v308_v2 = vld [vmem:[#allocation3 + $0x4] sm:$0xf]  ;;  %v2728_v42 = vld [vmem:[#allocation3 + $0x8] sm:$0xf] }
  0x4d   :  { %v278_v46 = vld [vmem:[#allocation3] sm:$0xf]  ;;  %v5113_v47 = vpack.c.bf16 %v287_v45, %v287_v45  ;;  %v184_v3 = vld [vmem:[#allocation3 + $0x4] sm:$0xf]  ;;  %v5115_v4 = vpack.c.bf16 %v308_v2, %v308_v2  ;;  %v2613_v62 = vld [vmem:[#allocation3 + $0x8] sm:$0xf] }
  0x4e   :  { %406 = vrot.lane.b32.xlu0 %v5124_v24, %s5631_s7  ;;  %v5112_v48 = vpack.c.bf16 %v278_v46, %v278_v46  ;;  %v449_v50 = vld [vmem:[#allocation3] sm:$0xf]  ;;  %v5102_v5 = vpack.c.bf16 %v184_v3, %v184_v3  ;;  %v494_v6 = vld [vmem:[#allocation3 + $0x4] sm:$0xf]  ;;  %v2457_v46 = vld [vmem:[#allocation3 + $0x8] sm:$0xf] }
  0x4f   :  { %418 = vrot.lane.b32.xlu1 %v5125_v23, %s5630_s6  ;;  %v5128_v52 = vpack.c.bf16 %v449_v50, %v449_v50  ;;  %v317_v7 = vld [vmem:[#allocation3 + $0x4] sm:$0xf]  ;;  %v5132_v8 = vpack.c.bf16 %v494_v6, %v494_v6  ;;  %v2595_v50 = vld [vmem:[#allocation3 + $0x8] sm:$0xf]  ;;  %vm385_vm7 = vcmask 908288   ;;  %vm421_vm8 = vcmask 515072  }
  0x50   :  { %v5116_v9 = vpack.c.bf16 %v317_v7, %v317_v7  ;;  %v193_v10 = vld [vmem:[#allocation3 + $0x4] sm:$0xf]  ;;  %vm409_vm9 = vcmask 646144   ;;  %vm724_vm10 = vcmask 1043456   ;;  %vm720_vm11 = vcmask 195584   ;;  %s5642_s17 = smov [#allocation9]  }
  0x51   :  { %v505_v11 = vld [vmem:[#allocation3 + $0x4] sm:$0xf]  ;;  %v5103_v12 = vpack.c.bf16 %v193_v10, %v193_v10  ;;  %vm445_vm12 = vcmask 252928   ;;  %vm433_vm13 = vcmask 384000   ;;  %vm457_vm14 = vcmask 121856   ;;  %s4682_s18 = sshll.u32 %s5642_s17, 4  ;;  %s4683_s18 = int_to_ptr.vmem [resolvable:$true] %s4682_s18 }
  0x52   :  { %126 = vrot.lane.b32.xlu0 %v5095_v28, %s5633_s1  ;;  %v5133_v13 = vpack.c.bf16 %v505_v11, %v505_v11  ;;  %v326_v14 = vld [vmem:[#allocation3 + $0x4] sm:$0xf]  ;;  %s5584_s19 = scalar_lea.vmem %s4683_s18, 2048  ;;  %p5589_p11 = scmp.lt.s32.totalorder %s4683_s18, %s4683_s18 }
  0x53   :  { %135 = vrot.lane.b32.xlu1 %v5096_v27, %s5632_s8  ;;  %v202_v15 = vld [vmem:[#allocation3 + $0x4] sm:$0xf]  ;;  %v5117_v16 = vpack.c.bf16 %v326_v14, %v326_v14  ;;  %v2493_v14 = vld [vmem:[#allocation3 + $0x8] sm:$0xf]  ;;  %p5585_p10 = scmp.ne.s32.totalorder %s4683_s18, %s5584_s19  ;;  %p5590_p12 = scmp.lt.s32.totalorder %s5584_s19, %s5584_s19 }
  0x54   :  { %v5104_v17 = vpack.c.bf16 %v202_v15, %v202_v15  ;;  %v516_v18 = vld [vmem:[#allocation3 + $0x4] sm:$0xf]  ;;  %v2484_v15 = vld [vmem:[#allocation3 + $0x8] sm:$0xf] }
  0x55   :  { %v335_v19 = vld [vmem:[#allocation3 + $0x4] sm:$0xf]  ;;  %v5134_v20 = vpack.c.bf16 %v516_v18, %v516_v18  ;;  %p5591_p13 = por %p5590_p12, %p5589_p11 }
  0x56   :  { %265 = vrot.lane.b32.xlu0 %v5110_v34, %s5613_s22  ;;  %v5118_v21 = vpack.c.bf16 %v335_v19, %v335_v19  ;;  %v211_v22 = vld [vmem:[#allocation3 + $0x4] sm:$0xf]  ;;  %v2430_v34 = vld [vmem:[#allocation3 + $0x8] sm:$0xf] }
  0x57   :  { %274 = vrot.lane.b32.xlu1 %v5111_v33, %s5634_s9  ;;  %v527_v23 = vld [vmem:[#allocation3 + $0x4] sm:$0xf]  ;;  %v5105_v24 = vpack.c.bf16 %v211_v22, %v211_v22  ;;  %v5145_v36 = vpack.c.bf16 %v2430_v34, %v2430_v34  ;;  %v5151_v22 = vpack.c.bf16 %v2484_v15, %v2484_v15  ;;  %p5592_p0 = pnand %p5591_p13, %p5585_p10 }
  0x58   :  { %v5135_v25 = vpack.c.bf16 %v527_v23, %v527_v23  ;;  %v344_v26 = vld [vmem:[#allocation3 + $0x4] sm:$0xf] }
  0x59   :  { %v220_v27 = vld [vmem:[#allocation3 + $0x4] sm:$0xf]  ;;  %v5119_v28 = vpack.c.bf16 %v344_v26, %v344_v26  ;;  %v2631_v26 = vld [vmem:[#allocation3 + $0x8] sm:$0xf] }
  0x5a   :  { %430 = vrot.lane.b32.xlu0 %v5126_v39, %s5636_s11  ;;  %v5106_v29 = vpack.c.bf16 %v220_v27, %v220_v27  ;;  %v538_v30 = vld [vmem:[#allocation3 + $0x4] sm:$0xf]  ;;  %v2439_v39 = vld [vmem:[#allocation3 + $0x8] sm:$0xf]  ;;  %v5167_v35 = vpack.c.bf16 %v2631_v26, %v2631_v26 }
  0x5b   :  { %442 = vrot.lane.b32.xlu1 %v5127_v38, %s5635_s10  ;;  %v353_v31 = vld [vmem:[#allocation3 + $0x4] sm:$0xf]  ;;  %v5136_v32 = vpack.c.bf16 %v538_v30, %v538_v30  ;;  %v2577_v38 = vld [vmem:[#allocation3 + $0x8] sm:$0xf]  ;;  %v5146_v41 = vpack.c.bf16 %v2439_v39, %v2439_v39 }
  0x5c   :  { %v5120_v33 = vpack.c.bf16 %v353_v31, %v353_v31  ;;  %v5161_v40 = vpack.c.bf16 %v2577_v38, %v2577_v38  ;;  %v2622_v27 = vld [vmem:[#allocation3 + $0x8] sm:$0xf] }
  0x5d   :  { %v2783_v38 = vld [vmem:[#allocation3 + $0x8] sm:$0xf] }
  0x5e   :  { %144 = vrot.lane.b32.xlu0 %v5097_v44, %s5638_s13  ;;  %v5177_v44 = vpack.c.bf16 %v2728_v42, %v2728_v42  ;;  %v5182_v42 = vpack.c.bf16 %v2783_v38, %v2783_v38  ;;  %v2838_v38 = vld [vmem:[#allocation3 + $0xc] sm:$0xf] }
  0x5f   :  { %153 = vrot.lane.b32.xlu1 %v5098_v43, %s5637_s12  ;;  %v2717_v43 = vld [vmem:[#allocation3 + $0x8] sm:$0xf] }
  0x60   :  { %v5176_v45 = vpack.c.bf16 %v2717_v43, %v2717_v43  ;;  %v2511_v43 = vld [vmem:[#allocation3 + $0xc] sm:$0xf] }
  0x62   :  { %283 = vrot.lane.b32.xlu0 %v5112_v48, %s5640_s15  ;;  %v5148_v48 = vpack.c.bf16 %v2457_v46, %v2457_v46 }
  0x63   :  { %292 = vrot.lane.b32.xlu1 %v5113_v47, %s5639_s14  ;;  %v2448_v47 = vld [vmem:[#allocation3 + $0x8] sm:$0xf] }
  0x64   :  { %v5147_v49 = vpack.c.bf16 %v2448_v47, %v2448_v47 }
  0x66   :  { %454 = vrot.lane.b32.xlu0 %v5128_v52, %s5641_s16  ;;  %v5163_v52 = vpack.c.bf16 %v2595_v50, %v2595_v50 }
  0x67   :  { %466 = vrot.lane.b32.xlu1 %v5129_v51, %s5620_s2  ;;  %v2586_v51 = vld [vmem:[#allocation3 + $0x8] sm:$0xf] }
  0x68   :  { %v5162_v53 = vpack.c.bf16 %v2586_v51, %v2586_v51 }
  0x6a   :  { %162 = vrot.lane.b32.xlu0 %v5099_v56, %s5623_s26  ;;  %v5179_v56 = vpack.c.bf16 %v2750_v54, %v2750_v54  ;;  %v2805_v54 = vld [vmem:[#allocation3 + $0xc] sm:$0xf] }
  0x6b   :  { %171 = vrot.lane.b32.xlu1 %v5100_v55, %s5621_s24  ;;  %v2739_v55 = vld [vmem:[#allocation3 + $0x8] sm:$0xf] }
  0x6c   :  { %v5178_v57 = vpack.c.bf16 %v2739_v55, %v2739_v55 }
  0x6e   :  { %304 = vrot.lane.b32.xlu0 %v5114_v60, %s5622_s25  ;;  %v5150_v60 = vpack.c.bf16 %v2475_v58, %v2475_v58 }
  0x6f   :  { %477 = vrot.lane.b32.xlu1 %v5130_v59, %s5625_s28  ;;  %v2466_v59 = vld [vmem:[#allocation3 + $0x8] sm:$0xf] }
  0x70   :  { %v5149_v61 = vpack.c.bf16 %v2466_v59, %v2466_v59  ;;  %v2643_v59 = vld [vmem:[#allocation3 + $0xc] sm:$0xf] }
  0x72   :  { %488 = vrot.lane.b32.xlu0 %v5131_v1, %s5624_s27 }
  0x73   :  { %180 = vrot.lane.b32.xlu1 %v5101_v63, %s5627_s30  ;;  %v2604_v63 = vld [vmem:[#allocation3 + $0x8] sm:$0xf] }
  0x74   :  { %v5164_v6 = vpack.c.bf16 %v2604_v63, %v2604_v63 }
  0x76   :  { %189 = vrot.lane.b32.xlu0 %v5102_v5, %s5626_s29  ;;  %v5165_v5 = vpack.c.bf16 %v2613_v62, %v2613_v62 }
  0x77   :  { %313 = vrot.lane.b32.xlu1 %v5115_v4, %s5629_s5 }
  0x7a   :  { %322 = vrot.lane.b32.xlu0 %v5116_v9, %s5628_s4  ;;  %v2761_v9 = vld [vmem:[#allocation3 + $0x8] sm:$0xf] }
  0x7b   :  { %499 = vrot.lane.b32.xlu1 %v5132_v8, %s5631_s7  ;;  %v2772_v8 = vld [vmem:[#allocation3 + $0x8] sm:$0xf] }
  0x7e   :  { %510 = vrot.lane.b32.xlu0 %v5133_v13, %s5630_s6  ;;  %v5180_v13 = vpack.c.bf16 %v2761_v9, %v2761_v9 }
  0x7f   :  { %198 = vrot.lane.b32.xlu1 %v5103_v12, %s5633_s1  ;;  %v5181_v12 = vpack.c.bf16 %v2772_v8, %v2772_v8 }
  0x82   :  { %207 = vrot.lane.b32.xlu0 %v5104_v17, %s5632_s8 }
  0x83   :  { %331 = vrot.lane.b32.xlu1 %v5117_v16, %s5613_s22  ;;  %v2574_v16 = vld [vmem:[#allocation3 + $0x8] sm:$0xf] }
  0x84   :  { %v2575_v23 = vpack.c.bf16 %v2574_v16, %v2574_v16 }
  0x86   :  { %340 = vrot.lane.b32.xlu0 %v5118_v21, %s5634_s9  ;;  %v5152_v21 = vpack.c.bf16 %v2493_v14, %v2493_v14 }
  0x87   :  { %521 = vrot.lane.b32.xlu1 %v5134_v20, %s5636_s11 }
  0x8a   :  { %532 = vrot.lane.b32.xlu0 %v5135_v25, %s5635_s10 }
  0x8b   :  { %216 = vrot.lane.b32.xlu1 %v5105_v24, %s5638_s13 }
  0x8e   :  { %225 = vrot.lane.b32.xlu0 %v5106_v29, %s5637_s12 }
  0x8f   :  { %349 = vrot.lane.b32.xlu1 %v5119_v28, %s5640_s15 }
  0x92   :  { %358 = vrot.lane.b32.xlu0 %v5120_v33, %s5639_s14 }
  0x93   :  { %543 = vrot.lane.b32.xlu1 %v5136_v32, %s5641_s16 }
  0x96   :  { %2711 = vrot.lane.b32.xlu0 %v5175_v37, %s5620_s2  ;;  %v2794_v37 = vld [vmem:[#allocation3 + $0xc] sm:$0xf] }
  0x97   :  { %2435 = vrot.lane.b32.xlu1 %v5145_v36, %s5623_s26  ;;  %v5166_v36 = vpack.c.bf16 %v2622_v27, %v2622_v27  ;;  %v2827_v27 = vld [vmem:[#allocation3 + $0xc] sm:$0xf] }
  0x9a   :  { %2444 = vrot.lane.b32.xlu0 %v5146_v41, %s5621_s24  ;;  %v5183_v41 = vpack.c.bf16 %v2794_v37, %v2794_v37  ;;  %v2538_v37 = vld [vmem:[#allocation3 + $0xc] sm:$0xf] }
  0x9b   :  { %2582 = vrot.lane.b32.xlu1 %v5161_v40, %s5622_s25 }
  0x9e   :  { %2722 = vrot.lane.b32.xlu0 %v5176_v45, %s5625_s28 }
  0x9f   :  { %2733 = vrot.lane.b32.xlu1 %v5177_v44, %s5624_s27  ;;  %v2502_v44 = vld [vmem:[#allocation3 + $0xc] sm:$0xf] }
  0xa2   :  { %2453 = vrot.lane.b32.xlu0 %v5147_v49, %s5627_s30 }
  0xa3   :  { %2462 = vrot.lane.b32.xlu1 %v5148_v48, %s5626_s29 }
  0xa6   :  { %2591 = vrot.lane.b32.xlu0 %v5162_v53, %s5629_s5  ;;  %v5153_v53 = vpack.c.bf16 %v2502_v44, %v2502_v44  ;;  %v2547_v44 = vld [vmem:[#allocation3 + $0xc] sm:$0xf] }
  0xa7   :  { %2600 = vrot.lane.b32.xlu1 %v5163_v52, %s5628_s4  ;;  %v5154_v52 = vpack.c.bf16 %v2511_v43, %v2511_v43  ;;  %v2670_v43 = vld [vmem:[#allocation3 + $0xc] sm:$0xf] }
  0xaa   :  { %2744 = vrot.lane.b32.xlu0 %v5178_v57, %s5631_s7 }
  0xab   :  { %2755 = vrot.lane.b32.xlu1 %v5179_v56, %s5630_s6 }
  0xac   :  { %v368_v1 = vpop.permute.xlu0 %367 }
  0xad   :  { %v100_v2 = vpop.permute.xlu1 %99  ;;  %v369_v4 = vrot.slane %v368_v1, 4 }
  0xae   :  { %102 = vst.msk [vmem:[#allocation2 + $0x8] sm:$0x3] %vm92_vm3, %v100_v2  ;;  %2471 = vrot.lane.b32.xlu0 %v5149_v61, %s5633_s1 }
  0xaf   :  { %2480 = vrot.lane.b32.xlu1 %v5150_v60, %s5632_s8  ;;  %v371_v7 = vsel %vm370_vm4, %v369_v4, %v368_v1  ;;  %v5830_v60 = vld [vmem:[#allocation6 + $0x4] sm:$0xf]  ;;  %v5184_v4 = vpack.c.bf16 %v2805_v54, %v2805_v54 }
  0xb0   :  { %376 = vst.msk [vmem:[#allocation2 + $0x90] sm:$0x33] %vm5791_vm5, %v371_v7  ;;  %v90_v11 = vpop.permute.xlu0 %89  ;;  %v2816_v7 = vld [vmem:[#allocation3 + $0xc] sm:$0xf] }
  0xb1   :  { %v239_v10 = vpop.permute.xlu1 %238  ;;  %93 = vst.msk [vmem:[#allocation2 + $0x4] sm:$0x3] %vm92_vm3, %v90_v11  ;;  %v5185_v11 = vpack.c.bf16 %v2816_v7, %v2816_v7  ;;  %v2860_v7 = vld [vmem:[#allocation3 + $0xc] sm:$0xf] }
  0xb2   :  { %241 = vst.msk [vmem:[#allocation2 + $0x50] sm:$0x3] %vm231_vm0, %v239_v10  ;;  %2609 = vrot.lane.b32.xlu0 %v5164_v6, %s5613_s22  ;;  %v2520_v6 = vld [vmem:[#allocation3 + $0xc] sm:$0xf] }
  0xb3   :  { %2618 = vrot.lane.b32.xlu1 %v5165_v5, %s5634_s9  ;;  %v5168_v5 = vpack.c.bf16 %v2643_v59, %v2643_v59  ;;  %v5155_v10 = vpack.c.bf16 %v2520_v6, %v2520_v6  ;;  %v2679_v59 = vld [vmem:[#allocation3 + $0xc] sm:$0xf] }
  0xb4   :  { %v383_v18 = vpop.permute.xlu0 %382  ;;  %v2556_v6 = vld [vmem:[#allocation3 + $0xc] sm:$0xf] }
  0xb5   :  { %v395_v17 = vpop.permute.xlu1 %394  ;;  %v384_v20 = vrot.slane %v383_v18, 4 }
  0xb6   :  { %v396_v19 = vrot.slane %v395_v17, 4  ;;  %2766 = vrot.lane.b32.xlu0 %v5180_v13, %s5636_s11  ;;  %v2529_v13 = vld [vmem:[#allocation3 + $0xc] sm:$0xf] }
  0xb7   :  { %2777 = vrot.lane.b32.xlu1 %v5181_v12, %s5635_s10  ;;  %v386_v25 = vsel %vm385_vm7, %v384_v20, %v383_v18  ;;  %v2652_v12 = vld [vmem:[#allocation3 + $0xc] sm:$0xf] }
  0xb8   :  { %v398_v24 = vsel %vm397_vm6, %v396_v19, %v395_v17  ;;  %388 = vst.msk [vmem:[#allocation2 + $0x94] sm:$0x33] %vm5791_vm5, %v386_v25  ;;  %v109_v29 = vpop.permute.xlu0 %108  ;;  %v574_v30 = vld [vmem:[#allocation2 + $0x4] sm:$0xff] }
  0xb9   :  { %v118_v28 = vpop.permute.xlu1 %117  ;;  %v582_v31 = vld [vmem:[#allocation2 + $0x4c] sm:$0xff]  ;;  %400 = vst.msk [vmem:[#allocation2 + $0x98] sm:$0x33] %vm5791_vm5, %v398_v24 }
  0xba   :  { %v5359_v32 = vld [vmem:[#allocation2 + $0x8] ss:$72 sps:$4 sm:$0xff]   ;;  %120 = vst.msk [vmem:[#allocation2 + $0x10] sm:$0x3] %vm92_vm3, %v118_v28  ;;  %111 = vst.msk [vmem:[#allocation2 + $0xc] sm:$0x3] %vm92_vm3, %v109_v29  ;;  %v4741_v33 = vcombine.low %v574_v30, %v582_v31  ;;  %2489 = vrot.lane.b32.xlu0 %v5151_v22, %s5638_s13  ;;  %v5156_v22 = vpack.c.bf16 %v2529_v13, %v2529_v13 }
  0xbb   :  { %v5815_v34 = vld [vmem:[#allocation2 + $0x4] ss:$72 sps:$4 sm:$0xff]   ;;  %2498 = vrot.lane.b32.xlu1 %v5152_v21, %s5637_s12  ;;  %773 = vmatprep.subr.bf16.mxu0 %v5359_v32  ;;  %v5169_v21 = vpack.c.bf16 %v2652_v12, %v2652_v12  ;;  %v5189_v12 = vpack.c.bf16 %v2860_v7, %v2860_v7 }
  0xbc   :  { %2576 = vst.msk [vmem:[#allocation2 + $0x4c] sm:$0x3] %vm231_vm0, %v2575_v23  ;;  %v248_v40 = vpop.permute.xlu0 %247  ;;  %774 = vmatpush1.bf16.msra.mxu0 %v4741_v33  ;;  %v2661_v28 = vld [vmem:[#allocation3 + $0xc] sm:$0xf] }
  0xbd   :  { %v257_v39 = vpop.permute.xlu1 %256  ;;  %250 = vst.msk [vmem:[#allocation2 + $0x54] sm:$0x3] %vm231_vm0, %v248_v40  ;;  %v2640_v13 = vld [vmem:[#allocation3 + $0xc] sm:$0xf] }
  0xbe   :  { %259 = vst.msk [vmem:[#allocation2 + $0x58] sm:$0x3] %vm231_vm0, %v257_v39  ;;  %2627 = vrot.lane.b32.xlu0 %v5166_v36, %s5640_s15  ;;  %v5170_v36 = vpack.c.bf16 %v2661_v28, %v2661_v28 }
  0xbf   :  { %2636 = vrot.lane.b32.xlu1 %v5167_v35, %s5639_s14  ;;  %v5186_v35 = vpack.c.bf16 %v2827_v27, %v2827_v27 }
  0xc0   :  { %v407_v46 = vpop.permute.xlu0 %406  ;;  %v590_v47 = vld [vmem:[#allocation2 + $0x94] sm:$0xff] }
  0xc1   :  { %v419_v45 = vpop.permute.xlu1 %418  ;;  %v408_v49 = vrot.slane %v407_v46, 4  ;;  %v4758_v50 = vcombine.high %v590_v47, %v590_v47  ;;  %v4757_v51 = vcombine.low %v590_v47, %v590_v47  ;;  %v575_v58 = vld [vmem:[#allocation2 + $0xc] sm:$0xff] }
  0xc2   :  { %v420_v48 = vrot.slane %v419_v45, 4  ;;  %2788 = vrot.lane.b32.xlu0 %v5182_v42, %s5641_s16  ;;  %v5187_v42 = vpack.c.bf16 %v2838_v38, %v2838_v38 }
  0xc3   :  { %2799 = vrot.lane.b32.xlu1 %v5183_v41, %s5620_s2  ;;  %v410_v56 = vsel %vm409_vm9, %v408_v49, %v407_v46  ;;  %4773 = vmatprep.subr.msk.bf16.mxu0 %vm724_vm10, %v4758_v50  ;;  %v726_v57 = vsel %vm724_vm10, %v4757_v51, 0  ;;  %v5157_v41 = vpack.c.bf16 %v2538_v37, %v2538_v37 }
  0xc4   :  { %v422_v55 = vsel %vm421_vm8, %v420_v48, %v419_v45  ;;  %412 = vst.msk [vmem:[#allocation2 + $0x9c] sm:$0x33] %vm5791_vm5, %v410_v56  ;;  %v127_v62 = vpop.permute.xlu0 %126  ;;  %776 = vmatpush1.bf16.msra.mxu0 %v726_v57 }
  0xc5   :  { %v136_v61 = vpop.permute.xlu1 %135  ;;  %v583_v63 = vld [vmem:[#allocation2 + $0x54] sm:$0xff]  ;;  %424 = vst.msk [vmem:[#allocation2 + $0xa0] sm:$0x33] %vm5791_vm5, %v422_v55 }
  0xc6   :  { %v5362_v1 = vld [vmem:[#allocation2 + $0x10] ss:$72 sps:$4 sm:$0xff]   ;;  %138 = vst.msk [vmem:[#allocation2 + $0x18] sm:$0x3] %vm92_vm3, %v136_v61  ;;  %129 = vst.msk [vmem:[#allocation2 + $0x14] sm:$0x3] %vm92_vm3, %v127_v62  ;;  %v4743_v2 = vcombine.low %v575_v58, %v583_v63  ;;  %2507 = vrot.lane.b32.xlu0 %v5153_v53, %s5623_s26  ;;  %v5158_v53 = vpack.c.bf16 %v2547_v44, %v2547_v44 }
  0xc7   :  { %2516 = vrot.lane.b32.xlu1 %v5154_v52, %s5621_s24  ;;  %814 = vmatprep.subr.bf16.mxu1 %v5362_v1  ;;  %v5171_v52 = vpack.c.bf16 %v2670_v43, %v2670_v43  ;;  %v2849_v58 = vld [vmem:[#allocation3 + $0xc] sm:$0xf] }
  0xc8   :  { %4774 = vmatmul.mubr.msk.bf16.vlgmr.msra.gmra.mrb[0].mxu0 %vm720_vm11, %v5830_v60  ;;  %v266_v9 = vpop.permute.xlu0 %265  ;;  %815 = vmatpush1.bf16.msra.mxu1 %v4743_v2 }
  0xc9   :  { %v275_v8 = vpop.permute.xlu1 %274  ;;  %887 = vmatprep.mubr.bf16.mxu0 %v5619_v0  ;;  %268 = vst.msk [vmem:[#allocation2 + $0x5c] sm:$0x3] %vm231_vm0, %v266_v9 }
  0xca   :  { %277 = vst.msk [vmem:[#allocation2 + $0x60] sm:$0x3] %vm231_vm0, %v275_v8  ;;  %2648 = vrot.lane.b32.xlu0 %v5168_v5, %s5622_s25  ;;  %v5172_v5 = vpack.c.bf16 %v2679_v59, %v2679_v59 }
  0xcb   :  { %2810 = vrot.lane.b32.xlu1 %v5184_v4, %s5625_s28  ;;  %v5188_v4 = vpack.c.bf16 %v2849_v58, %v2849_v58 }
  0xcc   :  { %v431_v15 = vpop.permute.xlu0 %430  ;;  %v591_v16 = vld [vmem:[#allocation2 + $0x9c] sm:$0xff] }
  0xcd   :  { %v443_v14 = vpop.permute.xlu1 %442  ;;  %v432_v18 = vrot.slane %v431_v15, 4  ;;  %v4760_v19 = vcombine.high %v591_v16, %v591_v16  ;;  %v4759_v20 = vcombine.low %v591_v16, %v591_v16  ;;  %v576_v26 = vld [vmem:[#allocation2 + $0x14] sm:$0xff]  ;;  %v2565_v16 = vld [vmem:[#allocation3 + $0xc] sm:$0xf] }
  0xce   :  { %v444_v17 = vrot.slane %v443_v14, 4  ;;  %2821 = vrot.lane.b32.xlu0 %v5185_v11, %s5624_s27  ;;  %v5159_v11 = vpack.c.bf16 %v2556_v6, %v2556_v6 }
  0xcf   :  { %2525 = vrot.lane.b32.xlu1 %v5155_v10, %s5627_s30  ;;  %v434_v24 = vsel %vm433_vm13, %v432_v18, %v431_v15  ;;  %4775 = vmatprep.subr.msk.bf16.mxu1 %vm724_vm10, %v4760_v19  ;;  %v732_v25 = vsel %vm724_vm10, %v4759_v20, 0  ;;  %v2688_v15 = vld [vmem:[#allocation3 + $0xc] sm:$0xf] }
  0xd0   :  { %v446_v23 = vsel %vm445_vm12, %v444_v17, %v443_v14  ;;  %436 = vst.msk [vmem:[#allocation2 + $0xa4] sm:$0x33] %vm5791_vm5, %v434_v24  ;;  %v145_v30 = vpop.permute.xlu0 %144  ;;  %817 = vmatpush1.bf16.msra.mxu1 %v732_v25  ;;  %v5173_v24 = vpack.c.bf16 %v2688_v15, %v2688_v15  ;;  %v5160_v25 = vpack.c.bf16 %v2565_v16, %v2565_v16 }
  0xd1   :  { %v154_v29 = vpop.permute.xlu1 %153  ;;  %v584_v31 = vld [vmem:[#allocation2 + $0x5c] sm:$0xff]  ;;  %448 = vst.msk [vmem:[#allocation2 + $0xa8] sm:$0x33] %vm5791_vm5, %v446_v23  ;;  %v2641_v23 = vpack.c.bf16 %v2640_v13, %v2640_v13 }
  0xd2   :  { %v5365_v32 = vld [vmem:[#allocation2 + $0x18] ss:$72 sps:$4 sm:$0xff]   ;;  %156 = vst.msk [vmem:[#allocation2 + $0x20] sm:$0x3] %vm92_vm3, %v154_v29  ;;  %147 = vst.msk [vmem:[#allocation2 + $0x1c] sm:$0x3] %vm92_vm3, %v145_v30  ;;  %v4745_v33 = vcombine.low %v576_v26, %v584_v31  ;;  %2534 = vrot.lane.b32.xlu0 %v5156_v22, %s5626_s29 }
  0xd3   :  { %2657 = vrot.lane.b32.xlu1 %v5169_v21, %s5629_s5  ;;  %855 = vmatprep.subr.bf16.mxu0 %v5365_v32  ;;  %v2871_v29 = vld [vmem:[#allocation3 + $0xc] sm:$0xf] }
  0xd4   :  { %4776 = vmatmul.mubr.msk.bf16.vlgmr.msra.gmra.mrb[0].mxu1 %vm720_vm11, %v5830_v60  ;;  %v284_v40 = vpop.permute.xlu0 %283  ;;  %856 = vmatpush1.bf16.msra.mxu0 %v4745_v33  ;;  %v2697_v30 = vld [vmem:[#allocation3 + $0xc] sm:$0xf]  ;;  %v5190_v38 = vpack.c.bf16 %v2871_v29, %v2871_v29  ;;  %v565_v29 = vld [vmem:[#allocation2 + $0x90] sm:$0xff] }
  0xd5   :  { %v293_v39 = vpop.permute.xlu1 %292  ;;  %928 = vmatprep.mubr.bf16.mxu1 %v5619_v0  ;;  %286 = vst.msk [vmem:[#allocation2 + $0x64] sm:$0x3] %vm231_vm0, %v284_v40 }
  0xd6   :  { %295 = vst.msk [vmem:[#allocation2 + $0x68] sm:$0x3] %vm231_vm0, %v293_v39  ;;  %2666 = vrot.lane.b32.xlu0 %v5170_v36, %s5628_s4  ;;  %v5174_v39 = vpack.c.bf16 %v2697_v30, %v2697_v30  ;;  %v5951_v30 = vld [vmem:[#allocation2 + $0xc] ss:$72 sps:$4 sm:$0xff]  }
  0xd7   :  { %2832 = vrot.lane.b32.xlu1 %v5186_v35, %s5631_s7 }
  0xd8   :  { %v455_v46 = vpop.permute.xlu0 %454  ;;  %v592_v47 = vld [vmem:[#allocation2 + $0xa4] sm:$0xff] }
  0xd9   :  { %v467_v45 = vpop.permute.xlu1 %466  ;;  %v456_v49 = vrot.slane %v455_v46, 4  ;;  %v4762_v50 = vcombine.high %v592_v47, %v592_v47  ;;  %v4761_v51 = vcombine.low %v592_v47, %v592_v47  ;;  %v577_v57 = vld [vmem:[#allocation2 + $0x1c] sm:$0xff] }
  0xda   :  { %v468_v48 = vrot.slane %v467_v45, 4  ;;  %2843 = vrot.lane.b32.xlu0 %v5187_v42, %s5630_s6 }
  0xdb   :  { %2543 = vrot.lane.b32.xlu1 %v5157_v41, %s5633_s1  ;;  %v458_v55 = vsel %vm457_vm14, %v456_v49, %v455_v46  ;;  %4777 = vmatprep.subr.msk.bf16.mxu0 %vm724_vm10, %v4762_v50  ;;  %v738_v56 = vsel %vm724_vm10, %v4761_v51, 0 }
  0xdc   :  { %v469_v54 = vsel %vm370_vm4, %v468_v48, %v467_v45  ;;  %460 = vst.msk [vmem:[#allocation2 + $0xac] sm:$0x33] %vm5791_vm5, %v458_v55  ;;  %v163_v62 = vpop.permute.xlu0 %162  ;;  %858 = vmatpush1.bf16.msra.mxu0 %v738_v56 }
  0xdd   :  { %v172_v61 = vpop.permute.xlu1 %171  ;;  %v585_v63 = vld [vmem:[#allocation2 + $0x64] sm:$0xff]  ;;  %471 = vst.msk [vmem:[#allocation2 + $0xb0] sm:$0x33] %vm5791_vm5, %v469_v54 }
  0xde   :  { %v5368_v1 = vld [vmem:[#allocation2 + $0x20] ss:$72 sps:$4 sm:$0xff]   ;;  %174 = vst.msk [vmem:[#allocation2 + $0x28] sm:$0x3] %vm92_vm3, %v172_v61  ;;  %165 = vst.msk [vmem:[#allocation2 + $0x24] sm:$0x3] %vm92_vm3, %v163_v62  ;;  %v4747_v2 = vcombine.low %v577_v57, %v585_v63  ;;  %2552 = vrot.lane.b32.xlu0 %v5158_v53, %s5632_s8 }
  0xdf   :  { %2675 = vrot.lane.b32.xlu1 %v5171_v52, %s5613_s22  ;;  %896 = vmatprep.subr.bf16.mxu1 %v5368_v1  ;;  %v5925_v57 = vld [vmem:[#allocation2 + $0x40] sm:$0xff] }
  0xe0   :  { %4778 = vmatmul.mubr.msk.bf16.vlgmr.msra.gmra.mrb[4].mxu0 %vm720_vm11, %v5830_v60  ;;  %v305_v9 = vpop.permute.xlu0 %304  ;;  %897 = vmatpush1.bf16.msra.mxu1 %v4747_v2 }
  0xe1   :  { %v478_v8 = vpop.permute.xlu1 %477  ;;  %969 = vmatprep.mubr.bf16.mxu0 %v5619_v0  ;;  %307 = vst.msk [vmem:[#allocation2 + $0x70] sm:$0x3] %vm231_vm0, %v305_v9 }
  0xe2   :  { %v479_v10 = vrot.slane %v478_v8, 4  ;;  %2684 = vrot.lane.b32.xlu0 %v5172_v5, %s5634_s9 }
  0xe3   :  { %2854 = vrot.lane.b32.xlu1 %v5188_v4, %s5636_s11 }
  0xe4   :  { %v480_v14 = vsel %vm385_vm7, %v479_v10, %v478_v8  ;;  %v489_v18 = vpop.permute.xlu0 %488  ;;  %v593_v19 = vld [vmem:[#allocation2 + $0xac] sm:$0xff] }
  0xe5   :  { %482 = vst.msk [vmem:[#allocation2 + $0xb4] sm:$0x33] %vm5791_vm5, %v480_v14  ;;  %v181_v17 = vpop.permute.xlu1 %180  ;;  %v490_v20 = vrot.slane %v489_v18, 4  ;;  %v4764_v21 = vcombine.high %v593_v19, %v593_v19  ;;  %v4763_v22 = vcombine.low %v593_v19, %v593_v19  ;;  %v578_v28 = vld [vmem:[#allocation2 + $0x24] sm:$0xff] }
  0xe6   :  { %183 = vst.msk [vmem:[#allocation2 + $0x2c] sm:$0x3] %vm92_vm3, %v181_v17  ;;  %2865 = vrot.lane.b32.xlu0 %v5189_v12, %s5635_s10  ;;  %v5899_v36 = vld [vmem:[#allocation2 + $0x24] ss:$72 sps:$4 sm:$0xff]  }
  0xe7   :  { %2561 = vrot.lane.b32.xlu1 %v5159_v11, %s5638_s13  ;;  %v491_v26 = vsel %vm397_vm6, %v490_v20, %v489_v18  ;;  %4779 = vmatprep.subr.msk.bf16.mxu1 %vm724_vm10, %v4764_v21  ;;  %v744_v27 = vsel %vm724_vm10, %v4763_v22, 0 }
  0xe8   :  { %493 = vst.msk [vmem:[#allocation2 + $0xb8] sm:$0x33] %vm5791_vm5, %v491_v26  ;;  %v190_v32 = vpop.permute.xlu0 %189  ;;  %899 = vmatpush1.bf16.msra.mxu1 %v744_v27  ;;  %v586_v33 = vld [vmem:[#allocation2 + $0x6c] sm:$0xff] }
  0xe9   :  { %v314_v31 = vpop.permute.xlu1 %313  ;;  %v5371_v35 = vld [vmem:[#allocation2 + $0x28] ss:$72 sps:$4 sm:$0xff]   ;;  %192 = vst.msk [vmem:[#allocation2 + $0x30] sm:$0x3] %vm92_vm3, %v190_v32  ;;  %v4749_v37 = vcombine.low %v578_v28, %v586_v33 }
  0xea   :  { %316 = vst.msk [vmem:[#allocation2 + $0x74] sm:$0x3] %vm231_vm0, %v314_v31  ;;  %2642 = vst.msk [vmem:[#allocation2 + $0x6c] sm:$0x3] %vm231_vm0, %v2641_v23  ;;  %2570 = vrot.lane.b32.xlu0 %v5160_v25, %s5637_s12  ;;  %937 = vmatprep.subr.bf16.mxu0 %v5371_v35  ;;  %v557_v27 = vld [vmem:[#allocation2 + $0x48] sm:$0xff] }
  0xeb   :  { %2693 = vrot.lane.b32.xlu1 %v5173_v24, %s5640_s15  ;;  %4780 = vmatmul.mubr.msk.bf16.vlgmr.msra.gmra.mrb[4].mxu1 %vm720_vm11, %v5830_v60 }
  0xec   :  { %v323_v41 = vpop.permute.xlu0 %322  ;;  %938 = vmatpush1.bf16.msra.mxu0 %v4749_v37  ;;  %1010 = vmatprep.mubr.bf16.mxu1 %v5619_v0 }
  0xed   :  { %v500_v40 = vpop.permute.xlu1 %499  ;;  %325 = vst.msk [vmem:[#allocation2 + $0x78] sm:$0x3] %vm231_vm0, %v323_v41 }
  0xee   :  { %v501_v42 = vrot.slane %v500_v40, 4  ;;  %2702 = vrot.lane.b32.xlu0 %v5174_v39, %s5639_s14  ;;  %v4805_v39 = vcombine.low %v565_v29, %v565_v29 }
  0xef   :  { %2876 = vrot.lane.b32.xlu1 %v5190_v38, %s5641_s16  ;;  %v594_v44 = vld [vmem:[#allocation2 + $0xb4] sm:$0xff]  ;;  %v4806_v38 = vcombine.high %v565_v29, %v565_v29 }
  0xf0   :  { %v502_v43 = vsel %vm409_vm9, %v501_v42, %v500_v40  ;;  %v511_v46 = vpop.permute.xlu0 %510  ;;  %v4766_v47 = vcombine.high %v594_v44, %v594_v44  ;;  %v4765_v48 = vcombine.low %v594_v44, %v594_v44  ;;  %v579_v53 = vld [vmem:[#allocation2 + $0x2c] sm:$0xff] }
  0xf1   :  { %504 = vst.msk [vmem:[#allocation2 + $0xbc] sm:$0x33] %vm5791_vm5, %v502_v43  ;;  %v199_v45 = vpop.permute.xlu1 %198  ;;  %v512_v0 = vrot.slane %v511_v46, 4 }
  0xf2   :  { %201 = vst.msk [vmem:[#allocation2 + $0x34] sm:$0x3] %vm92_vm3, %v199_v45  ;;  %4781 = vmatprep.subr.msk.bf16.mxu0 %vm724_vm10, %v4766_v47  ;;  %v750_v49 = vsel %vm724_vm10, %v4765_v48, 0  ;;  %v5965_v48 = vld [vmem:[#allocation2 + $0x14] ss:$72 sps:$4 sm:$0xff]  }
  0xf3   :  { %v513_v50 = vsel %vm421_vm8, %v512_v0, %v511_v46  ;;  %940 = vmatpush1.bf16.msra.mxu0 %v750_v49  ;;  %v1225_v46 = vsel %vm724_vm10, %v4805_v39, 0  ;;  %v566_v0 = vld [vmem:[#allocation2 + $0x98] sm:$0xff] }
  0xf4   :  { %515 = vst.msk [vmem:[#allocation2 + $0xc0] sm:$0x33] %vm5791_vm5, %v513_v50  ;;  %v208_v52 = vpop.permute.xlu0 %207  ;;  %v587_v54 = vld [vmem:[#allocation2 + $0x74] sm:$0xff] }
  0xf5   :  { %v332_v51 = vpop.permute.xlu1 %331  ;;  %v5375_v55 = vld [vmem:[#allocation2 + $0x30] ss:$72 sps:$4 sm:$0xff]   ;;  %210 = vst.msk [vmem:[#allocation2 + $0x38] sm:$0x3] %vm92_vm3, %v208_v52  ;;  %v4751_v56 = vcombine.low %v579_v53, %v587_v54  ;;  %v567_v52 = vld [vmem:[#allocation2 + $0xa0] sm:$0xff] }
  0xf6   :  { %334 = vst.msk [vmem:[#allocation2 + $0x7c] sm:$0x3] %vm231_vm0, %v332_v51  ;;  %978 = vmatprep.subr.bf16.mxu1 %v5375_v55  ;;  %4782 = vmatmul.mubr.msk.bf16.vlgmr.msra.gmra.mrb[8].mxu0 %vm720_vm11, %v5830_v60  ;;  %v5969_v51 = vld [vmem:[#allocation6] sm:$0xf]  ;;  %v5975_v55 = vld [vmem:[#allocation2 + $0x10] ss:$72 sps:$4 sm:$0xff]  }
  0xf7   :  { %979 = vmatpush1.bf16.msra.mxu1 %v4751_v56  ;;  %1051 = vmatprep.mubr.bf16.mxu0 %v5925_v57  ;;  %v6055_v29 = vld [vmem:[#allocation2 + $0x30] ss:$72 sps:$4 sm:$0xff]  }
  0xf8   :  { %v341_v59 = vpop.permute.xlu0 %340 }
  0xf9   :  { %v522_v58 = vpop.permute.xlu1 %521  ;;  %343 = vst.msk [vmem:[#allocation2 + $0x80] sm:$0x3] %vm231_vm0, %v341_v59  ;;  %v5989_v59 = vcombine.high %v567_v52, %v567_v52 }
  0xfa   :  { %v523_v61 = vrot.slane %v522_v58, 4 }
  0xfb   :  { %v595_v63 = vld [vmem:[#allocation2 + $0xbc] sm:$0xff] }
  0xfc   :  { %v524_v62 = vsel %vm433_vm13, %v523_v61, %v522_v58  ;;  %v533_v2 = vpop.permute.xlu0 %532  ;;  %v4768_v4 = vcombine.high %v595_v63, %v595_v63  ;;  %v4767_v5 = vcombine.low %v595_v63, %v595_v63  ;;  %v580_v11 = vld [vmem:[#allocation2 + $0x34] sm:$0xff]  ;;  %v5979_v58 = vcombine.high %v566_v0, %v566_v0 }
  0xfd   :  { %526 = vst.msk [vmem:[#allocation2 + $0xc4] sm:$0x33] %vm5791_vm5, %v524_v62  ;;  %v217_v1 = vpop.permute.xlu1 %216  ;;  %v534_v6 = vrot.slane %v533_v2, 4  ;;  %v4809_v61 = vcombine.low %v567_v52, %v567_v52  ;;  %v4807_v62 = vcombine.low %v566_v0, %v566_v0 }
  0xfe   :  { %219 = vst.msk [vmem:[#allocation2 + $0x3c] sm:$0x3] %vm92_vm3, %v217_v1  ;;  %4783 = vmatprep.subr.msk.bf16.mxu1 %vm724_vm10, %v4768_v4  ;;  %v756_v7 = vsel %vm724_vm10, %v4767_v5, 0  ;;  %v6007_v4 = vld [vmem:[#allocation2 + $0x1c] ss:$72 sps:$4 sm:$0xff]   ;;  %v568_v5 = vld [vmem:[#allocation2 + $0xa8] sm:$0xff] }
  0xff   :  { %v535_v8 = vsel %vm445_vm12, %v534_v6, %v533_v2  ;;  %981 = vmatpush1.bf16.msra.mxu1 %v756_v7  ;;  %v6005_v2 = vsel %vm724_vm10, %v4807_v62, 0  ;;  %v569_v6 = vld [vmem:[#allocation2 + $0xb0] sm:$0xff] }
 0x100   :  { %537 = vst.msk [vmem:[#allocation2 + $0xc8] sm:$0x33] %vm5791_vm5, %v535_v8  ;;  %v226_v10 = vpop.permute.xlu0 %225  ;;  %v588_v12 = vld [vmem:[#allocation2 + $0x7c] sm:$0xff] }
 0x101   :  { %v350_v9 = vpop.permute.xlu1 %349  ;;  %v5379_v13 = vld [vmem:[#allocation2 + $0x38] ss:$72 sps:$4 sm:$0xff]   ;;  %228 = vst.msk [vmem:[#allocation2 + $0x40] sm:$0x3] %vm92_vm3, %v226_v10  ;;  %v4753_v14 = vcombine.low %v580_v11, %v588_v12 }
 0x102   :  { %352 = vst.msk [vmem:[#allocation2 + $0x84] sm:$0x3] %vm231_vm0, %v350_v9  ;;  %1019 = vmatprep.subr.bf16.mxu0 %v5379_v13  ;;  %4784 = vmatmul.mubr.msk.bf16.vlgmr.msra.gmra.mrb[8].mxu1 %vm720_vm11, %v5830_v60  ;;  %v6013_v11 = vld [vmem:[#allocation2 + $0x20] ss:$72 sps:$4 sm:$0xff]   ;;  %v4811_v13 = vcombine.low %v568_v5, %v568_v5 }
 0x103   :  { %1020 = vmatpush1.bf16.msra.mxu0 %v4753_v14  ;;  %1092 = vmatprep.mubr.bf16.mxu1 %v5925_v57  ;;  %v6015_v12 = vld [vmem:[#allocation2 + $0x18] ss:$72 sps:$4 sm:$0xff]   ;;  %v6021_v14 = vcombine.high %v569_v6, %v569_v6 }
 0x104   :  { %v359_v16 = vpop.permute.xlu0 %358 }
 0x105   :  { %v544_v15 = vpop.permute.xlu1 %543  ;;  %361 = vst.msk [vmem:[#allocation2 + $0x88] sm:$0x3] %vm231_vm0, %v359_v16  ;;  %v4813_v16 = vcombine.low %v569_v6, %v569_v6 }
 0x106   :  { %v545_v17 = vrot.slane %v544_v15, 4 }
 0x107   :  { %v596_v19 = vld [vmem:[#allocation2 + $0xc4] sm:$0xff] }
 0x108   :  { %v546_v18 = vsel %vm457_vm14, %v545_v17, %v544_v15  ;;  %v2712_v21 = vpop.permute.xlu0 %2711  ;;  %v4770_v22 = vcombine.high %v596_v19, %v596_v19  ;;  %v4769_v23 = vcombine.low %v596_v19, %v596_v19  ;;  %v6023_v15 = vcombine.high %v568_v5, %v568_v5 }
 0x109   :  { %548 = vst.msk [vmem:[#allocation2 + $0xcc] sm:$0x33] %vm5791_vm5, %v546_v18  ;;  %v2436_v20 = vpop.permute.xlu1 %2435  ;;  %v2713_v24 = vrot.slane %v2712_v21, 4  ;;  %v5387_v35 = vld [vmem:[#allocation2 + $0x3c] ss:$72 sps:$4 sm:$0xff]  }
 0x10a   :  { %2438 = vst.msk [vmem:[#allocation2 + $0x4] sm:$0x3] %vm92_vm3, %v2436_v20  ;;  %4785 = vmatprep.subr.msk.bf16.mxu0 %vm724_vm10, %v4770_v22  ;;  %v762_v25 = vsel %vm724_vm10, %v4769_v23, 0  ;;  %v6045_v22 = vsel %vm724_vm10, %v4813_v16, 0  ;;  %v6047_v23 = vld [vmem:[#allocation2 + $0x34] ss:$72 sps:$4 sm:$0xff]  }
 0x10b   :  { %v2714_v28 = vsel %vm370_vm4, %v2713_v24, %v2712_v21  ;;  %1022 = vmatpush1.bf16.msra.mxu0 %v762_v25  ;;  %v6036_v21 = vsel %vm724_vm10, %v4811_v13, 0  ;;  %v6049_v24 = vld [vmem:[#allocation2 + $0x2c] ss:$72 sps:$4 sm:$0xff]   ;;  %v570_v25 = vld [vmem:[#allocation2 + $0xb8] sm:$0xff] }
 0x10c   :  { %v2445_v32 = vpop.permute.xlu0 %2444  ;;  %1272 = vmatprep.subr.bf16.mxu0 %v5815_v34  ;;  %v5385_v33 = vld [vmem:[#allocation2 + $0x40] ss:$72 sps:$4 sm:$0xff]   ;;  %2716 = vst.msk [vmem:[#allocation2 + $0x90] sm:$0x33] %vm5791_vm5, %v2714_v28 }
 0x10d   :  { %v2583_v31 = vpop.permute.xlu1 %2582  ;;  %2447 = vst.msk [vmem:[#allocation2 + $0x8] sm:$0x3] %vm92_vm3, %v2445_v32  ;;  %1060 = vmatprep.subr.bf16.mxu1 %v5385_v33  ;;  %v6059_v32 = vcombine.high %v570_v25, %v570_v25  ;;  %v1615_v13 = vld [vmem:[#allocation2 + $0x88] sm:$0xff] }
 0x10e   :  { %2585 = vst.msk [vmem:[#allocation2 + $0x50] sm:$0x3] %vm231_vm0, %v2583_v31  ;;  %4786 = vmatmul.mubr.msk.bf16.vlgmr.msra.gmra.mrb[12].mxu0 %vm720_vm11, %v5830_v60  ;;  %1061 = vmatpush1.bf16.msra.mxu1 %v5387_v35  ;;  %v6057_v31 = vld [vmem:[#allocation2 + $0x28] ss:$72 sps:$4 sm:$0xff]  }
 0x10f   :  { %1304 = vmatprep.mubr.bf16.mxu0 %v5925_v57 }
 0x110   :  { %v597_v40 = vld [vmem:[#allocation2 + $0xcc] sm:$0xff]  ;;  %v2723_v41 = vpop.permute.xlu0 %2722 }
 0x111   :  { %v549_v26 = vld [vmem:[#allocation2] sm:$0xff]  ;;  %v2734_v34 = vpop.permute.xlu1 %2733  ;;  %v4772_v42 = vcombine.high %v597_v40, %v597_v40  ;;  %v4771_v43 = vcombine.low %v597_v40, %v597_v40  ;;  %v2724_v45 = vrot.slane %v2723_v41, 4  ;;  %v1623_v16 = vld [vmem:[#allocation2 + $0xd0] sm:$0xff] }
 0x112   :  { %v4789_v37 = vcombine.low %v549_v26, %v557_v27  ;;  %v2735_v44 = vrot.slane %v2734_v34, 4  ;;  %v571_v26 = vld [vmem:[#allocation2 + $0xc0] sm:$0xff] }
 0x113   :  { %4787 = vmatprep.subr.msk.bf16.mxu1 %vm724_vm10, %v4772_v42  ;;  %v768_v47 = vsel %vm724_vm10, %v4771_v43, 0  ;;  %v2725_v50 = vsel %vm385_vm7, %v2724_v45, %v2723_v41  ;;  %v6067_v33 = vcombine.high %v571_v26, %v571_v26  ;;  %v4817_v35 = vcombine.low %v571_v26, %v571_v26  ;;  %v6083_v43 = vld [vmem:[#allocation2 + $0x3c] ss:$72 sps:$4 sm:$0xff]  }
 0x114   :  { %1273 = vmatpush1.bf16.msra.mxu0 %v4789_v37  ;;  %v2736_v49 = vsel %vm397_vm6, %v2735_v44, %v2734_v34  ;;  %1063 = vmatpush1.bf16.msra.mxu1 %v768_v47  ;;  %v2454_v54 = vpop.permute.xlu0 %2453  ;;  %2727 = vst.msk [vmem:[#allocation2 + $0x94] sm:$0x33] %vm5791_vm5, %v2725_v50  ;;  %v4815_v37 = vcombine.low %v570_v25, %v570_v25  ;;  %v5465_v3 = vld [vmem:[#allocation2 + $0x4] ss:$72 sps:$4 sm:$0xff]  }
 0x115   :  { %4821 = vmatprep.subr.msk.bf16.mxu0 %vm724_vm10, %v4806_v38  ;;  %v2463_v53 = vpop.permute.xlu1 %2462  ;;  %1313 = vmatprep.subr.bf16.mxu1 %v5951_v30  ;;  %v5977_v56 = vld [vmem:[#allocation2 + $0x8] ss:$72 sps:$4 sm:$0xff]   ;;  %2456 = vst.msk [vmem:[#allocation2 + $0xc] sm:$0x3] %vm92_vm3, %v2454_v54  ;;  %v6078_v41 = vsel %vm724_vm10, %v4817_v35, 0  ;;  %v4867_v25 = vcombine.low %v1623_v16, %v1623_v16 }
 0x116   :  { %2738 = vst.msk [vmem:[#allocation2 + $0x98] sm:$0x33] %vm5791_vm5, %v2736_v49  ;;  %v6081_v42 = vsel %vm724_vm10, %v4815_v37, 0  ;;  %v6093_v49 = vld [vmem:[#allocation2 + $0x38] ss:$72 sps:$4 sm:$0xff]  }
 0x117   :  { %2465 = vst.msk [vmem:[#allocation2 + $0x10] sm:$0x3] %vm92_vm3, %v2463_v53  ;;  %4788 = vmatmul.mubr.msk.bf16.vlgmr.msra.gmra.mrb[12].mxu1 %vm720_vm11, %v5830_v60  ;;  %v6002_v60 = vsel %vm724_vm10, %v4809_v61, 0 }
 0x118   :  { %1275 = vmatpush1.bf16.msra.mxu0 %v1225_v46  ;;  %1314 = vmatpush1.bf16.msra.mxu1 %v5977_v56  ;;  %v2592_v1 = vpop.permute.xlu0 %2591  ;;  %v572_v46 = vld [vmem:[#allocation2 + $0xc8] sm:$0xff] }
 0x119   :  { %1354 = vmatprep.subr.bf16.mxu0 %v5965_v48  ;;  %v2601_v63 = vpop.permute.xlu1 %2600  ;;  %4823 = vmatprep.subr.msk.bf16.mxu1 %vm724_vm10, %v5979_v58  ;;  %2594 = vst.msk [vmem:[#allocation2 + $0x54] sm:$0x3] %vm231_vm0, %v2592_v1  ;;  %v4819_v50 = vcombine.low %v572_v46, %v572_v46 }
 0x11a   :  { %1345 = vmatprep.mubr.bf16.mxu1 %v5925_v57  ;;  %2603 = vst.msk [vmem:[#allocation2 + $0x58] sm:$0x3] %vm231_vm0, %v2601_v63 }
 0x11b   :  { %4822 = vmatmul.mubr.msk.bf16.vlgmr.msra.gmra.mrb[0].mxu0 %vm720_vm11, %v5969_v51  ;;  %v6116_v54 = vsel %vm724_vm10, %v4819_v50, 0 }
 0x11c   :  { %1355 = vmatpush1.bf16.msra.mxu0 %v5975_v55  ;;  %1386 = vmatprep.mubr.bf16.mxu0 %v5925_v57  ;;  %v2745_v8 = vpop.permute.xlu0 %2744 }
 0x11d   :  { %4825 = vmatprep.subr.msk.bf16.mxu0 %vm724_vm10, %v5989_v59  ;;  %1316 = vmatpush1.bf16.msra.mxu1 %v6005_v2  ;;  %v2756_v7 = vpop.permute.xlu1 %2755  ;;  %v2746_v10 = vrot.slane %v2745_v8, 4 }
 0x11e   :  { %1395 = vmatprep.subr.bf16.mxu1 %v6007_v4  ;;  %v2757_v9 = vrot.slane %v2756_v7, 4 }
 0x11f   :  { %v2747_v18 = vsel %vm409_vm9, %v2746_v10, %v2745_v8 }
 0x120   :  { %1357 = vmatpush1.bf16.msra.mxu0 %v6002_v60  ;;  %4824 = vmatmul.mubr.msk.bf16.vlgmr.msra.gmra.mrb[0].mxu1 %vm720_vm11, %v5969_v51  ;;  %v2758_v17 = vsel %vm421_vm8, %v2757_v9, %v2756_v7  ;;  %v2472_v20 = vpop.permute.xlu0 %2471  ;;  %2749 = vst.msk [vmem:[#allocation2 + $0x9c] sm:$0x33] %vm5791_vm5, %v2747_v18  ;;  %v2923_v18 = vld [vmem:[#allocation2 + $0x94] sm:$0xff] }
 0x121   :  { %1436 = vmatprep.subr.bf16.mxu0 %v5899_v36  ;;  %1396 = vmatpush1.bf16.msra.mxu1 %v6015_v12  ;;  %v2481_v19 = vpop.permute.xlu1 %2480  ;;  %2474 = vst.msk [vmem:[#allocation2 + $0x14] sm:$0x3] %vm92_vm3, %v2472_v20  ;;  %v4956_v26 = vcombine.high %v2923_v18, %v2923_v18 }
 0x122   :  { %4827 = vmatprep.subr.msk.bf16.mxu1 %vm724_vm10, %v6023_v15  ;;  %1427 = vmatprep.mubr.bf16.mxu1 %v5925_v57  ;;  %2483 = vst.msk [vmem:[#allocation2 + $0x18] sm:$0x3] %vm92_vm3, %v2481_v19 }
 0x123   :  { %4826 = vmatmul.mubr.msk.bf16.vlgmr.msra.gmra.mrb[4].mxu0 %vm720_vm11, %v5969_v51  ;;  %2760 = vst.msk [vmem:[#allocation2 + $0xa0] sm:$0x33] %vm5791_vm5, %v2758_v17 }
 0x124   :  { %1437 = vmatpush1.bf16.msra.mxu0 %v6013_v11  ;;  %1468 = vmatprep.mubr.bf16.mxu0 %v5925_v57  ;;  %v2610_v28 = vpop.permute.xlu0 %2609 }
 0x125   :  { %4829 = vmatprep.subr.msk.bf16.mxu0 %vm724_vm10, %v6021_v14  ;;  %1398 = vmatpush1.bf16.msra.mxu1 %v6036_v21  ;;  %v2619_v27 = vpop.permute.xlu1 %2618  ;;  %2612 = vst.msk [vmem:[#allocation2 + $0x5c] sm:$0x3] %vm231_vm0, %v2610_v28  ;;  %v4955_v28 = vcombine.low %v2923_v18, %v2923_v18 }
 0x126   :  { %1477 = vmatprep.subr.bf16.mxu1 %v6049_v24  ;;  %2621 = vst.msk [vmem:[#allocation2 + $0x60] sm:$0x3] %vm231_vm0, %v2619_v27  ;;  %v4868_v27 = vcombine.high %v1623_v16, %v1623_v16 }
 0x127   :  { %v3056_v35 = vsel %vm724_vm10, %v4955_v28, 0 }
 0x128   :  { %1439 = vmatpush1.bf16.msra.mxu0 %v6045_v22  ;;  %4828 = vmatmul.mubr.msk.bf16.vlgmr.msra.gmra.mrb[4].mxu1 %vm720_vm11, %v5969_v51  ;;  %v2767_v39 = vpop.permute.xlu0 %2766 }
 0x129   :  { %1518 = vmatprep.subr.bf16.mxu0 %v6047_v23  ;;  %1478 = vmatpush1.bf16.msra.mxu1 %v6057_v31  ;;  %v2778_v38 = vpop.permute.xlu1 %2777  ;;  %v2768_v34 = vrot.slane %v2767_v39, 4 }
 0x12a   :  { %4831 = vmatprep.subr.msk.bf16.mxu1 %vm724_vm10, %v6059_v32  ;;  %v2779_v40 = vrot.slane %v2778_v38, 4  ;;  %1509 = vmatprep.mubr.bf16.mxu1 %v5925_v57 }
 0x12b   :  { %4830 = vmatmul.mubr.msk.bf16.vlgmr.msra.gmra.mrb[8].mxu0 %vm720_vm11, %v5969_v51  ;;  %v2769_v45 = vsel %vm433_vm13, %v2768_v34, %v2767_v39  ;;  %v2924_v39 = vld [vmem:[#allocation2 + $0x9c] sm:$0xff] }
 0x12c   :  { %1519 = vmatpush1.bf16.msra.mxu0 %v6055_v29  ;;  %1550 = vmatprep.mubr.bf16.mxu0 %v5925_v57  ;;  %v2780_v44 = vsel %vm445_vm12, %v2779_v40, %v2778_v38  ;;  %v2490_v0 = vpop.permute.xlu0 %2489  ;;  %2771 = vst.msk [vmem:[#allocation2 + $0xa4] sm:$0x33] %vm5791_vm5, %v2769_v45  ;;  %v5439_v38 = vld [vmem:[#allocation2 + $0x10] ss:$72 sps:$4 sm:$0xff]   ;;  %v6208_v40 = vld [vmem:[#allocation6 + $0x4] sm:$0xf] }
 0x12d   :  { %4833 = vmatprep.subr.msk.bf16.mxu0 %vm724_vm10, %v6067_v33  ;;  %1480 = vmatpush1.bf16.msra.mxu1 %v6081_v42  ;;  %v2499_v47 = vpop.permute.xlu1 %2498  ;;  %2492 = vst.msk [vmem:[#allocation2 + $0x1c] sm:$0x3] %vm92_vm3, %v2490_v0  ;;  %v5436_v37 = vld [vmem:[#allocation2 + $0x18] ss:$72 sps:$4 sm:$0xff]   ;;  %v5437_v45 = vld [vmem:[#allocation2 + $0xc] ss:$72 sps:$4 sm:$0xff]   ;;  %v4958_v0 = vcombine.high %v2924_v39, %v2924_v39 }
 0x12e   :  { %1559 = vmatprep.subr.bf16.mxu1 %v6083_v43  ;;  %2782 = vst.msk [vmem:[#allocation2 + $0xa8] sm:$0x33] %vm5791_vm5, %v2780_v44  ;;  %v5434_v44 = vld [vmem:[#allocation2 + $0x14] ss:$72 sps:$4 sm:$0xff]  }
 0x12f   :  { %2501 = vst.msk [vmem:[#allocation2 + $0x20] sm:$0x3] %vm92_vm3, %v2499_v47 }
 0x130   :  { %1521 = vmatpush1.bf16.msra.mxu0 %v6078_v41  ;;  %4832 = vmatmul.mubr.msk.bf16.vlgmr.msra.gmra.mrb[8].mxu1 %vm720_vm11, %v5969_v51  ;;  %v2628_v53 = vpop.permute.xlu0 %2627 }
 0x131   :  { %1797 = vmatprep.subr.bf16.mxu0 %v5951_v30  ;;  %v6103_v30 = vcombine.high %v572_v46, %v572_v46  ;;  %1560 = vmatpush1.bf16.msra.mxu1 %v6093_v49  ;;  %v2637_v52 = vpop.permute.xlu1 %2636  ;;  %2630 = vst.msk [vmem:[#allocation2 + $0x64] sm:$0x3] %vm231_vm0, %v2628_v53  ;;  %v4957_v46 = vcombine.low %v2924_v39, %v2924_v39  ;;  %v2899_v39 = vld [vmem:[#allocation2 + $0x98] sm:$0xff] }
 0x132   :  { %1591 = vmatprep.mubr.bf16.mxu1 %v5925_v57  ;;  %2639 = vst.msk [vmem:[#allocation2 + $0x68] sm:$0x3] %vm231_vm0, %v2637_v52 }
 0x133   :  { %4834 = vmatmul.mubr.msk.bf16.vlgmr.msra.gmra.mrb[12].mxu0 %vm720_vm11, %v5969_v51  ;;  %4835 = vmatprep.subr.msk.bf16.mxu1 %vm724_vm10, %v6103_v30 }
 0x134   :  { %1798 = vmatpush1.bf16.msra.mxu0 %v5977_v56  ;;  %1829 = vmatprep.mubr.bf16.mxu0 %v5925_v57  ;;  %v6120_v56 = vld [vmem:[#allocation6 + $0x8] sm:$0xf]  ;;  %v2789_v61 = vpop.permute.xlu0 %2788 }
 0x135   :  { %4869 = vmatprep.subr.msk.bf16.mxu0 %vm724_vm10, %v5979_v58  ;;  %1562 = vmatpush1.bf16.msra.mxu1 %v6116_v54  ;;  %v2800_v58 = vpop.permute.xlu1 %2799  ;;  %v2790_v63 = vrot.slane %v2789_v61, 4  ;;  %v2925_v34 = vld [vmem:[#allocation2 + $0xa4] sm:$0xff] }
 0x136   :  { %1838 = vmatprep.subr.bf16.mxu1 %v5965_v48  ;;  %v2801_v62 = vrot.slane %v2800_v58, 4  ;;  %v4960_v47 = vcombine.high %v2925_v34, %v2925_v34 }
 0x138   :  { %1800 = vmatpush1.bf16.msra.mxu0 %v6005_v2  ;;  %4836 = vmatmul.mubr.msk.bf16.vlgmr.msra.gmra.mrb[12].mxu1 %vm720_vm11, %v5969_v51  ;;  %v2802_v1 = vsel %vm370_vm4, %v2801_v62, %v2800_v58  ;;  %v2791_v2 = vsel %vm457_vm14, %v2790_v63, %v2789_v61 }
 0x139   :  { %1879 = vmatprep.subr.bf16.mxu0 %v6007_v4  ;;  %1839 = vmatpush1.bf16.msra.mxu1 %v5975_v55  ;;  %v2517_v5 = vpop.permute.xlu1 %2516  ;;  %v2508_v4 = vpop.permute.xlu0 %2507  ;;  %2793 = vst.msk [vmem:[#allocation2 + $0xac] sm:$0x33] %vm5791_vm5, %v2791_v2  ;;  %v5448_v61 = vld [vmem:[#allocation2 + $0x20] ss:$72 sps:$4 sm:$0xff]  }
 0x13a   :  { %4871 = vmatprep.subr.msk.bf16.mxu1 %vm724_vm10, %v5989_v59  ;;  %2519 = vst.msk [vmem:[#allocation2 + $0x28] sm:$0x3] %vm92_vm3, %v2517_v5  ;;  %2510 = vst.msk [vmem:[#allocation2 + $0x24] sm:$0x3] %vm92_vm3, %v2508_v4  ;;  %1870 = vmatprep.mubr.bf16.mxu1 %v5925_v57 }
 0x13b   :  { %4870 = vmatmul.mubr.msk.bf16.vlgmr.msra.gmra.mrb[0].mxu0 %vm720_vm11, %v6120_v56  ;;  %2804 = vst.msk [vmem:[#allocation2 + $0xb0] sm:$0x33] %vm5791_vm5, %v2802_v1 }
 0x13c   :  { %1880 = vmatpush1.bf16.msra.mxu0 %v6015_v12  ;;  %1911 = vmatprep.mubr.bf16.mxu0 %v5925_v57 }
 0x13d   :  { %4873 = vmatprep.subr.msk.bf16.mxu0 %vm724_vm10, %v6023_v15  ;;  %1841 = vmatpush1.bf16.msra.mxu1 %v6002_v60  ;;  %v2811_v48 = vpop.permute.xlu1 %2810  ;;  %v2649_v51 = vpop.permute.xlu0 %2648  ;;  %v5429_v15 = vld [vmem:[#allocation2 + $0x44] ss:$72 sps:$4 sm:$0xff]  }
 0x13e   :  { %1920 = vmatprep.subr.bf16.mxu1 %v5899_v36  ;;  %v2812_v55 = vrot.slane %v2811_v48, 4  ;;  %2651 = vst.msk [vmem:[#allocation2 + $0x70] sm:$0x3] %vm231_vm0, %v2649_v51 }
 0x140   :  { %1882 = vmatpush1.bf16.msra.mxu0 %v6036_v21  ;;  %4872 = vmatmul.mubr.msk.bf16.vlgmr.msra.gmra.mrb[0].mxu1 %vm720_vm11, %v6120_v56  ;;  %v2813_v59 = vsel %vm385_vm7, %v2812_v55, %v2811_v48  ;;  %v1607_v21 = vld [vmem:[#allocation2 + $0x40] sm:$0xff] }
 0x141   :  { %1961 = vmatprep.subr.bf16.mxu0 %v6049_v24  ;;  %1921 = vmatpush1.bf16.msra.mxu1 %v6013_v11  ;;  %v2526_v60 = vpop.permute.xlu1 %2525  ;;  %v2822_v6 = vpop.permute.xlu0 %2821  ;;  %2815 = vst.msk [vmem:[#allocation2 + $0xb4] sm:$0x33] %vm5791_vm5, %v2813_v59  ;;  %v4851_v24 = vcombine.low %v1607_v21, %v1615_v13  ;;  %v5443_v4 = vld [vmem:[#allocation2 + $0x24] ss:$72 sps:$4 sm:$0xff]  }
 0x142   :  { %4875 = vmatprep.subr.msk.bf16.mxu1 %vm724_vm10, %v6021_v14  ;;  %2528 = vst.msk [vmem:[#allocation2 + $0x2c] sm:$0x3] %vm92_vm3, %v2526_v60  ;;  %v2823_v36 = vrot.slane %v2822_v6, 4  ;;  %1952 = vmatprep.mubr.bf16.mxu1 %v5925_v57  ;;  %v5428_v14 = vld [vmem:[#allocation2 + $0x8] ss:$72 sps:$4 sm:$0xff]  }
 0x143   :  { %4874 = vmatmul.mubr.msk.bf16.vlgmr.msra.gmra.mrb[4].mxu0 %vm720_vm11, %v6120_v56  ;;  %v2926_v62 = vld [vmem:[#allocation2 + $0xac] sm:$0xff]  ;;  %v5446_v48 = vld [vmem:[#allocation2 + $0x1c] ss:$72 sps:$4 sm:$0xff]  }
 0x144   :  { %1962 = vmatpush1.bf16.msra.mxu0 %v6057_v31  ;;  %1993 = vmatprep.mubr.bf16.mxu0 %v5925_v57  ;;  %v2824_v7 = vsel %vm397_vm6, %v2823_v36, %v2822_v6  ;;  %v4961_v51 = vcombine.low %v2926_v62, %v2926_v62  ;;  %v4962_v59 = vcombine.high %v2926_v62, %v2926_v62 }
 0x145   :  { %4877 = vmatprep.subr.msk.bf16.mxu0 %vm724_vm10, %v6059_v32  ;;  %1923 = vmatpush1.bf16.msra.mxu1 %v6045_v22  ;;  %2826 = vst.msk [vmem:[#allocation2 + $0xb8] sm:$0x33] %vm5791_vm5, %v2824_v7  ;;  %v2658_v8 = vpop.permute.xlu1 %2657  ;;  %v2535_v9 = vpop.permute.xlu0 %2534  ;;  %v5445_v58 = vld [vmem:[#allocation2 + $0x28] ss:$72 sps:$4 sm:$0xff]  }
 0x146   :  { %2002 = vmatprep.subr.bf16.mxu1 %v6047_v23  ;;  %2660 = vst.msk [vmem:[#allocation2 + $0x74] sm:$0x3] %vm231_vm0, %v2658_v8  ;;  %v5426_v23 = vld [vmem:[#allocation2 + $0x4] ss:$72 sps:$4 sm:$0xff]   ;;  %v3074_v8 = vsel %vm724_vm10, %v4961_v51, 0 }
 0x147   :  { %2537 = vst.msk [vmem:[#allocation2 + $0x30] sm:$0x3] %vm92_vm3, %v2535_v9 }
 0x148   :  { %1964 = vmatpush1.bf16.msra.mxu0 %v6081_v42  ;;  %4876 = vmatmul.mubr.msk.bf16.vlgmr.msra.gmra.mrb[4].mxu1 %vm720_vm11, %v6120_v56 }
 0x149   :  { %2043 = vmatprep.subr.bf16.mxu0 %v6083_v43  ;;  %2003 = vmatpush1.bf16.msra.mxu1 %v6055_v29  ;;  %v2833_v10 = vpop.permute.xlu1 %2832  ;;  %v2667_v11 = vpop.permute.xlu0 %2666 }
 0x14a   :  { %4879 = vmatprep.subr.msk.bf16.mxu1 %vm724_vm10, %v6067_v33  ;;  %v2834_v12 = vrot.slane %v2833_v10, 4  ;;  %2669 = vst.msk [vmem:[#allocation2 + $0x78] sm:$0x3] %vm231_vm0, %v2667_v11  ;;  %2034 = vmatprep.mubr.bf16.mxu1 %v5925_v57  ;;  %v1792_v33 = vsel %vm724_vm10, %v4867_v25, 0 }
 0x14b   :  { %4878 = vmatmul.mubr.msk.bf16.vlgmr.msra.gmra.mrb[8].mxu0 %vm720_vm11, %v6120_v56 }
 0x14c   :  { %2044 = vmatpush1.bf16.msra.mxu0 %v6093_v49  ;;  %2075 = vmatprep.mubr.bf16.mxu0 %v5925_v57  ;;  %v2835_v17 = vsel %vm409_vm9, %v2834_v12, %v2833_v10  ;;  %v4959_v49 = vcombine.low %v2925_v34, %v2925_v34  ;;  %v2927_v1 = vld [vmem:[#allocation2 + $0xb4] sm:$0xff]  ;;  %v6268_v34 = vld [vmem:[#allocation6] sm:$0xf] }
 0x14d   :  { %4881 = vmatprep.subr.msk.bf16.mxu0 %vm724_vm10, %v6103_v30  ;;  %2005 = vmatpush1.bf16.msra.mxu1 %v6078_v41  ;;  %2837 = vst.msk [vmem:[#allocation2 + $0xbc] sm:$0x33] %vm5791_vm5, %v2835_v17  ;;  %v2544_v19 = vpop.permute.xlu1 %2543  ;;  %v2844_v20 = vpop.permute.xlu0 %2843  ;;  %v4964_v55 = vcombine.high %v2927_v1, %v2927_v1  ;;  %v4963_v60 = vcombine.low %v2927_v1, %v2927_v1  ;;  %v5456_v16 = vld [vmem:[#allocation2 + $0x2c] ss:$72 sps:$4 sm:$0xff]  }
 0x14e   :  { %2084 = vmatprep.subr.bf16.mxu1 %v5429_v15  ;;  %2546 = vst.msk [vmem:[#allocation2 + $0x34] sm:$0x3] %vm92_vm3, %v2544_v19  ;;  %v2845_v22 = vrot.slane %v2844_v20, 4 }
 0x14f   :  { %v3080_v9 = vsel %vm724_vm10, %v4963_v60, 0 }
 0x150   :  { %2046 = vmatpush1.bf16.msra.mxu0 %v6116_v54  ;;  %4880 = vmatmul.mubr.msk.bf16.vlgmr.msra.gmra.mrb[8].mxu1 %vm720_vm11, %v6120_v56  ;;  %v2846_v29 = vsel %vm421_vm8, %v2845_v22, %v2844_v20  ;;  %v3062_v54 = vsel %vm724_vm10, %v4957_v46, 0  ;;  %v6282_v46 = vcombine.high %v2899_v39, %v2899_v39 }
 0x151   :  { %3103 = vmatprep.subr.bf16.mxu0 %v5428_v14  ;;  %2085 = vmatpush1.bf16.msra.mxu1 %v4851_v24  ;;  %2848 = vst.msk [vmem:[#allocation2 + $0xc0] sm:$0x33] %vm5791_vm5, %v2846_v29  ;;  %v2676_v31 = vpop.permute.xlu1 %2675  ;;  %v2553_v32 = vpop.permute.xlu0 %2552  ;;  %v5458_v11 = vld [vmem:[#allocation2 + $0x30] ss:$72 sps:$4 sm:$0xff]  }
 0x152   :  { %4883 = vmatprep.subr.msk.bf16.mxu1 %vm724_vm10, %v4868_v27  ;;  %2678 = vst.msk [vmem:[#allocation2 + $0x7c] sm:$0x3] %vm231_vm0, %v2676_v31  ;;  %2116 = vmatprep.mubr.bf16.mxu1 %v5925_v57  ;;  %v2898_v24 = vld [vmem:[#allocation2 + $0x90] sm:$0xff]  ;;  %v5463_v27 = vld [vmem:[#allocation2] ss:$72 sps:$4 sm:$0xff]  }
 0x153   :  { %4882 = vmatmul.mubr.msk.bf16.vlgmr.msra.gmra.mrb[12].mxu0 %vm720_vm11, %v6120_v56  ;;  %2555 = vst.msk [vmem:[#allocation2 + $0x38] sm:$0x3] %vm92_vm3, %v2553_v32  ;;  %v5003_v29 = vcombine.low %v2898_v24, %v2898_v24  ;;  %v5004_v31 = vcombine.high %v2898_v24, %v2898_v24  ;;  %v6331_v51 = vld [vmem:[#allocation2 + $0x30] ss:$72 sps:$4 sm:$0xff]  }
 0x154   :  { %3104 = vmatpush1.bf16.msra.mxu0 %v5426_v23  ;;  %3135 = vmatprep.mubr.bf16.mxu0 %v5925_v57  ;;  %v82_v24 = vld [vmem:[#allocation8] sm:$0xff] }
 0x155   :  { %4971 = vmatprep.subr.msk.bf16.mxu0 %vm724_vm10, %v4956_v26  ;;  %2087 = vmatpush1.bf16.msra.mxu1 %v1792_v33  ;;  %v2855_v41 = vpop.permute.xlu1 %2854  ;;  %v2685_v42 = vpop.permute.xlu0 %2684  ;;  %v3555_v33 = vsel %vm724_vm10, %v5003_v29, 0 }
 0x156   :  { %3144 = vmatprep.subr.bf16.mxu1 %v5439_v38  ;;  %v2856_v43 = vrot.slane %v2855_v41, 4  ;;  %2687 = vst.msk [vmem:[#allocation2 + $0x80] sm:$0x3] %vm231_vm0, %v2685_v42  ;;  %v6266_v38 = vld [vmem:[#allocation2 + $0xc] ss:$72 sps:$4 sm:$0xff]  }
 0x157   :  { %v6272_v42 = vld [vmem:[#allocation2 + $0x10] ss:$72 sps:$4 sm:$0xff]  }
 0x158   :  { %3106 = vmatpush1.bf16.msra.mxu0 %v3056_v35  ;;  %4884 = vmatmul.mubr.msk.bf16.vlgmr.msra.gmra.mrb[12].mxu1 %vm720_vm11, %v6120_v56  ;;  %v2857_v30 = vsel %vm433_vm13, %v2856_v43, %v2855_v41  ;;  %v3068_v56 = vsel %vm724_vm10, %v4959_v49, 0  ;;  %v2928_v12 = vld [vmem:[#allocation2 + $0xbc] sm:$0xff]  ;;  %v6274_v43 = vld [vmem:[#allocation2 + $0x8] ss:$72 sps:$4 sm:$0xff]   ;;  %v6298_v49 = vld [vmem:[#allocation2 + $0x24] ss:$72 sps:$4 sm:$0xff]  }
 0x159   :  { %3185 = vmatprep.subr.bf16.mxu0 %v5436_v37  ;;  %3145 = vmatpush1.bf16.msra.mxu1 %v5437_v45  ;;  %2859 = vst.msk [vmem:[#allocation2 + $0xc4] sm:$0x33] %vm5791_vm5, %v2857_v30  ;;  %v2562_v50 = vpop.permute.xlu1 %2561  ;;  %v2866_v52 = vpop.permute.xlu0 %2865  ;;  %v5453_v15 = vld [vmem:[#allocation2 + $0x34] ss:$72 sps:$4 sm:$0xff]   ;;  %v4966_v17 = vcombine.high %v2928_v12, %v2928_v12  ;;  %v4965_v20 = vcombine.low %v2928_v12, %v2928_v12  ;;  %v2900_v41 = vld [vmem:[#allocation2 + $0xa0] sm:$0xff] }
 0x15a   :  { %4973 = vmatprep.subr.msk.bf16.mxu1 %vm724_vm10, %v4958_v0  ;;  %2564 = vst.msk [vmem:[#allocation2 + $0x3c] sm:$0x3] %vm92_vm3, %v2562_v50  ;;  %v2867_v53 = vrot.slane %v2866_v52, 4  ;;  %3176 = vmatprep.mubr.bf16.mxu1 %v5925_v57  ;;  %v6264_v37 = vld [vmem:[#allocation2 + $0x14] ss:$72 sps:$4 sm:$0xff]   ;;  %v6280_v45 = vcombine.high %v2900_v41, %v2900_v41  ;;  %v2901_v50 = vld [vmem:[#allocation2 + $0xa8] sm:$0xff] }
 0x15b   :  { %4972 = vmatmul.mubr.msk.bf16.vlgmr.msra.gmra.mrb[16].mxu0 %vm720_vm11, %v6208_v40  ;;  %v3086_v22 = vsel %vm724_vm10, %v4965_v20, 0  ;;  %v6300_v30 = vld [vmem:[#allocation2 + $0x1c] ss:$72 sps:$4 sm:$0xff]  }
 0x15c   :  { %3186 = vmatpush1.bf16.msra.mxu0 %v5434_v44  ;;  %3217 = vmatprep.mubr.bf16.mxu0 %v5925_v57  ;;  %v2868_v63 = vsel %vm445_vm12, %v2867_v53, %v2866_v52  ;;  %v5005_v44 = vcombine.low %v2899_v39, %v2899_v39  ;;  %v2902_v52 = vld [vmem:[#allocation2 + $0xb0] sm:$0xff]  ;;  %v6306_v53 = vld [vmem:[#allocation2 + $0x20] ss:$72 sps:$4 sm:$0xff]  }
 0x15d   :  { %4975 = vmatprep.subr.msk.bf16.mxu0 %vm724_vm10, %v4960_v47  ;;  %3147 = vmatpush1.bf16.msra.mxu1 %v3062_v54  ;;  %2870 = vst.msk [vmem:[#allocation2 + $0xc8] sm:$0x33] %vm5791_vm5, %v2868_v63  ;;  %v2694_v2 = vpop.permute.xlu1 %2693  ;;  %v2571_v5 = vpop.permute.xlu0 %2570  ;;  %v5455_v10 = vld [vmem:[#allocation2 + $0x38] ss:$72 sps:$4 sm:$0xff]   ;;  %v5007_v47 = vcombine.low %v2900_v41, %v2900_v41  ;;  %v5011_v62 = vcombine.low %v2902_v52, %v2902_v52 }
 0x15e   :  { %3226 = vmatprep.subr.bf16.mxu1 %v5448_v61  ;;  %2696 = vst.msk [vmem:[#allocation2 + $0x84] sm:$0x3] %vm231_vm0, %v2694_v2  ;;  %v6291_v0 = vsel %vm724_vm10, %v5005_v44, 0  ;;  %v6308_v54 = vld [vmem:[#allocation2 + $0x18] ss:$72 sps:$4 sm:$0xff]   ;;  %v5010_v61 = vcombine.high %v2901_v50, %v2901_v50 }
 0x15f   :  { %2573 = vst.msk [vmem:[#allocation2 + $0x40] sm:$0x3] %vm92_vm3, %v2571_v5  ;;  %v6325_v1 = vsel %vm724_vm10, %v5011_v62, 0  ;;  %v6327_v2 = vld [vmem:[#allocation2 + $0x34] ss:$72 sps:$4 sm:$0xff]  }
 0x160   :  { %3188 = vmatpush1.bf16.msra.mxu0 %v3068_v56  ;;  %4974 = vmatmul.mubr.msk.bf16.vlgmr.msra.gmra.mrb[16].mxu1 %vm720_vm11, %v6208_v40  ;;  %v5009_v56 = vcombine.low %v2901_v50, %v2901_v50  ;;  %v5498_v5 = vld [vmem:[#allocation2 + $0x2c] ss:$72 sps:$4 sm:$0xff]  }
 0x161   :  { %3267 = vmatprep.subr.bf16.mxu0 %v5445_v58  ;;  %3227 = vmatpush1.bf16.msra.mxu1 %v5446_v48  ;;  %v2877_v6 = vpop.permute.xlu1 %2876  ;;  %v2703_v36 = vpop.permute.xlu0 %2702  ;;  %v6314_v58 = vcombine.high %v2902_v52, %v2902_v52  ;;  %v2904_v48 = vld [vmem:[#allocation2 + $0xc0] sm:$0xff] }
 0x162   :  { %4977 = vmatprep.subr.msk.bf16.mxu1 %vm724_vm10, %v4962_v59  ;;  %v2878_v7 = vrot.slane %v2877_v6, 4  ;;  %2705 = vst.msk [vmem:[#allocation2 + $0x88] sm:$0x3] %vm231_vm0, %v2703_v36  ;;  %3258 = vmatprep.mubr.bf16.mxu1 %v5925_v57  ;;  %v3573_v63 = vsel %vm724_vm10, %v5009_v56, 0  ;;  %v6337_v60 = vcombine.high %v2904_v48, %v2904_v48 }
 0x163   :  { %4976 = vmatmul.mubr.msk.bf16.vlgmr.msra.gmra.mrb[20].mxu0 %vm720_vm11, %v6208_v40 }
 0x164   :  { %3268 = vmatpush1.bf16.msra.mxu0 %v5443_v4  ;;  %3299 = vmatprep.mubr.bf16.mxu0 %v5925_v57  ;;  %v2879_v13 = vsel %vm457_vm14, %v2878_v7, %v2877_v6  ;;  %v2929_v14 = vld [vmem:[#allocation2 + $0xc4] sm:$0xff]  ;;  %v2903_v4 = vld [vmem:[#allocation2 + $0xb8] sm:$0xff]  ;;  %v5015_v6 = vcombine.low %v2904_v48, %v2904_v48 }
 0x165   :  { %4979 = vmatprep.subr.msk.bf16.mxu0 %vm724_vm10, %v4964_v55  ;;  %3229 = vmatpush1.bf16.msra.mxu1 %v3074_v8  ;;  %2881 = vst.msk [vmem:[#allocation2 + $0xcc] sm:$0x33] %vm5791_vm5, %v2879_v13  ;;  %v4968_v18 = vcombine.high %v2929_v14, %v2929_v14  ;;  %v4967_v19 = vcombine.low %v2929_v14, %v2929_v14  ;;  %v5466_v28 = vld [vmem:[#allocation2 + $0x3c] ss:$72 sps:$4 sm:$0xff]   ;;  %v5496_v55 = vld [vmem:[#allocation2 + $0x28] ss:$72 sps:$4 sm:$0xff]  }
 0x166   :  { %3308 = vmatprep.subr.bf16.mxu1 %v5458_v11  ;;  %v5014_v59 = vcombine.high %v2903_v4, %v2903_v4  ;;  %v5013_v36 = vcombine.low %v2903_v4, %v2903_v4  ;;  %v3591_v7 = vsel %vm724_vm10, %v5015_v6, 0  ;;  %v5503_v11 = vld [vmem:[#allocation2 + $0x38] ss:$72 sps:$4 sm:$0xff]  }
 0x167   :  { %v3092_v21 = vsel %vm724_vm10, %v4967_v19, 0 }
 0x168   :  { %3270 = vmatpush1.bf16.msra.mxu0 %v3080_v9  ;;  %4978 = vmatmul.mubr.msk.bf16.vlgmr.msra.gmra.mrb[20].mxu1 %vm720_vm11, %v6208_v40  ;;  %v3585_v8 = vsel %vm724_vm10, %v5013_v36, 0  ;;  %v5505_v9 = vld [vmem:[#allocation2 + $0x3c] ss:$72 sps:$4 sm:$0xff]  }
 0x169   :  { %3349 = vmatprep.subr.bf16.mxu0 %v5455_v10  ;;  %3309 = vmatpush1.bf16.msra.mxu1 %v5456_v16  ;;  %v5468_v23 = vld [vmem:[#allocation2 + $0x40] ss:$72 sps:$4 sm:$0xff]   ;;  %v5510_v16 = vld [vmem:[#allocation2 + $0x44] ss:$72 sps:$4 sm:$0xff]  }
 0x16a   :  { %4981 = vmatprep.subr.msk.bf16.mxu1 %vm724_vm10, %v4966_v17  ;;  %3340 = vmatprep.mubr.bf16.mxu1 %v5925_v57 }
 0x16b   :  { %4980 = vmatmul.mubr.msk.bf16.vlgmr.msra.gmra.mrb[24].mxu0 %vm720_vm11, %v6208_v40 }
 0x16c   :  { %3350 = vmatpush1.bf16.msra.mxu0 %v5453_v15  ;;  %3381 = vmatprep.mubr.bf16.mxu0 %v5925_v57  ;;  %v2930_v25 = vld [vmem:[#allocation2 + $0xcc] sm:$0xff] }
 0x16d   :  { %4983 = vmatprep.subr.msk.bf16.mxu0 %vm724_vm10, %v4968_v18  ;;  %3311 = vmatpush1.bf16.msra.mxu1 %v3086_v22  ;;  %v4970_v26 = vcombine.high %v2930_v25, %v2930_v25  ;;  %v4969_v32 = vcombine.low %v2930_v25, %v2930_v25  ;;  %v2905_v10 = vld [vmem:[#allocation2 + $0xc8] sm:$0xff]  ;;  %v3954_v15 = vld [vmem:[#allocation6 + $0x8] sm:$0xf] }
 0x16e   :  { %3390 = vmatprep.subr.bf16.mxu1 %v5468_v23  ;;  %v5018_v12 = vcombine.high %v2905_v10, %v2905_v10  ;;  %v5017_v13 = vcombine.low %v2905_v10, %v2905_v10  ;;  %v3953_v17 = vld [vmem:[#allocation2 + $0xd0] sm:$0xff]  ;;  %v5508_v18 = vld [vmem:[#allocation2 + $0x40] ss:$72 sps:$4 sm:$0xff]  }
 0x16f   :  { %v3098_v35 = vsel %vm724_vm10, %v4969_v32, 0  ;;  %v5066_v19 = vcombine.high %v3953_v17, %v3953_v17  ;;  %v5065_v20 = vcombine.low %v3953_v17, %v3953_v17 }
 0x170   :  { %3352 = vmatpush1.bf16.msra.mxu0 %v3092_v21  ;;  %4982 = vmatmul.mubr.msk.bf16.vlgmr.msra.gmra.mrb[24].mxu1 %vm720_vm11, %v6208_v40  ;;  %v3597_v14 = vsel %vm724_vm10, %v5017_v13, 0  ;;  %v2143_v21 = vlaneseq }
 0x171   :  { %3602 = vmatprep.subr.bf16.mxu0 %v5465_v3  ;;  %3391 = vmatpush1.bf16.msra.mxu1 %v5466_v28  ;;  %v4121_v3 = vsel %vm724_vm10, %v5065_v20, 0 }
 0x172   :  { %4985 = vmatprep.subr.msk.bf16.mxu1 %vm724_vm10, %v4970_v26  ;;  %3422 = vmatprep.mubr.bf16.mxu1 %v5925_v57  ;;  %v6398_v22 = vshrl.u32 %v2143_v21, 7 }
 0x173   :  { %4984 = vmatmul.mubr.msk.bf16.vlgmr.msra.gmra.mrb[28].mxu0 %vm720_vm11, %v6208_v40 }
 0x174   :  { %3603 = vmatpush1.bf16.msra.mxu0 %v5463_v27  ;;  %3634 = vmatprep.mubr.bf16.mxu0 %v5925_v57  ;;  %v2145_v23 = vsub.s32 0, %v6398_v22  ;;  %v2149_v25 = vsub.s32 1, %v6398_v22  ;;  %v2161_v39 = vsub.s32 4, %v6398_v22  ;;  %v2173_v52 = vsub.s32 7, %v6398_v22 }
 0x175   :  { %5019 = vmatprep.subr.msk.bf16.mxu0 %vm724_vm10, %v5004_v31  ;;  %3393 = vmatpush1.bf16.msra.mxu1 %v3098_v35  ;;  %v2153_v31 = vsub.s32 2, %v6398_v22  ;;  %v2157_v35 = vsub.s32 3, %v6398_v22 }
 0x176   :  { %3643 = vmatprep.subr.bf16.mxu1 %v6266_v38  ;;  %v6402_v26 = vrot.slane %v82_v24, %v2145_v23  ;;  %v6404_v27 = vrot.slane %v82_v24, %v2149_v25 }
 0x177   :  { %v6419_v41 = vrot.slane %v82_v24, %v2157_v35 }
 0x178   :  { %3605 = vmatpush1.bf16.msra.mxu0 %v3555_v33  ;;  %4986 = vmatmul.mubr.msk.bf16.vlgmr.msra.gmra.mrb[28].mxu1 %vm720_vm11, %v6208_v40  ;;  %v6296_v40 = vsel %vm724_vm10, %v5007_v47, 0 }
 0x179   :  { %3684 = vmatprep.subr.bf16.mxu0 %v6264_v37  ;;  %3644 = vmatpush1.bf16.msra.mxu1 %v6274_v43 }
 0x17a   :  { %5021 = vmatprep.subr.msk.bf16.mxu1 %vm724_vm10, %v6282_v46  ;;  %3675 = vmatprep.mubr.bf16.mxu1 %v5925_v57 }
 0x17b   :  { %5020 = vmatmul.mubr.msk.bf16.vlgmr.msra.gmra.mrb[16].mxu0 %vm720_vm11, %v6268_v34 }
 0x17c   :  { %3685 = vmatpush1.bf16.msra.mxu0 %v6272_v42  ;;  %3716 = vmatprep.mubr.bf16.mxu0 %v5925_v57 }
 0x17d   :  { %5023 = vmatprep.subr.msk.bf16.mxu0 %vm724_vm10, %v6280_v45  ;;  %3646 = vmatpush1.bf16.msra.mxu1 %v6291_v0 }
 0x17e   :  { %3725 = vmatprep.subr.bf16.mxu1 %v6300_v30 }
 0x180   :  { %3687 = vmatpush1.bf16.msra.mxu0 %v6296_v40  ;;  %5022 = vmatmul.mubr.msk.bf16.vlgmr.msra.gmra.mrb[16].mxu1 %vm720_vm11, %v6268_v34 }
 0x181   :  { %3766 = vmatprep.subr.bf16.mxu0 %v6298_v49  ;;  %3726 = vmatpush1.bf16.msra.mxu1 %v6308_v54 }
 0x182   :  { %5025 = vmatprep.subr.msk.bf16.mxu1 %vm724_vm10, %v5010_v61  ;;  %3757 = vmatprep.mubr.bf16.mxu1 %v5925_v57 }
 0x183   :  { %5024 = vmatmul.mubr.msk.bf16.vlgmr.msra.gmra.mrb[20].mxu0 %vm720_vm11, %v6268_v34 }
 0x184   :  { %3767 = vmatpush1.bf16.msra.mxu0 %v6306_v53  ;;  %3798 = vmatprep.mubr.bf16.mxu0 %v5925_v57 }
 0x185   :  { %5027 = vmatprep.subr.msk.bf16.mxu0 %vm724_vm10, %v6314_v58  ;;  %3728 = vmatpush1.bf16.msra.mxu1 %v3573_v63 }
 0x186   :  { %3807 = vmatprep.subr.bf16.mxu1 %v5498_v5 }
 0x188   :  { %3769 = vmatpush1.bf16.msra.mxu0 %v6325_v1  ;;  %5026 = vmatmul.mubr.msk.bf16.vlgmr.msra.gmra.mrb[20].mxu1 %vm720_vm11, %v6268_v34 }
 0x189   :  { %3848 = vmatprep.subr.bf16.mxu0 %v6327_v2  ;;  %3808 = vmatpush1.bf16.msra.mxu1 %v5496_v55 }
 0x18a   :  { %5029 = vmatprep.subr.msk.bf16.mxu1 %vm724_vm10, %v5014_v59  ;;  %3839 = vmatprep.mubr.bf16.mxu1 %v5925_v57 }
 0x18b   :  { %5028 = vmatmul.mubr.msk.bf16.vlgmr.msra.gmra.mrb[24].mxu0 %vm720_vm11, %v6268_v34 }
 0x18c   :  { %3849 = vmatpush1.bf16.msra.mxu0 %v6331_v51  ;;  %3880 = vmatprep.mubr.bf16.mxu0 %v5925_v57 }
 0x18d   :  { %5031 = vmatprep.subr.msk.bf16.mxu0 %vm724_vm10, %v6337_v60  ;;  %3810 = vmatpush1.bf16.msra.mxu1 %v3585_v8 }
 0x18e   :  { %3889 = vmatprep.subr.bf16.mxu1 %v5505_v9 }
 0x190   :  { %3851 = vmatpush1.bf16.msra.mxu0 %v3591_v7  ;;  %5030 = vmatmul.mubr.msk.bf16.vlgmr.msra.gmra.mrb[24].mxu1 %vm720_vm11, %v6268_v34 }
 0x191   :  { %4126 = vmatprep.subr.bf16.mxu0 %v6266_v38  ;;  %3890 = vmatpush1.bf16.msra.mxu1 %v5503_v11 }
 0x192   :  { %5033 = vmatprep.subr.msk.bf16.mxu1 %vm724_vm10, %v5018_v12  ;;  %3921 = vmatprep.mubr.bf16.mxu1 %v5925_v57 }
 0x193   :  { %5032 = vmatmul.mubr.msk.bf16.vlgmr.msra.gmra.mrb[28].mxu0 %vm720_vm11, %v6268_v34 }
 0x194   :  { %4127 = vmatpush1.bf16.msra.mxu0 %v6274_v43  ;;  %4158 = vmatprep.mubr.bf16.mxu0 %v5925_v57 }
 0x195   :  { %5067 = vmatprep.subr.msk.bf16.mxu0 %vm724_vm10, %v6282_v46  ;;  %3892 = vmatpush1.bf16.msra.mxu1 %v3597_v14 }
 0x196   :  { %4167 = vmatprep.subr.bf16.mxu1 %v6264_v37 }
 0x198   :  { %4129 = vmatpush1.bf16.msra.mxu0 %v6291_v0  ;;  %5034 = vmatmul.mubr.msk.bf16.vlgmr.msra.gmra.mrb[28].mxu1 %vm720_vm11, %v6268_v34  ;;  %v6417_v34 = vrot.slane %v82_v24, %v2153_v31 }
 0x199   :  { %4208 = vmatprep.subr.bf16.mxu0 %v6300_v30  ;;  %4168 = vmatpush1.bf16.msra.mxu1 %v6272_v42  ;;  %v2165_v42 = vsub.s32 5, %v6398_v22 }
 0x19a   :  { %5069 = vmatprep.subr.msk.bf16.mxu1 %vm724_vm10, %v6280_v45  ;;  %4199 = vmatprep.mubr.bf16.mxu1 %v5925_v57  ;;  %v6426_v45 = vrot.slane %v82_v24, %v2161_v39 }
 0x19b   :  { %5068 = vmatmul.mubr.msk.bf16.vlgmr.msra.gmra.mrb[16].mxu0 %vm720_vm11, %v3954_v15 }
 0x19c   :  { %4209 = vmatpush1.bf16.msra.mxu0 %v6308_v54  ;;  %4240 = vmatprep.mubr.bf16.mxu0 %v5925_v57  ;;  %v6438_v54 = vrot.slane %v82_v24, %v2165_v42 }
 0x19d   :  { %5071 = vmatprep.subr.msk.bf16.mxu0 %vm724_vm10, %v5010_v61  ;;  %4170 = vmatpush1.bf16.msra.mxu1 %v6296_v40  ;;  %v2169_v40 = vsub.s32 6, %v6398_v22 }
 0x19e   :  { %4249 = vmatprep.subr.bf16.mxu1 %v6298_v49 }
 0x1a0   :  { %4211 = vmatpush1.bf16.msra.mxu0 %v3573_v63  ;;  %5070 = vmatmul.mubr.msk.bf16.vlgmr.msra.gmra.mrb[16].mxu1 %vm720_vm11, %v3954_v15  ;;  %v6442_v63 = vrot.slane %v82_v24, %v2169_v40 }
 0x1a1   :  { %4290 = vmatprep.subr.bf16.mxu0 %v5498_v5  ;;  %4250 = vmatpush1.bf16.msra.mxu1 %v6306_v53 }
 0x1a2   :  { %5073 = vmatprep.subr.msk.bf16.mxu1 %vm724_vm10, %v6314_v58  ;;  %4281 = vmatprep.mubr.bf16.mxu1 %v5925_v57 }
 0x1a3   :  { %5072 = vmatmul.mubr.msk.bf16.vlgmr.msra.gmra.mrb[20].mxu0 %vm720_vm11, %v3954_v15 }
 0x1a4   :  { %4291 = vmatpush1.bf16.msra.mxu0 %v5496_v55  ;;  %4322 = vmatprep.mubr.bf16.mxu0 %v5925_v57 }
 0x1a5   :  { %5075 = vmatprep.subr.msk.bf16.mxu0 %vm724_vm10, %v5014_v59  ;;  %4252 = vmatpush1.bf16.msra.mxu1 %v6325_v1  ;;  %v83_v1 = vld [vmem:[#allocation8 + $0x8] sm:$0xff] }
 0x1a6   :  { %4331 = vmatprep.subr.bf16.mxu1 %v6327_v2  ;;  %v6444_v2 = vrot.slane %v82_v24, %v2173_v52  ;;  %v6452_v55 = vrot.slane %v83_v1, %v2145_v23  ;;  %v6468_v17 = vrot.slane %v83_v1, %v2157_v35  ;;  %v6476_v21 = vrot.slane %v83_v1, %v2161_v39 }
 0x1a7   :  { %v6486_v35 = vrot.slane %v83_v1, %v2165_v42 }
 0x1a8   :  { %4293 = vmatpush1.bf16.msra.mxu0 %v3585_v8  ;;  %5074 = vmatmul.mubr.msk.bf16.vlgmr.msra.gmra.mrb[20].mxu1 %vm720_vm11, %v3954_v15 }
 0x1a9   :  { %4372 = vmatprep.subr.bf16.mxu0 %v5505_v9  ;;  %4332 = vmatpush1.bf16.msra.mxu1 %v6331_v51 }
 0x1aa   :  { %5077 = vmatprep.subr.msk.bf16.mxu1 %vm724_vm10, %v6337_v60  ;;  %4363 = vmatprep.mubr.bf16.mxu1 %v5925_v57 }
 0x1ab   :  { %5076 = vmatmul.mubr.msk.bf16.vlgmr.msra.gmra.mrb[24].mxu0 %vm720_vm11, %v3954_v15 }
 0x1ac   :  { %4373 = vmatpush1.bf16.msra.mxu0 %v5503_v11  ;;  %4404 = vmatprep.mubr.bf16.mxu0 %v5925_v57  ;;  %v6462_v11 = vrot.slane %v83_v1, %v2149_v25 }
 0x1ad   :  { %5079 = vmatprep.subr.msk.bf16.mxu0 %vm724_vm10, %v5018_v12  ;;  %4334 = vmatpush1.bf16.msra.mxu1 %v3591_v7 }
 0x1ae   :  { %4413 = vmatprep.subr.bf16.mxu1 %v5510_v16  ;;  %v6466_v16 = vrot.slane %v83_v1, %v2153_v31 }
 0x1b0   :  { %4375 = vmatpush1.bf16.msra.mxu0 %v3597_v14  ;;  %5078 = vmatmul.mubr.msk.bf16.vlgmr.msra.gmra.mrb[24].mxu1 %vm720_vm11, %v3954_v15 }
 0x1b1   :  { %4414 = vmatpush1.bf16.msra.mxu1 %v5508_v18  ;;  %4445 = vmatprep.mubr.bf16.mxu1 %v5925_v57 }
 0x1b2   :  { %5081 = vmatprep.subr.msk.bf16.mxu1 %vm724_vm10, %v5066_v19 }
 0x1b3   :  { %5080 = vmatmul.mubr.msk.bf16.vlgmr.msra.gmra.mrb[28].mxu0 %vm720_vm11, %v3954_v15 }
 0x1b5   :  { %4416 = vmatpush1.bf16.msra.mxu1 %v4121_v3 }
 0x1b8   :  { %5082 = vmatmul.mubr.msk.bf16.vlgmr.msra.gmra.mrb[28].mxu1 %vm720_vm11, %v3954_v15 }
 0x20e   :  { %v6406_v57 = vpop.f32.mrb[0].mxu0 }
 0x20f   :  { %v2223_v28 = vmul.f32 %v6402_v26, %v6406_v57  ;;  %v6410_v29 = vpop.f32.mrb[1].mxu0 }
 0x210   :  { %v2224_v32 = vmul.f32 %v6404_v27, %v6410_v29  ;;  %v1835_v33 = vpop.f32.mrb[2].mxu0 }
 0x211   :  { %v1836_v37 = vpop.f32.mrb[3].mxu0 }
 0x212   :  { %v2239_v38 = vadd.f32 %v2224_v32, %v2223_v28 }
 0x213   :  { %v6424_v44 = vpop.f32.mrb[0].mxu1 }
 0x214   :  { %v2225_v46 = vmul.f32 %v6417_v34, %v6424_v44  ;;  %v6432_v0 = vpop.f32.mrb[1].mxu1 }
 0x215   :  { %v2226_v49 = vmul.f32 %v6419_v41, %v6432_v0  ;;  %v1876_v50 = vpop.f32.mrb[2].mxu1 }
 0x216   :  { %v6422_v43 = vpop.f32.mrb[4].mxu0  ;;  %v2240_v53 = vadd.f32 %v2239_v38, %v2225_v46  ;;  %v1877_v58 = vpop.f32.mrb[3].mxu1 }
 0x217   :  { %v6430_v47 = vpop.f32.mrb[5].mxu0  ;;  %v2227_v61 = vmul.f32 %v6426_v45, %v6422_v43 }
 0x218   :  { %v1917_v30 = vpop.f32.mrb[6].mxu0  ;;  %v2241_v62 = vadd.f32 %v2240_v53, %v2226_v49  ;;  %v2228_v5 = vmul.f32 %v6438_v54, %v6430_v47  ;;  %v6490_v49 = vrot.slane %v83_v1, %v2169_v40 }
 0x219   :  { %v1918_v56 = vpop.f32.mrb[7].mxu0  ;;  %v6492_v30 = vrot.slane %v83_v1, %v2173_v52 }
 0x21a   :  { %v2242_v4 = vadd.f32 %v2241_v62, %v2227_v61 }
 0x21b   :  { %v6450_v51 = vpop.f32.mrb[4].mxu1 }
 0x21c   :  { %v2229_v59 = vmul.f32 %v6442_v63, %v6450_v51  ;;  %v2243_v60 = vadd.f32 %v2242_v4, %v2228_v5  ;;  %v6458_v36 = vpop.f32.mrb[5].mxu1 }
 0x21d   :  { %v2230_v7 = vmul.f32 %v6444_v2, %v6458_v36  ;;  %v1958_v9 = vpop.f32.mrb[6].mxu1 }
 0x21e   :  { %v6448_v48 = vpop.f32.mrb[8].mxu0  ;;  %v2244_v10 = vadd.f32 %v2243_v60, %v2229_v59  ;;  %v1959_v13 = vpop.f32.mrb[7].mxu1 }
 0x21f   :  { %v6456_v6 = vpop.f32.mrb[9].mxu0  ;;  %v2231_v14 = vmul.f32 %v6452_v55, %v6448_v48 }
 0x220   :  { %v1999_v8 = vpop.f32.mrb[10].mxu0  ;;  %v2245_v15 = vadd.f32 %v2244_v10, %v2230_v7  ;;  %v2232_v18 = vmul.f32 %v6462_v11, %v6456_v6 }
 0x221   :  { %v2000_v12 = vpop.f32.mrb[11].mxu0 }
 0x222   :  { %v2246_v19 = vadd.f32 %v2245_v15, %v2231_v14 }
 0x223   :  { %v6474_v3 = vpop.f32.mrb[8].mxu1 }
 0x224   :  { %v2233_v22 = vmul.f32 %v6466_v16, %v6474_v3  ;;  %v2247_v23 = vadd.f32 %v2246_v19, %v2232_v18  ;;  %v6482_v25 = vpop.f32.mrb[9].mxu1 }
 0x225   :  { %v2234_v28 = vmul.f32 %v6468_v17, %v6482_v25  ;;  %v2040_v32 = vpop.f32.mrb[10].mxu1 }
 0x226   :  { %v6472_v20 = vpop.f32.mrb[12].mxu0  ;;  %v2248_v33 = vadd.f32 %v2247_v23, %v2233_v22  ;;  %v2041_v38 = vpop.f32.mrb[11].mxu1 }
 0x227   :  { %v6480_v24 = vpop.f32.mrb[13].mxu0  ;;  %v2235_v39 = vmul.f32 %v6476_v21, %v6472_v20 }
 0x228   :  { %v2081_v31 = vpop.f32.mrb[14].mxu0  ;;  %v2249_v46 = vadd.f32 %v2248_v33, %v2234_v28  ;;  %v2236_v50 = vmul.f32 %v6486_v35, %v6480_v24 }
 0x229   :  { %v2082_v37 = vpop.f32.mrb[15].mxu0 }
 0x22a   :  { %v2250_v53 = vadd.f32 %v2249_v46, %v2235_v39 }
 0x22b   :  { %v6496_v56 = vpop.f32.mrb[12].mxu1 }
 0x22c   :  { %v2237_v42 = vmul.f32 %v6490_v49, %v6496_v56  ;;  %v6500_v58 = vpop.f32.mrb[13].mxu1  ;;  %v2251_v61 = vadd.f32 %v2250_v53, %v2236_v50 }
 0x22d   :  { %v2238_v62 = vmul.f32 %v6492_v30, %v6500_v58  ;;  %v2122_v5 = vpop.f32.mrb[14].mxu1 }
 0x22e   :  { %v2123_v40 = vpop.f32.mrb[15].mxu1  ;;  %v2252_v4 = vadd.f32 %v2251_v61, %v2237_v42 }
 0x230   :  { %v2253_v52 = vadd.f32 %v2252_v4, %v2238_v62 }
 0x232   :  { %2254 = vadd.xlane.f32.xlu0 %v2253_v52 }
 0x26e   :  { %v6504_v1 = vpop.f32.mrb[16].mxu0 }
 0x26f   :  { %v4470_v59 = vmul.f32 %v6504_v1, %v6402_v26  ;;  %v6508_v60 = vpop.f32.mrb[17].mxu0 }
 0x270   :  { %v4471_v7 = vmul.f32 %v6508_v60, %v6404_v27  ;;  %v4164_v8 = vpop.f32.mrb[18].mxu0 }
 0x271   :  { %v4165_v9 = vpop.f32.mrb[19].mxu0 }
 0x272   :  { %v4486_v10 = vadd.f32 %v4471_v7, %v4470_v59 }
 0x273   :  { %v6514_v13 = vpop.f32.mrb[16].mxu1 }
 0x274   :  { %v4472_v14 = vmul.f32 %v6514_v13, %v6417_v34  ;;  %v6520_v18 = vpop.f32.mrb[17].mxu1 }
 0x275   :  { %v4473_v19 = vmul.f32 %v6520_v18, %v6419_v41  ;;  %v4205_v23 = vpop.f32.mrb[18].mxu1 }
 0x276   :  { %v6512_v12 = vpop.f32.mrb[20].mxu0  ;;  %v4487_v28 = vadd.f32 %v4486_v10, %v4472_v14  ;;  %v4206_v32 = vpop.f32.mrb[19].mxu1 }
 0x277   :  { %v6518_v15 = vpop.f32.mrb[21].mxu0  ;;  %v4474_v33 = vmul.f32 %v6512_v12, %v6426_v45 }
 0x278   :  { %v4246_v22 = vpop.f32.mrb[22].mxu0  ;;  %v4488_v37 = vadd.f32 %v4487_v28, %v4473_v19  ;;  %v4475_v38 = vmul.f32 %v6518_v15, %v6438_v54 }
 0x279   :  { %v4247_v31 = vpop.f32.mrb[23].mxu0 }
 0x27a   :  { %v4489_v39 = vadd.f32 %v4488_v37, %v4474_v33 }
 0x27b   :  { %v6530_v50 = vpop.f32.mrb[20].mxu1 }
 0x27c   :  { %v4476_v53 = vmul.f32 %v6530_v50, %v6442_v63  ;;  %v4490_v42 = vadd.f32 %v4489_v39, %v4475_v38  ;;  %v6536_v62 = vpop.f32.mrb[21].mxu1 }
 0x27d   :  { %v4477_v5 = vmul.f32 %v6536_v62, %v6444_v2  ;;  %v4287_v4 = vpop.f32.mrb[22].mxu1 }
 0x27e   :  { %v6528_v46 = vpop.f32.mrb[24].mxu0  ;;  %v4491_v52 = vadd.f32 %v4490_v42, %v4476_v53  ;;  %v4288_v7 = vpop.f32.mrb[23].mxu1 }
 0x27f   :  { %v6534_v61 = vpop.f32.mrb[25].mxu0  ;;  %v4478_v8 = vmul.f32 %v6528_v46, %v6452_v55 }
 0x280   :  { %v4328_v40 = vpop.f32.mrb[26].mxu0  ;;  %v4492_v9 = vadd.f32 %v4491_v52, %v4477_v5  ;;  %v4479_v10 = vmul.f32 %v6534_v61, %v6462_v11 }
 0x281   :  { %v4329_v59 = vpop.f32.mrb[27].mxu0 }
 0x282   :  { %v4493_v14 = vadd.f32 %v4492_v9, %v4478_v8 }
 0x283   :  { %v6546_v22 = vpop.f32.mrb[24].mxu1 }
 0x284   :  { %v4480_v23 = vmul.f32 %v6546_v22, %v6466_v16  ;;  %v4494_v28 = vadd.f32 %v4493_v14, %v4479_v10  ;;  %v6552_v32 = vpop.f32.mrb[25].mxu1 }
 0x285   :  { %v4481_v33 = vmul.f32 %v6552_v32, %v6468_v17  ;;  %v4369_v38 = vpop.f32.mrb[26].mxu1 }
 0x286   :  { %v6544_v19 = vpop.f32.mrb[28].mxu0  ;;  %v4495_v39 = vadd.f32 %v4494_v28, %v4480_v23  ;;  %v4370_v42 = vpop.f32.mrb[27].mxu1 }
 0x287   :  { %v6550_v31 = vpop.f32.mrb[29].mxu0  ;;  %v4482_v5 = vmul.f32 %v6544_v19, %v6476_v21 }
 0x288   :  { %v4410_v37 = vpop.f32.mrb[30].mxu0  ;;  %v4496_v40 = vadd.f32 %v4495_v39, %v4481_v33  ;;  %v4483_v4 = vmul.f32 %v6550_v31, %v6486_v35 }
 0x289   :  { %v4411_v53 = vpop.f32.mrb[31].mxu0 }
 0x28a   :  { %v4497_v52 = vadd.f32 %v4496_v40, %v4482_v5 }
 0x28b   :  { %v6560_v59 = vpop.f32.mrb[28].mxu1 }
 0x28c   :  { %v4484_v7 = vmul.f32 %v6560_v59, %v6490_v49  ;;  %v6564_v8 = vpop.f32.mrb[29].mxu1  ;;  %v4498_v9 = vadd.f32 %v4497_v52, %v4483_v4 }
 0x28d   :  { %v4485_v10 = vmul.f32 %v6564_v8, %v6492_v30  ;;  %v4451_v14 = vpop.f32.mrb[30].mxu1 }
 0x28e   :  { %v4452_v23 = vpop.f32.mrb[31].mxu1  ;;  %v4499_v28 = vadd.f32 %v4498_v9, %v4484_v7 }
 0x290   :  { %v4500_v37 = vadd.f32 %v4499_v28, %v4485_v10 }
 0x292   :  { %4501 = vadd.xlane.f32.xlu1 %v4500_v37 }
 0x2bf   :  { %v2255_v33 = vpop.xlane.xlu0 %2254 }
 0x2c0   :  { %v2256_v38 = vmul.f32 0.00390625, %v2255_v33 }
 0x2c2   :  { %v6569_v39 = vsub.f32 %v6406_v57, %v2256_v38  ;;  %v6572_v53 = vsub.f32 %v6410_v29, %v2256_v38  ;;  %v6575_v42 = vsub.f32 %v6424_v44, %v2256_v38  ;;  %v6582_v4 = vsub.f32 %v6432_v0, %v2256_v38 }
 0x2c3   :  { %v6585_v52 = vsub.f32 %v6422_v43, %v2256_v38  ;;  %v6590_v44 = vsub.f32 %v6430_v47, %v2256_v38  ;;  %v6595_v10 = vsub.f32 %v6450_v51, %v2256_v38  ;;  %v6600_v23 = vsub.f32 %v6458_v36, %v2256_v38 }
 0x2c4   :  { %v2273_v5 = vmul.f32 %v6569_v39, %v6402_v26  ;;  %v2274_v40 = vmul.f32 %v6572_v53, %v6404_v27  ;;  %v2275_v57 = vmul.f32 %v6575_v42, %v6417_v34  ;;  %v2276_v9 = vmul.f32 %v6582_v4, %v6419_v41 }
 0x2c5   :  { %6783 = vst [vmem:[#allocation13_spill] sm:$0xff] %v6585_v52  ;;  %v2277_v0 = vmul.f32 %v6585_v52, %v6426_v45  ;;  %v2278_v28 = vmul.f32 %v6590_v44, %v6438_v54  ;;  %v6605_v33 = vsub.f32 %v6448_v48, %v2256_v38  ;;  %v2279_v51 = vmul.f32 %v6595_v10, %v6442_v63 }
 0x2c6   :  { %v2289_v29 = vmul.f32 %v2273_v5, %v2273_v5  ;;  %v2290_v7 = vmul.f32 %v2274_v40, %v2274_v40  ;;  %v2291_v14 = vmul.f32 %v2275_v57, %v2275_v57  ;;  %v2292_v37 = vmul.f32 %v2276_v9, %v2276_v9 }
 0x2c7   :  { %v2293_v5 = vmul.f32 %v2277_v0, %v2277_v0  ;;  %v6610_v52 = vsub.f32 %v6456_v6, %v2256_v38  ;;  %v2280_v36 = vmul.f32 %v6600_v23, %v6444_v2  ;;  %v2294_v57 = vmul.f32 %v2278_v28, %v2278_v28 }
 0x2c8   :  { %v2305_v43 = vadd.f32 %v2290_v7, %v2289_v29  ;;  %v6615_v7 = vsub.f32 %v6474_v3, %v2256_v38  ;;  %v2281_v48 = vmul.f32 %v6605_v33, %v6452_v55  ;;  %v2295_v9 = vmul.f32 %v2279_v51, %v2279_v51 }
 0x2c9   :  { %v2282_v6 = vmul.f32 %v6610_v52, %v6462_v11  ;;  %v2296_v0 = vmul.f32 %v2280_v36, %v2280_v36 }
 0x2ca   :  { %v2306_v47 = vadd.f32 %v2305_v43, %v2291_v14  ;;  %v6620_v43 = vsub.f32 %v6482_v25, %v2256_v38  ;;  %v2283_v3 = vmul.f32 %v6615_v7, %v6466_v16  ;;  %v2297_v28 = vmul.f32 %v2281_v48, %v2281_v48 }
 0x2cb   :  { %v2298_v51 = vmul.f32 %v2282_v6, %v2282_v6 }
 0x2cc   :  { %v2307_v40 = vadd.f32 %v2306_v47, %v2292_v37  ;;  %6784 = vst [vmem:[#allocation14_spill] sm:$0xff] %v6620_v43  ;;  %v6625_v47 = vsub.f32 %v6472_v20, %v2256_v38  ;;  %v2284_v25 = vmul.f32 %v6620_v43, %v6468_v17  ;;  %v2299_v36 = vmul.f32 %v2283_v3, %v2283_v3 }
 0x2ce   :  { %v2308_v29 = vadd.f32 %v2307_v40, %v2293_v5  ;;  %6785 = vst [vmem:[#allocation15_spill] sm:$0xff] %v6625_v47  ;;  %v6630_v40 = vsub.f32 %v6480_v24, %v2256_v38  ;;  %v2285_v20 = vmul.f32 %v6625_v47, %v6476_v21  ;;  %v2300_v48 = vmul.f32 %v2284_v25, %v2284_v25 }
 0x2d0   :  { %v2309_v14 = vadd.f32 %v2308_v29, %v2294_v57  ;;  %6786 = vst [vmem:[#allocation16_spill] sm:$0xff] %v6630_v40  ;;  %v6635_v29 = vsub.f32 %v6496_v56, %v2256_v38  ;;  %v2286_v24 = vmul.f32 %v6630_v40, %v6486_v35 }
 0x2d2   :  { %v2310_v37 = vadd.f32 %v2309_v14, %v2295_v9  ;;  %v6640_v14 = vsub.f32 %v6500_v58, %v2256_v38  ;;  %v2287_v6 = vmul.f32 %v6635_v29, %v6490_v49 }
 0x2d4   :  { %v2311_v5 = vadd.f32 %v2310_v37, %v2296_v0  ;;  %v2301_v37 = vmul.f32 %v2285_v20, %v2285_v20  ;;  %v2288_v56 = vmul.f32 %v6640_v14, %v6492_v30  ;;  %v2303_v3 = vmul.f32 %v2287_v6, %v2287_v6 }
 0x2d6   :  { %v2312_v57 = vadd.f32 %v2311_v5, %v2297_v28  ;;  %v2302_v5 = vmul.f32 %v2286_v24, %v2286_v24 }
 0x2d8   :  { %v2313_v9 = vadd.f32 %v2312_v57, %v2298_v51  ;;  %v2304_v57 = vmul.f32 %v2288_v56, %v2288_v56 }
 0x2da   :  { %v2314_v0 = vadd.f32 %v2313_v9, %v2299_v36 }
 0x2dc   :  { %v2315_v28 = vadd.f32 %v2314_v0, %v2300_v48 }
 0x2de   :  { %v2316_v47 = vadd.f32 %v2315_v28, %v2301_v37 }
 0x2e0   :  { %v2317_v51 = vadd.f32 %v2316_v47, %v2302_v5 }
 0x2e2   :  { %v2318_v58 = vadd.f32 %v2317_v51, %v2303_v3 }
 0x2e4   :  { %v2319_v38 = vadd.f32 %v2318_v58, %v2304_v57 }
 0x2e6   :  { %2320 = vadd.xlane.f32.xlu0 %v2319_v38 }
 0x31f   :  { %v4502_v43 = vpop.xlane.xlu1 %4501 }
 0x320   :  { %v4503_v40 = vmul.f32 0.00390625, %v4502_v43 }
 0x322   :  { %v6649_v25 = vsub.f32 %v6504_v1, %v4503_v40  ;;  %v6652_v36 = vsub.f32 %v6508_v60, %v4503_v40  ;;  %v6655_v20 = vsub.f32 %v6514_v13, %v4503_v40  ;;  %v6662_v24 = vsub.f32 %v6520_v18, %v4503_v40 }
 0x323   :  { %v6665_v43 = vsub.f32 %v6512_v12, %v4503_v40  ;;  %v6670_v13 = vsub.f32 %v6518_v15, %v4503_v40  ;;  %v6675_v0 = vsub.f32 %v6530_v50, %v4503_v40  ;;  %v6680_v6 = vsub.f32 %v6536_v62, %v4503_v40 }
 0x324   :  { %v4520_v9 = vmul.f32 %v6649_v25, %v6402_v26  ;;  %v4521_v47 = vmul.f32 %v6652_v36, %v6404_v27  ;;  %v4522_v1 = vmul.f32 %v6655_v20, %v6417_v34  ;;  %v4523_v26 = vmul.f32 %v6662_v24, %v6419_v41 }
 0x325   :  { %v4524_v27 = vmul.f32 %v6665_v43, %v6426_v45  ;;  %v4525_v34 = vmul.f32 %v6670_v13, %v6438_v54  ;;  %v6685_v28 = vsub.f32 %v6528_v46, %v4503_v40  ;;  %v4526_v41 = vmul.f32 %v6675_v0, %v6442_v63 }
 0x326   :  { %v4536_v60 = vmul.f32 %v4520_v9, %v4520_v9  ;;  %v4537_v48 = vmul.f32 %v4521_v47, %v4521_v47  ;;  %v4538_v18 = vmul.f32 %v4522_v1, %v4522_v1  ;;  %v4539_v37 = vmul.f32 %v4523_v26, %v4523_v26 }
 0x327   :  { %v4540_v50 = vmul.f32 %v4524_v27, %v4524_v27  ;;  %v6690_v45 = vsub.f32 %v6534_v61, %v4503_v40  ;;  %v4527_v62 = vmul.f32 %v6680_v6, %v6444_v2  ;;  %v4541_v5 = vmul.f32 %v4525_v34, %v4525_v34 }
 0x328   :  { %v4552_v12 = vadd.f32 %v4537_v48, %v4536_v60  ;;  %v6695_v54 = vsub.f32 %v6546_v22, %v4503_v40  ;;  %v4528_v46 = vmul.f32 %v6685_v28, %v6452_v55  ;;  %v4542_v51 = vmul.f32 %v4526_v41, %v4526_v41 }
 0x329   :  { %v6700_v63 = vsub.f32 %v6552_v32, %v4503_v40  ;;  %v4529_v61 = vmul.f32 %v6690_v45, %v6462_v11  ;;  %v4543_v58 = vmul.f32 %v4527_v62, %v4527_v62  ;;  %v6705_v2 = vsub.f32 %v6544_v19, %v4503_v40 }
 0x32a   :  { %v4553_v15 = vadd.f32 %v4552_v12, %v4538_v18  ;;  %v4530_v22 = vmul.f32 %v6695_v54, %v6466_v16  ;;  %v4544_v9 = vmul.f32 %v4528_v46, %v4528_v46  ;;  %v6710_v55 = vsub.f32 %v6550_v31, %v4503_v40 }
 0x32b   :  { %v4531_v32 = vmul.f32 %v6700_v63, %v6468_v17  ;;  %v4545_v1 = vmul.f32 %v4529_v61, %v4529_v61  ;;  %v6715_v11 = vsub.f32 %v6560_v59, %v4503_v40  ;;  %v4532_v19 = vmul.f32 %v6705_v2, %v6476_v21 }
 0x32c   :  { %v4554_v56 = vadd.f32 %v4553_v15, %v4539_v37  ;;  %v4546_v48 = vmul.f32 %v4530_v22, %v4530_v22  ;;  %v6720_v16 = vsub.f32 %v6564_v8, %v4503_v40  ;;  %v4533_v31 = vmul.f32 %v6710_v55, %v6486_v35 }
 0x32d   :  { %v4547_v27 = vmul.f32 %v4531_v32, %v4531_v32  ;;  %v4534_v17 = vmul.f32 %v6715_v11, %v6490_v49  ;;  %v4548_v12 = vmul.f32 %v4532_v19, %v4532_v19  ;;  %v6789_v32 = vld [vmem:[#allocation15_spill] sm:$0xff] }
 0x32e   :  { %v4555_v3 = vadd.f32 %v4554_v56, %v4540_v50  ;;  %v4535_v59 = vmul.f32 %v6720_v16, %v6492_v30  ;;  %v4549_v37 = vmul.f32 %v4533_v31, %v4533_v31 }
 0x32f   :  { %v4550_v15 = vmul.f32 %v4534_v17, %v4534_v17 }
 0x330   :  { %v4556_v57 = vadd.f32 %v4555_v3, %v4541_v5  ;;  %v4551_v50 = vmul.f32 %v4535_v59, %v4535_v59 }
 0x332   :  { %v4557_v38 = vadd.f32 %v4556_v57, %v4542_v51  ;;  %v6787_v51 = vld [vmem:[#allocation13_spill] sm:$0xff] }
 0x334   :  { %v4558_v47 = vadd.f32 %v4557_v38, %v4543_v58 }
 0x336   :  { %v4559_v60 = vadd.f32 %v4558_v47, %v4544_v9  ;;  %v6788_v47 = vld [vmem:[#allocation14_spill] sm:$0xff] }
 0x338   :  { %v4560_v26 = vadd.f32 %v4559_v60, %v4545_v1  ;;  %v6790_v1 = vld [vmem:[#allocation16_spill] sm:$0xff] }
 0x33a   :  { %v4561_v18 = vadd.f32 %v4560_v26, %v4546_v48 }
 0x33c   :  { %v4562_v34 = vadd.f32 %v4561_v18, %v4547_v27 }
 0x33e   :  { %v4563_v21 = vadd.f32 %v4562_v34, %v4548_v12 }
 0x340   :  { %v4564_v41 = vadd.f32 %v4563_v21, %v4549_v37 }
 0x342   :  { %v4565_v8 = vadd.f32 %v4564_v41, %v4550_v15 }
 0x344   :  { %v4566_v40 = vadd.f32 %v4565_v8, %v4551_v50 }
 0x346   :  { %4567 = vadd.xlane.f32.xlu0 %v4566_v40 }
 0x373   :  { %v2321_v56 = vpop.xlane.xlu0 %2320 }
 0x374   :  { %v2322_v35 = vmul.f32 0.00390625, %v2321_v56 }
 0x376   :  { %v2323_v62 = vadd.f32 1e-05, %v2322_v35 }
 0x378   :  { %5513 = vrsqrt.f32 %v2323_v62 }
 0x382   :  { %v5514_v5 = vpop.eup %5513 }
 0x383   :  { %v2325_v49 = vmul.f32 %v5514_v5, %v6569_v39  ;;  %v2326_v3 = vmul.f32 %v5514_v5, %v6572_v53  ;;  %v2327_v46 = vmul.f32 %v5514_v5, %v6575_v42  ;;  %v2328_v30 = vmul.f32 %v5514_v5, %v6582_v4 }
 0x384   :  { %v2329_v57 = vmul.f32 %v5514_v5, %v6787_v51  ;;  %v2330_v61 = vmul.f32 %v5514_v5, %v6590_v44  ;;  %v2331_v58 = vmul.f32 %v5514_v5, %v6595_v10  ;;  %v2332_v38 = vmul.f32 %v5514_v5, %v6600_v23 }
 0x385   :  { %v2333_v22 = vmul.f32 %v5514_v5, %v6605_v33  ;;  %v2334_v9 = vmul.f32 %v5514_v5, %v6610_v52  ;;  %v2335_v39 = vmul.f32 %v5514_v5, %v6615_v7  ;;  %v2336_v53 = vmul.f32 %v5514_v5, %v6788_v47 }
 0x386   :  { %v2337_v42 = vmul.f32 %v5514_v5, %v6789_v32  ;;  %v2338_v4 = vmul.f32 %v5514_v5, %v6790_v1  ;;  %v2339_v60 = vmul.f32 %v5514_v5, %v6635_v29  ;;  %v2340_v44 = vmul.f32 %v5514_v5, %v6640_v14 }
 0x387   :  { %v2341_v19 = vmax.f32 %v2325_v49, 0.0  ;;  %v2342_v10 = vmax.f32 %v2326_v3, 0.0  ;;  %v2343_v48 = vmax.f32 %v2327_v46, 0.0  ;;  %v2344_v23 = vmax.f32 %v2328_v30, 0.0 }
 0x388   :  { %v2345_v26 = vmax.f32 %v2329_v57, 0.0  ;;  %v2346_v33 = vmax.f32 %v2330_v61, 0.0  ;;  %v2347_v31 = vmax.f32 %v2331_v58, 0.0  ;;  %v2348_v52 = vmax.f32 %v2332_v38, 0.0 }
 0x389   :  { %v2349_v27 = vmax.f32 %v2333_v22, 0.0  ;;  %v2350_v7 = vmax.f32 %v2334_v9, 0.0  ;;  %v2351_v18 = vmax.f32 %v2335_v39, 0.0  ;;  %v2352_v17 = vmax.f32 %v2336_v53, 0.0 }
 0x38a   :  { %v2353_v12 = vmax.f32 %v2337_v42, 0.0  ;;  %v2354_v34 = vmax.f32 %v2338_v4, 0.0  ;;  %v2355_v59 = vmax.f32 %v2339_v60, 0.0  ;;  %v2356_v37 = vmax.f32 %v2340_v44, 0.0 }
 0x38b   :  { %v5137_v21 = vpack.c.bf16 %v2342_v10, %v2341_v19  ;;  %v5138_v29 = vpack.c.bf16 %v2344_v23, %v2343_v48  ;;  %v5139_v15 = vpack.c.bf16 %v2346_v33, %v2345_v26  ;;  %v5140_v14 = vpack.c.bf16 %v2348_v52, %v2347_v31 }
 0x38c   :  { %v5141_v41 = vpack.c.bf16 %v2350_v7, %v2349_v27  ;;  %v5142_v50 = vpack.c.bf16 %v2352_v17, %v2351_v18  ;;  %v5143_v8 = vpack.c.bf16 %v2354_v34, %v2353_v12  ;;  %v5144_v40 = vpack.c.bf16 %v2356_v37, %v2355_v59 }
 0x38d   :  { %2421 = vst [vmem:[#allocation9] sm:$0xff] %v5137_v21  ;;  %2422 = vst [vmem:[#allocation9 + $0x8] sm:$0xff] %v5138_v29 }
 0x38e   :  { %2423 = vst [vmem:[#allocation9 + $0x10] sm:$0xff] %v5139_v15  ;;  %2424 = vst [vmem:[#allocation9 + $0x18] sm:$0xff] %v5140_v14 }
 0x38f   :  { %2425 = vst [vmem:[#allocation9 + $0x20] sm:$0xff] %v5141_v41  ;;  %2426 = vst [vmem:[#allocation9 + $0x28] sm:$0xff] %v5142_v50 }
 0x390   :  { %2427 = vst [vmem:[#allocation9 + $0x30] sm:$0xff] %v5143_v8  ;;  %2428 = vst [vmem:[#allocation9 + $0x38] sm:$0xff] %v5144_v40 }
 0x3d3   :  { %v4568_v56 = vpop.xlane.xlu0 %4567 }
 0x3d4   :  { %v4569_v35 = vmul.f32 0.00390625, %v4568_v56 }
 0x3d6   :  { %v4570_v62 = vadd.f32 1e-05, %v4569_v35 }
 0x3d8   :  { %5515 = vrsqrt.f32 %v4570_v62 }
 0x3e2   :  { %v5516_v5 = vpop.eup %5515 }
 0x3e3   :  { %v4572_v49 = vmul.f32 %v5516_v5, %v6649_v25  ;;  %v4573_v3 = vmul.f32 %v5516_v5, %v6652_v36  ;;  %v4574_v46 = vmul.f32 %v5516_v5, %v6655_v20  ;;  %v4575_v30 = vmul.f32 %v5516_v5, %v6662_v24 }
 0x3e4   :  { %v4576_v51 = vmul.f32 %v5516_v5, %v6665_v43  ;;  %v4577_v57 = vmul.f32 %v5516_v5, %v6670_v13  ;;  %v4578_v61 = vmul.f32 %v5516_v5, %v6675_v0  ;;  %v4579_v58 = vmul.f32 %v5516_v5, %v6680_v6 }
 0x3e5   :  { %v4580_v38 = vmul.f32 %v5516_v5, %v6685_v28  ;;  %v4581_v22 = vmul.f32 %v5516_v5, %v6690_v45  ;;  %v4582_v25 = vmul.f32 %v5516_v5, %v6695_v54  ;;  %v4583_v36 = vmul.f32 %v5516_v5, %v6700_v63 }
 0x3e6   :  { %v4584_v20 = vmul.f32 %v5516_v5, %v6705_v2  ;;  %v4585_v24 = vmul.f32 %v5516_v5, %v6710_v55  ;;  %v4586_v43 = vmul.f32 %v5516_v5, %v6715_v11  ;;  %v4587_v13 = vmul.f32 %v5516_v5, %v6720_v16 }
 0x3e7   :  { %v4588_v9 = vmax.f32 %v4572_v49, 0.0  ;;  %v4589_v0 = vmax.f32 %v4573_v3, 0.0  ;;  %v4590_v39 = vmax.f32 %v4574_v46, 0.0  ;;  %v4591_v6 = vmax.f32 %v4575_v30, 0.0 }
 0x3e8   :  { %v4592_v47 = vmax.f32 %v4576_v51, 0.0  ;;  %v4593_v28 = vmax.f32 %v4577_v57, 0.0  ;;  %v4594_v53 = vmax.f32 %v4578_v61, 0.0  ;;  %v4595_v45 = vmax.f32 %v4579_v58, 0.0 }
 0x3e9   :  { %v4596_v32 = vmax.f32 %v4580_v38, 0.0  ;;  %v4597_v54 = vmax.f32 %v4581_v22, 0.0  ;;  %v4598_v42 = vmax.f32 %v4582_v25, 0.0  ;;  %v4599_v63 = vmax.f32 %v4583_v36, 0.0 }
 0x3ea   :  { %v4600_v2 = vmax.f32 %v4584_v20, 0.0  ;;  %v4601_v55 = vmax.f32 %v4585_v24, 0.0  ;;  %v4602_v1 = vmax.f32 %v4586_v43, 0.0  ;;  %v4603_v11 = vmax.f32 %v4587_v13, 0.0 }
 0x3eb   :  { %v5191_v4 = vpack.c.bf16 %v4589_v0, %v4588_v9  ;;  %v5192_v16 = vpack.c.bf16 %v4591_v6, %v4590_v39  ;;  %v5193_v60 = vpack.c.bf16 %v4593_v28, %v4592_v47  ;;  %v5194_v44 = vpack.c.bf16 %v4595_v45, %v4594_v53 }
 0x3ec   :  { %v5195_v19 = vpack.c.bf16 %v4597_v54, %v4596_v32  ;;  %v5196_v10 = vpack.c.bf16 %v4599_v63, %v4598_v42  ;;  %v5197_v48 = vpack.c.bf16 %v4601_v55, %v4600_v2  ;;  %v5198_v23 = vpack.c.bf16 %v4603_v11, %v4602_v1 }
 0x3ed   :  { %4669 = vst [vmem:[#allocation9 + $0x40] sm:$0xff] %v5191_v4  ;;  %4670 = vst [vmem:[#allocation9 + $0x48] sm:$0xff] %v5192_v16 }
 0x3ee   :  { %4671 = vst [vmem:[#allocation9 + $0x50] sm:$0xff] %v5193_v60  ;;  %4672 = vst [vmem:[#allocation9 + $0x58] sm:$0xff] %v5194_v44 }
 0x3ef   :  { %4673 = vst [vmem:[#allocation9 + $0x60] sm:$0xff] %v5195_v19  ;;  %4674 = vst [vmem:[#allocation9 + $0x68] sm:$0xff] %v5196_v10 }
 0x3f0   :  { %4675 = vst [vmem:[#allocation9 + $0x70] sm:$0xff] %v5197_v48  ;;  %4676 = vst [vmem:[#allocation9 + $0x78] sm:$0xff] %v5198_v23 }
 0x3f1   :  { %5595 = shalt.err (!%p5592_p0)
}
 0x3f2   :  { %s5596_s0 = scalar_lea.hbm %s6776_s3, 2048 }
 0x3f3   :  { %p5597_p1 = scmp.ne.s32.totalorder %s6776_s3, %s5596_s0  ;;  %p5600_p2 = scmp.lt.u32.totalorder %s5596_s0, %s6776_s3 }
 0x3f5   :  { %p5602_p3 = pnand %p5600_p2, %p5597_p1 }
 0x3f7   :  { %5605 = shalt.err (!%p5602_p3)
}
 0x3f8   :  { %s5643_s26 = smov 1024  }
 0x3f9   :  { %4688 = dma.vmem_to_hbm [thread:$0]  %s4683_s18, 2048, %s6776_s3, [#allocation5], %s5643_s26, %s5643_s26, %s5613_s22  }
 0x3fa   :  { %5610 = dma.done.wait [#allocation5], 2048  }
 0x3fb   :  { %5611 = vsyncadd [#allocation5], 4294965248 }
 0x3fc   :  { %4692 = vsyncpa [#allocation4], 1 }
 0x3fd   :  { %4693 = vsyncpa [#allocation7], 1 }
 0x3fe   :  { %4694 = vsyncpa [#allocation5], 1 }

</bundles_post_ra>
